<compile_context>
chip_gen: v7x
topology: tpu7x:2x2x1
jax: 0.10.0
libtpu: 0.0.40
codegen_flags: <defaults>
</compile_context>

<pallas_src>
import functools
import numpy as np
import jax
import jax.numpy as jnp
from jax.experimental import pallas as pl
from jax.experimental.pallas import tpu as pltpu


# ----------------------------------------------------------------------------
# small helpers
# ----------------------------------------------------------------------------
def _round_up(x, m):
    return (x + m - 1) // m * m


# ----------------------------------------------------------------------------
# Pallas kernel: tiled matmul with fused (+bias, ReLU) epilogue
# ----------------------------------------------------------------------------
def _mm_bias_kernel(x_ref, w_ref, b_ref, o_ref, acc_ref, *, relu):
    @pl.when(pl.program_id(2) == 0)
    def _():
        acc_ref[...] = jnp.zeros_like(acc_ref)

    acc_ref[...] += jnp.dot(x_ref[...], w_ref[...],
                            preferred_element_type=jnp.float32)

    @pl.when(pl.program_id(2) == pl.num_programs(2) - 1)
    def _():
        y = acc_ref[...] + b_ref[...]
        if relu:
            y = jnp.maximum(y, 0.0)
        o_ref[...] = y.astype(o_ref.dtype)


def matmul_bias(x, w, bias, *, relu=False, out_dtype=jnp.bfloat16):
    """o = relu_opt(x @ w + bias).  w must be pre-cast bf16 with N a 128-multiple."""
    M, K = x.shape
    K2, Npad = w.shape
    assert K == K2 and Npad % 128 == 0

    tn = 256 if Npad % 256 == 0 else 128
    if M <= 512:
        Mpad = _round_up(M, 8)
        tm = Mpad
    else:
        tm = 512
        Mpad = _round_up(M, tm)
    # v7x: make sure the parallel tile grid has >= 2 tiles so both TCs get work.
    if (Mpad // tm) * (Npad // tn) < 2:
        if Npad // 128 >= 2:
            tn = 128
        elif Mpad >= 16 and (Mpad // 2) % 8 == 0:
            tm = Mpad // 2

    # K tiling: single full-extent K block when K <= 1024 (no K padding needed).
    if K <= 1024:
        Kpad, tk = K, K
    else:
        tk = 1024 if K % 1024 == 0 else 512
        Kpad = _round_up(K, tk)

    xb = x.astype(jnp.bfloat16)
    if Mpad != M or Kpad != K:
        xb = jnp.pad(xb, ((0, Mpad - M), (0, Kpad - K)))
    wb = w if Kpad == K else jnp.pad(w, ((0, Kpad - K), (0, 0)))
    bb = jnp.asarray(bias, jnp.float32).reshape(1, Npad)

    grid = (Mpad // tm, Npad // tn, Kpad // tk)
    out = pl.pallas_call(
        functools.partial(_mm_bias_kernel, relu=relu),
        out_shape=jax.ShapeDtypeStruct((Mpad, Npad), out_dtype),
        grid=grid,
        in_specs=[
            pl.BlockSpec((tm, tk), lambda i, j, k: (i, k)),
            pl.BlockSpec((tk, tn), lambda i, j, k: (k, j)),
            pl.BlockSpec((1, tn), lambda i, j, k: (0, j)),
        ],
        out_specs=pl.BlockSpec((tm, tn), lambda i, j, k: (i, j)),
        scratch_shapes=[pltpu.VMEM((tm, tn), jnp.float32)],
        compiler_params=pltpu.CompilerParams(
            dimension_semantics=("parallel", "parallel", "arbitrary")),
    )(xb, wb, bb)
    if Mpad != M:
        out = out[:M]
    return out


# ----------------------------------------------------------------------------
# Pallas kernel: fused 3x3 conv (stride 1, padding == dilation) — no im2col slab
# ----------------------------------------------------------------------------
def _conv3x3_kernel(x_ref, w_ref, b_ref, o_ref, *, dilation, ho, wo, relu):
    """x_ref:(1,Hp,Wp,C) padded image, w_ref:(9,C,tn), b_ref:(1,tn), o_ref:(1,ho,wo,tn)."""
    d = dilation
    cin = x_ref.shape[-1]
    tn = o_ref.shape[-1]
    acc = jnp.zeros((ho * wo, tn), jnp.float32)
    for ky in range(3):
        for kx in range(3):
            xt = x_ref[0, ky * d:ky * d + ho, kx * d:kx * d + wo, :]
            xt = xt.reshape(ho * wo, cin)          # wo % 16 == 0 -> layout-preserving
            acc = acc + jnp.dot(xt, w_ref[ky * 3 + kx],
                                preferred_element_type=jnp.float32)
    acc = acc + b_ref[...]
    if relu:
        acc = jnp.maximum(acc, 0.0)
    o_ref[0] = acc.reshape(ho, wo, tn).astype(o_ref.dtype)


def conv3x3_fused(x_nhwc, w9, bias, *, dilation=1, relu=True, out_dtype=jnp.bfloat16):
    """Conv2d(3x3, stride=1, padding=dilation, dilation=dilation) + folded BN + ReLU.

    The 9 im2col taps are folded into the kernel: per grid step the padded NHWC image
    is resident in VMEM and each tap is a static slice fed to the MXU.
    TODO(synk): add a channel (K) grid axis for very large C (real MobileNetV3 C=960).
    """
    N, H, W, C = x_nhwc.shape
    d = dilation
    assert w9.shape[0] == 9 and w9.shape[1] == C
    Ho, Wo = H, W                                   # "same" conv
    Wo_al = _round_up(Wo, 16)                       # aligned width (bf16 sublane packing)
    Hp, Wp = Ho + 2 * d, Wo_al + 2 * d
    xpad = jnp.pad(x_nhwc.astype(jnp.bfloat16),
                   ((0, 0), (d, d), (d, Wp - W - d), (0, 0)))

    Npad = w9.shape[-1]
    assert Npad % 128 == 0
    tn = 256 if Npad % 256 == 0 else 128
    if N * (Npad // tn) < 2 and tn == 256:          # v7x: feed both TensorCores
        tn = 128
    bias_row = jnp.asarray(bias, jnp.float32).reshape(1, Npad)

    out = pl.pallas_call(
        functools.partial(_conv3x3_kernel, dilation=d, ho=Ho, wo=Wo_al, relu=relu),
        out_shape=jax.ShapeDtypeStruct((N, Ho, Wo_al, Npad), out_dtype),
        grid=(N, Npad // tn),
        in_specs=[
            pl.BlockSpec((1, Hp, Wp, C), lambda n, j: (n, 0, 0, 0)),
            pl.BlockSpec((9, C, tn), lambda n, j: (0, 0, j)),
            pl.BlockSpec((1, tn), lambda n, j: (0, j)),
        ],
        out_specs=pl.BlockSpec((1, Ho, Wo_al, tn), lambda n, j: (n, 0, 0, j)),
        compiler_params=pltpu.CompilerParams(
            dimension_semantics=("parallel", "parallel")),
    )(xpad, w9, bias_row)
    return out[:, :, :Wo, :] if Wo_al != Wo else out


# ----------------------------------------------------------------------------
# Pallas kernel: fused ASPP concat + 1x1 projection with per-batch (pooled) bias
# ----------------------------------------------------------------------------
def _proj_kernel(*refs, n_terms, relu):
    x_refs = refs[:n_terms]
    w_refs = refs[n_terms:2 * n_terms]
    b_ref = refs[2 * n_terms]        # (1,1,tn) per-batch total bias (proj BN + pooled branch)
    o_ref = refs[2 * n_terms + 1]    # (1,ts,tn)
    acc = jnp.dot(x_refs[0][0], w_refs[0][...], preferred_element_type=jnp.float32)
    for i in range(1, n_terms):
        acc = acc + jnp.dot(x_refs[i][0], w_refs[i][...],
                            preferred_element_type=jnp.float32)
    acc = acc + b_ref[0]
    if relu:
        acc = jnp.maximum(acc, 0.0)
    o_ref[0] = acc.astype(o_ref.dtype)


def aspp_project(xs, ws, bias_nb, *, relu=True, out_dtype=jnp.bfloat16):
    """y[n,s,:] = relu(sum_i xs[i][n,s,:] @ ws[i] + bias_nb[n,:]) without concat(xs)."""
    n_terms = len(xs)
    N, S, _ = xs[0].shape
    Npad = ws[0].shape[1]
    assert Npad % 128 == 0

    if S <= 1024:
        Sp, ts = S, S
    else:
        ts = 1024
        Sp = _round_up(S, ts)
    tn = 256 if Npad % 256 == 0 else 128
    if N * max(Sp // ts, 1) * (Npad // tn) < 2 and tn == 256:
        tn = 128
    xs = [x if Sp == S else jnp.pad(x, ((0, 0), (0, Sp - S), (0, 0))) for x in xs]
    bias3 = bias_nb.astype(jnp.float32).reshape(N, 1, Npad)

    in_specs = ([pl.BlockSpec((1, ts, x.shape[2]), lambda n, s, j: (n, s, 0)) for x in xs]
                + [pl.BlockSpec((w.shape[0], tn), lambda n, s, j: (0, j)) for w in ws]
                + [pl.BlockSpec((1, 1, tn), lambda n, s, j: (n, 0, j))])
    out = pl.pallas_call(
        functools.partial(_proj_kernel, n_terms=n_terms, relu=relu),
        out_shape=jax.ShapeDtypeStruct((N, Sp, Npad), out_dtype),
        grid=(N, Sp // ts, Npad // tn),
        in_specs=in_specs,
        out_specs=pl.BlockSpec((1, ts, tn), lambda n, s, j: (n, s, j)),
        compiler_params=pltpu.CompilerParams(
            dimension_semantics=("parallel", "parallel", "parallel")),
    )(*xs, *ws, bias3)
    return out[:, :S, :] if Sp != S else out


# ----------------------------------------------------------------------------
# Pallas kernel: global average pool (NHWC), MXU ones-vector reduce
# ----------------------------------------------------------------------------
def _gap_kernel(x_ref, o_ref, *, inv_count):
    @pl.when(pl.program_id(1) == 0)
    def _():
        o_ref[...] = jnp.zeros_like(o_ref)

    x = x_ref[0]                                   # (ts, C) bf16
    ones = jnp.ones((1, x.shape[0]), x.dtype)
    o_ref[0] += jnp.dot(ones, x, preferred_element_type=jnp.float32)

    @pl.when(pl.program_id(1) == pl.num_programs(1) - 1)
    def _():
        o_ref[...] = o_ref[...] * inv_count


def global_avg_pool(x_nhwc):
    """AdaptiveAvgPool2d(1) in NHWC: (N,H,W,C) -> (N,C) float32."""
    N, H, W, C = x_nhwc.shape
    S = H * W
    x = x_nhwc.reshape(N, S, C)
    if S <= 2048:
        Sp, ts = S, S
    else:
        ts = 2048
        Sp = _round_up(S, ts)
        x = jnp.pad(x, ((0, 0), (0, Sp - S), (0, 0)))
    out = pl.pallas_call(
        functools.partial(_gap_kernel, inv_count=1.0 / float(S)),
        out_shape=jax.ShapeDtypeStruct((N, 1, C), jnp.float32),
        grid=(N, Sp // ts),
        in_specs=[pl.BlockSpec((1, ts, C), lambda n, t: (n, t, 0))],
        out_specs=pl.BlockSpec((1, 1, C), lambda n, t: (n, 0, 0)),
        compiler_params=pltpu.CompilerParams(
            dimension_semantics=("parallel", "arbitrary")),
    )(x)
    return out.reshape(N, C)


# ----------------------------------------------------------------------------
# Backbone stub conv (strided, tiny C) — lax.conv per perf review
# ----------------------------------------------------------------------------
def _stem_conv(x, w_hwio, b, *, stride):
    y = jax.lax.conv_general_dilated(
        x, w_hwio, window_strides=(stride, stride), padding=((1, 1), (1, 1)),
        dimension_numbers=('NHWC', 'HWIO', 'NHWC'),
        preferred_element_type=jnp.float32)
    return jnp.maximum(y + b, 0.0).astype(jnp.bfloat16)


# ----------------------------------------------------------------------------
# Bilinear-interpolation matrix (align_corners=False), exact separable form
# ----------------------------------------------------------------------------
def _interp_matrix(in_size, out_size):
    A = np.zeros((out_size, in_size), np.float32)
    if in_size == 1:
        A[:, 0] = 1.0
        return jnp.asarray(A)
    scale = in_size / out_size
    for i in range(out_size):
        src = max((i + 0.5) * scale - 0.5, 0.0)
        x0 = int(np.floor(src))
        x1 = min(x0 + 1, in_size - 1)
        lam = src - x0
        A[i, x0] += 1.0 - lam
        A[i, x1] += lam
    return jnp.asarray(A)


# ----------------------------------------------------------------------------
# Parameters (eval-mode BN folded; weights pre-cast bf16 / pre-padded lane-dense)
# ----------------------------------------------------------------------------
def _fold_bn(key, c, eps=1e-5):
    k1, k2 = jax.random.split(key)
    gamma = 1.0 + 0.1 * jax.random.normal(k1, (c,), jnp.float32)
    beta = 0.1 * jax.random.normal(k2, (c,), jnp.float32)
    running_mean = jnp.zeros((c,), jnp.float32)
    running_var = jnp.ones((c,), jnp.float32)
    scale = gamma * jax.lax.rsqrt(running_var + eps)
    bias = beta - running_mean * scale
    return scale, bias


def _w_conv1x1(key, cin, cout):
    return 0.1 * jax.random.normal(key, (cin, cout), jnp.float32)


def _w_conv3x3_tapmajor(key, cin, cout):
    # torch (cout,cin,3,3) -> (ky,kx,cin,cout) -> (9,cin,cout); centre tap = index 4.
    w = 0.1 * jax.random.normal(key, (cout, cin, 3, 3), jnp.float32)
    return jnp.transpose(w, (2, 3, 1, 0)).reshape(9, cin, cout)


def _w_conv3x3_hwio(key, cin, cout):
    w = 0.1 * jax.random.normal(key, (cout, cin, 3, 3), jnp.float32)
    return jnp.transpose(w, (2, 3, 1, 0))


def init_params(key, n_classes, in_ch=3, stem=16, out_inplanes=32, aspp_out=256):
    ks = iter(jax.random.split(key, 20))
    p = {}

    def conv_bn(maker, cin, cout, dtype):
        w = maker(next(ks), cin, cout)
        scale, bias = _fold_bn(next(ks), cout)
        return (w * scale).astype(dtype), bias         # BN scale folded into weight

    # backbone stub (stride 4 total)
    p['bb1'] = conv_bn(_w_conv3x3_hwio, in_ch, stem, jnp.bfloat16)
    p['bb2'] = conv_bn(_w_conv3x3_hwio, stem, out_inplanes, jnp.bfloat16)
    # ASPP branches
    p['aspp0'] = conv_bn(_w_conv1x1, out_inplanes, aspp_out, jnp.bfloat16)
    for r in (12, 24, 36):
        p[f'aspp{r}'] = conv_bn(_w_conv3x3_tapmajor, out_inplanes, aspp_out, jnp.bfloat16)
    p['aspp_pool'] = conv_bn(_w_conv1x1, out_inplanes, aspp_out, jnp.float32)
    # projection: rows [0:1024] for [1x1, r12, r24, r36], rows [1024:1280] for pooling
    wproj, bproj = conv_bn(_w_conv1x1, 5 * aspp_out, aspp_out, jnp.float32)
    p['proj_w'] = wproj[:4 * aspp_out].astype(jnp.bfloat16)
    p['proj_pool_w'] = wproj[4 * aspp_out:]
    p['proj_b'] = bproj
    # DeepLabHead tail
    p['head'] = conv_bn(_w_conv3x3_tapmajor, aspp_out, aspp_out, jnp.bfloat16)
    kcw, kcb = jax.random.split(next(ks))
    ncls_pad = _round_up(n_classes, 128)
    wcls = 0.1 * jax.random.normal(kcw, (aspp_out, n_classes), jnp.float32)
    bcls = 0.1 * jax.random.normal(kcb, (n_classes,), jnp.float32)
    p['cls'] = (jnp.pad(wcls, ((0, 0), (0, ncls_pad - n_classes))).astype(jnp.bfloat16),
                jnp.pad(bcls, (0, ncls_pad - n_classes)))
    return p


# ----------------------------------------------------------------------------
# Forward pass (== MobilNet3DeepLab3.forward, eval mode)
# ----------------------------------------------------------------------------
def mobilenet3_deeplab3_forward(params, x_nchw, n_classes):
    N, _, H, W = x_nchw.shape
    x = jnp.transpose(x_nchw, (0, 2, 3, 1)).astype(jnp.bfloat16)   # NCHW -> NHWC

    # --- backbone (stub) -> features['out'] ---
    x = _stem_conv(x, *params['bb1'], stride=2)
    feat = _stem_conv(x, *params['bb2'], stride=2)
    Nf, Hf, Wf, Cf = feat.shape
    S = Hf * Wf
    M = Nf * S
    feat2d = feat.reshape(M, Cf)

    aspp_out = 256
    rates = (12, 24, 36)
    wproj_main = params['proj_w']                      # (4*256, 256) bf16

    # Branches that are exactly 1x1 convs (plain 1x1 + degenerate dilated rates) merge
    # into ONE matmul; only non-degenerate dilated rates use the fused 3x3 kernel.
    merged_w = [params['aspp0'][0]]
    merged_b = [params['aspp0'][1]]
    merged_rows = [wproj_main[0:aspp_out]]
    general = []
    for bi, r in enumerate(rates, start=1):
        w9, b = params[f'aspp{r}']
        rows = wproj_main[bi * aspp_out:(bi + 1) * aspp_out]
        if r >= Hf and r >= Wf:
            # padding == dilation >= spatial size -> off-centre taps read only zeros.
            merged_w.append(w9[4])
            merged_b.append(b)
            merged_rows.append(rows)
        else:
            general.append((r, w9, b, rows))

    terms_x, terms_w = [], []
    wm = jnp.concatenate(merged_w, axis=1)             # (Cf, 256*k) bf16
    bm = jnp.concatenate(merged_b, axis=0)
    slab = matmul_bias(feat2d, wm, bm, relu=True)      # (M, 256*k) bf16
    terms_x.append(slab.reshape(Nf, S, -1))
    terms_w.append(jnp.concatenate(merged_rows, axis=0))
    # TODO(synk): when several rates are non-degenerate, merge them into one pallas_call
    #             (leading grid axis over branch) to reuse the resident feat tile.
    for r, w9, b, rows in general:
        yb = conv3x3_fused(feat, w9, b, dilation=r, relu=True)
        terms_x.append(yb.reshape(Nf, S, aspp_out))
        terms_w.append(rows)

    # ASPPPooling folded into the projection bias (1x1 bilinear resize == broadcast).
    pooled = global_avg_pool(feat)                                    # (N, Cf) f32
    wpool, bpool = params['aspp_pool']
    pooled_vec = jax.nn.relu(jnp.dot(pooled, wpool) + bpool)          # (N, 256) f32
    bias_total = params['proj_b'][None, :] + jnp.dot(pooled_vec, params['proj_pool_w'])

    # Fused concat + 1x1 projection (+BN, ReLU); Dropout(0.5) is identity in eval.
    yproj = aspp_project(terms_x, terms_w, bias_total, relu=True)     # (N, S, 256)
    yproj = yproj.reshape(Nf, Hf, Wf, aspp_out)

    # --- DeepLabHead tail: 3x3 conv (fused, d=1) + 1x1 classifier ---
    yhead = conv3x3_fused(yproj, *params['head'], dilation=1, relu=True)
    wcls, bcls = params['cls']
    ycls = matmul_bias(yhead.reshape(M, aspp_out), wcls, bcls, relu=False,
                       out_dtype=jnp.float32)                         # (M, 128) f32
    ycls = ycls.reshape(Nf, Hf, Wf, -1)[..., :n_classes]              # (N,Hf,Wf,ncls)

    # --- final bilinear upsample (align_corners=False), channel-first so the large W
    #     dimension rides the lane axis; produces NCHW directly (no big transpose). ---
    y = jnp.transpose(ycls, (0, 3, 1, 2))                             # small tensor
    Aw = _interp_matrix(Wf, W)                                        # (W, Wf)
    Ah = _interp_matrix(Hf, H)                                        # (H, Hf)
    y = jnp.einsum('qw,nchw->nchq', Aw, y)
    y = jnp.einsum('ph,nchq->ncpq', Ah, y)
    return y.astype(jnp.float32)                                      # (N, ncls, H, W)


if __name__ == "__main__":
    key = jax.random.PRNGKey(0)
    k_param, k_input = jax.random.split(key)

    n_classes = 3
    params = init_params(k_param, n_classes)
    x = jax.random.normal(k_input, (2, 3, 16, 16), jnp.float32)       # NCHW like PyTorch

    fwd = jax.jit(functools.partial(mobilenet3_deeplab3_forward, n_classes=n_classes))
    out = jax.block_until_ready(fwd(params, x))

    assert out.shape == (2, n_classes, 16, 16), out.shape
    assert bool(jnp.all(jnp.isfinite(out)))
    print("KERNEL_OK")
</pallas_src>

<mosaic_0001>
module attributes {stable_mosaic.version = 11 : i64} {
  func.func @_mm_bias_kernel(%arg0: i32, %arg1: i32, %arg2: i32, %arg3: memref<32x32xbf16, #tpu.memory_space<vmem>>, %arg4: memref<32x256xbf16, #tpu.memory_space<vmem>>, %arg5: memref<1x256xf32, #tpu.memory_space<vmem>>, %arg6: memref<32x256xbf16, #tpu.memory_space<vmem>>, %arg7: memref<32x256xf32, #tpu.memory_space<vmem>>) attributes {dimension_semantics = [#tpu.dimension_semantics<parallel>, #tpu.dimension_semantics<parallel>, #tpu.dimension_semantics<arbitrary>], iteration_bounds = array<i64: 1, 4, 1>, scalar_prefetch = 0 : i64, scratch_operands = 1 : i64, tpu.core_type = #tpu.core_type<tc>, window_params = [{transform_indices = @transform_0, window_bounds = array<i64: 32, 32>}, {transform_indices = @transform_1, window_bounds = array<i64: 32, 256>}, {transform_indices = @transform_2, window_bounds = array<i64: 1, 256>}, {transform_indices = @transform_3, window_bounds = array<i64: 32, 256>}]} {
    %c0_i32 = arith.constant 0 : i32
    %0 = arith.cmpi eq, %arg2, %c0_i32 : i32
    %1 = arith.extui %0 : i1 to i32
    %c0_i32_0 = arith.constant 0 : i32
    %2 = arith.cmpi ne, %1, %c0_i32_0 : i32
    scf.if %2 {
      %cst_10 = arith.constant 0.000000e+00 : f32
      %12 = vector.broadcast %cst_10 : f32 to vector<32x256xf32>
      %c0_11 = arith.constant 0 : index
      %c0_12 = arith.constant 0 : index
      %13 = vector.load %arg7[%c0_11, %c0_12] : memref<32x256xf32, #tpu.memory_space<vmem>>, vector<32x256xf32>
      tpu.vector_store %arg7[%c0_11, %c0_12], %12 {strides = array<i32>} : memref<32x256xf32, #tpu.memory_space<vmem>>, vector<32x256xf32>,
    } else {
    }
    %c0 = arith.constant 0 : index
    %c0_1 = arith.constant 0 : index
    %3 = vector.load %arg7[%c0, %c0_1] : memref<32x256xf32, #tpu.memory_space<vmem>>, vector<32x256xf32>
    %c0_2 = arith.constant 0 : index
    %c0_3 = arith.constant 0 : index
    %4 = vector.load %arg3[%c0_2, %c0_3] : memref<32x32xbf16, #tpu.memory_space<vmem>>, vector<32x32xbf16>
    %c0_4 = arith.constant 0 : index
    %c0_5 = arith.constant 0 : index
    %5 = vector.load %arg4[%c0_4, %c0_5] : memref<32x256xbf16, #tpu.memory_space<vmem>>, vector<32x256xbf16>
    %cst = arith.constant dense<0.000000e+00> : vector<32x256xf32>
    %6 = tpu.matmul %4, %5, %cst {dimension_numbers = #tpu.dot_dimension_numbers<[1], [0], [0], [1], [0, 0, 1, 1], [], []>} : vector<32x32xbf16>, vector<32x256xbf16>, vector<32x256xf32> -> vector<32x256xf32>
    %7 = arith.addf %3, %6 : vector<32x256xf32>
    %c0_6 = arith.constant 0 : index
    %c0_7 = arith.constant 0 : index
    %8 = vector.load %arg7[%c0_6, %c0_7] : memref<32x256xf32, #tpu.memory_space<vmem>>, vector<32x256xf32>
    tpu.vector_store %arg7[%c0_6, %c0_7], %7 {strides = array<i32>} : memref<32x256xf32, #tpu.memory_space<vmem>>, vector<32x256xf32>,
    %c0_i32_8 = arith.constant 0 : i32
    %9 = arith.cmpi eq, %arg2, %c0_i32_8 : i32
    %10 = arith.extui %9 : i1 to i32
    %c0_i32_9 = arith.constant 0 : i32
    %11 = arith.cmpi ne, %10, %c0_i32_9 : i32
    scf.if %11 {
      %c0_10 = arith.constant 0 : index
      %c0_11 = arith.constant 0 : index
      %12 = vector.load %arg7[%c0_10, %c0_11] : memref<32x256xf32, #tpu.memory_space<vmem>>, vector<32x256xf32>
      %c0_12 = arith.constant 0 : index
      %c0_13 = arith.constant 0 : index
      %13 = vector.load %arg5[%c0_12, %c0_13] : memref<1x256xf32, #tpu.memory_space<vmem>>, vector<1x256xf32>
      %14 = vector.broadcast %13 : vector<1x256xf32> to vector<32x256xf32>
      %15 = arith.addf %12, %14 : vector<32x256xf32>
      %cst_14 = arith.constant 0.000000e+00 : f32
      %16 = vector.broadcast %cst_14 : f32 to vector<32x256xf32>
      %17 = arith.maximumf %15, %16 : vector<32x256xf32>
      %18 = arith.truncf %17 : vector<32x256xf32> to vector<32x256xbf16>
      %c0_15 = arith.constant 0 : index
      %c0_16 = arith.constant 0 : index
      %19 = vector.load %arg6[%c0_15, %c0_16] : memref<32x256xbf16, #tpu.memory_space<vmem>>, vector<32x256xbf16>
      tpu.vector_store %arg6[%c0_15, %c0_16], %18 {strides = array<i32>} : memref<32x256xbf16, #tpu.memory_space<vmem>>, vector<32x256xbf16>,
    } else {
    }
    return
  }
  func.func @transform_0(%arg0: i32, %arg1: i32, %arg2: i32) -> (i32, i32) {
    %c0_i32 = arith.constant 0 : i32
    return %arg0, %arg2 : i32, i32
  }
  func.func @transform_1(%arg0: i32, %arg1: i32, %arg2: i32) -> (i32, i32) {
    %c0_i32 = arith.constant 0 : i32
    return %arg2, %arg1 : i32, i32
  }
  func.func @transform_2(%arg0: i32, %arg1: i32, %arg2: i32) -> (i32, i32) {
    %c0_i32 = arith.constant 0 : i32
    %c0_i32_0 = arith.constant 0 : i32
    return %c0_i32, %arg1 : i32, i32
  }
  func.func @transform_3(%arg0: i32, %arg1: i32, %arg2: i32) -> (i32, i32) {
    %c0_i32 = arith.constant 0 : i32
    return %arg0, %arg1 : i32, i32
  }
}

module attributes {stable_mosaic.version = 11 : i64} {
  func.func @_gap_kernel(%arg0: i32, %arg1: i32, %arg2: memref<1x16x32xbf16, #tpu.memory_space<vmem>>, %arg3: memref<1x1x32xf32, #tpu.memory_space<vmem>>) attributes {dimension_semantics = [#tpu.dimension_semantics<parallel>, #tpu.dimension_semantics<arbitrary>], iteration_bounds = array<i64: 2, 1>, scalar_prefetch = 0 : i64, scratch_operands = 0 : i64, tpu.core_type = #tpu.core_type<tc>, window_params = [{transform_indices = @transform_0, window_bounds = array<i64: 1, 16, 32>}, {transform_indices = @transform_1, window_bounds = array<i64: 1, 1, 32>}]} {
    %c0_i32 = arith.constant 0 : i32
    %0 = arith.cmpi eq, %arg1, %c0_i32 : i32
    %1 = arith.extui %0 : i1 to i32
    %c0_i32_0 = arith.constant 0 : i32
    %2 = arith.cmpi ne, %1, %c0_i32_0 : i32
    scf.if %2 {
      %cst_12 = arith.constant 0.000000e+00 : f32
      %16 = vector.broadcast %cst_12 : f32 to vector<1x1x32xf32>
      %c0_13 = arith.constant 0 : index
      %c0_14 = arith.constant 0 : index
      %c0_15 = arith.constant 0 : index
      %17 = vector.load %arg3[%c0_13, %c0_14, %c0_15] : memref<1x1x32xf32, #tpu.memory_space<vmem>>, vector<1x1x32xf32>
      tpu.vector_store %arg3[%c0_13, %c0_14, %c0_15], %16 {strides = array<i32>} : memref<1x1x32xf32, #tpu.memory_space<vmem>>, vector<1x1x32xf32>,
    } else {
    }
    %c0 = arith.constant 0 : index
    %c0_1 = arith.constant 0 : index
    %c0_2 = arith.constant 0 : index
    %3 = vector.load %arg2[%c0, %c0_1, %c0_2] : memref<1x16x32xbf16, #tpu.memory_space<vmem>>, vector<1x16x32xbf16>
    %4 = vector.shape_cast %3 : vector<1x16x32xbf16> to vector<16x32xbf16>
    %cst = arith.constant 1.000000e+00 : bf16
    %5 = vector.broadcast %cst : bf16 to vector<1x16xbf16>
    %c0_3 = arith.constant 0 : index
    %c0_4 = arith.constant 0 : index
    %c0_5 = arith.constant 0 : index
    %6 = vector.load %arg3[%c0_3, %c0_4, %c0_5] : memref<1x1x32xf32, #tpu.memory_space<vmem>>, vector<1x1x32xf32>
    %7 = vector.shape_cast %6 : vector<1x1x32xf32> to vector<1x32xf32>
    %cst_6 = arith.constant dense<0.000000e+00> : vector<1x32xf32>
    %8 = tpu.matmul %5, %4, %cst_6 {dimension_numbers = #tpu.dot_dimension_numbers<[1], [0], [0], [1], [0, 0, 1, 1], [], []>} : vector<1x16xbf16>, vector<16x32xbf16>, vector<1x32xf32> -> vector<1x32xf32>
    %9 = arith.addf %7, %8 : vector<1x32xf32>
    %c0_7 = arith.constant 0 : index
    %c0_8 = arith.constant 0 : index
    %c0_9 = arith.constant 0 : index
    %10 = vector.load %arg3[%c0_7, %c0_8, %c0_9] : memref<1x1x32xf32, #tpu.memory_space<vmem>>, vector<1x1x32xf32>
    %11 = vector.shape_cast %10 : vector<1x1x32xf32> to vector<1x32xf32>
    %12 = vector.shape_cast %9 : vector<1x32xf32> to vector<1x1x32xf32>
    tpu.vector_store %arg3[%c0_7, %c0_8, %c0_9], %12 {strides = array<i32>} : memref<1x1x32xf32, #tpu.memory_space<vmem>>, vector<1x1x32xf32>,
    %c0_i32_10 = arith.constant 0 : i32
    %13 = arith.cmpi eq, %arg1, %c0_i32_10 : i32
    %14 = arith.extui %13 : i1 to i32
    %c0_i32_11 = arith.constant 0 : i32
    %15 = arith.cmpi ne, %14, %c0_i32_11 : i32
    scf.if %15 {
      %c0_12 = arith.constant 0 : index
      %c0_13 = arith.constant 0 : index
      %c0_14 = arith.constant 0 : index
      %16 = vector.load %arg3[%c0_12, %c0_13, %c0_14] : memref<1x1x32xf32, #tpu.memory_space<vmem>>, vector<1x1x32xf32>
      %cst_15 = arith.constant 6.250000e-02 : f32
      %17 = vector.broadcast %cst_15 : f32 to vector<1x1x32xf32>
      %18 = arith.mulf %16, %17 : vector<1x1x32xf32>
      %c0_16 = arith.constant 0 : index
      %c0_17 = arith.constant 0 : index
      %c0_18 = arith.constant 0 : index
      %19 = vector.load %arg3[%c0_16, %c0_17, %c0_18] : memref<1x1x32xf32, #tpu.memory_space<vmem>>, vector<1x1x32xf32>
      tpu.vector_store %arg3[%c0_16, %c0_17, %c0_18], %18 {strides = array<i32>} : memref<1x1x32xf32, #tpu.memory_space<vmem>>, vector<1x1x32xf32>,
    } else {
    }
    return
  }
  func.func @transform_0(%arg0: i32, %arg1: i32) -> (i32, i32, i32) {
    %c0_i32 = arith.constant 0 : i32
    %c0_i32_0 = arith.constant 0 : i32
    return %arg0, %arg1, %c0_i32 : i32, i32, i32
  }
  func.func @transform_1(%arg0: i32, %arg1: i32) -> (i32, i32, i32) {
    %c0_i32 = arith.constant 0 : i32
    %c0_i32_0 = arith.constant 0 : i32
    %c0_i32_1 = arith.constant 0 : i32
    return %arg0, %c0_i32, %c0_i32_0 : i32, i32, i32
  }
}

module attributes {stable_mosaic.version = 11 : i64} {
  func.func @_proj_kernel(%arg0: i32, %arg1: i32, %arg2: i32, %arg3: memref<1x16x1024xbf16, #tpu.memory_space<vmem>>, %arg4: memref<1024x256xbf16, #tpu.memory_space<vmem>>, %arg5: memref<1x1x256xf32, #tpu.memory_space<vmem>>, %arg6: memref<1x16x256xbf16, #tpu.memory_space<vmem>>) attributes {dimension_semantics = [#tpu.dimension_semantics<parallel>, #tpu.dimension_semantics<parallel>, #tpu.dimension_semantics<parallel>], iteration_bounds = array<i64: 2, 1, 1>, scalar_prefetch = 0 : i64, scratch_operands = 0 : i64, tpu.core_type = #tpu.core_type<tc>, window_params = [{transform_indices = @transform_0, window_bounds = array<i64: 1, 16, 1024>}, {transform_indices = @transform_1, window_bounds = array<i64: 1024, 256>}, {transform_indices = @transform_2, window_bounds = array<i64: 1, 1, 256>}, {transform_indices = @transform_3, window_bounds = array<i64: 1, 16, 256>}]} {
    %c0 = arith.constant 0 : index
    %c0_0 = arith.constant 0 : index
    %c0_1 = arith.constant 0 : index
    %0 = vector.load %arg3[%c0, %c0_0, %c0_1] : memref<1x16x1024xbf16, #tpu.memory_space<vmem>>, vector<1x16x1024xbf16>
    %1 = vector.shape_cast %0 : vector<1x16x1024xbf16> to vector<16x1024xbf16>
    %c0_2 = arith.constant 0 : index
    %c0_3 = arith.constant 0 : index
    %2 = vector.load %arg4[%c0_2, %c0_3] : memref<1024x256xbf16, #tpu.memory_space<vmem>>, vector<1024x256xbf16>
    %cst = arith.constant dense<0.000000e+00> : vector<16x256xf32>
    %3 = tpu.matmul %1, %2, %cst {dimension_numbers = #tpu.dot_dimension_numbers<[1], [0], [0], [1], [0, 0, 1, 1], [], []>} : vector<16x1024xbf16>, vector<1024x256xbf16>, vector<16x256xf32> -> vector<16x256xf32>
    %c0_4 = arith.constant 0 : index
    %c0_5 = arith.constant 0 : index
    %c0_6 = arith.constant 0 : index
    %4 = vector.load %arg5[%c0_4, %c0_5, %c0_6] : memref<1x1x256xf32, #tpu.memory_space<vmem>>, vector<1x1x256xf32>
    %5 = vector.shape_cast %4 : vector<1x1x256xf32> to vector<1x256xf32>
    %6 = vector.broadcast %5 : vector<1x256xf32> to vector<16x256xf32>
    %7 = arith.addf %3, %6 : vector<16x256xf32>
    %cst_7 = arith.constant 0.000000e+00 : f32
    %8 = vector.broadcast %cst_7 : f32 to vector<16x256xf32>
    %9 = arith.maximumf %7, %8 : vector<16x256xf32>
    %10 = arith.truncf %9 : vector<16x256xf32> to vector<16x256xbf16>
    %c0_8 = arith.constant 0 : index
    %c0_9 = arith.constant 0 : index
    %c0_10 = arith.constant 0 : index
    %11 = vector.load %arg6[%c0_8, %c0_9, %c0_10] : memref<1x16x256xbf16, #tpu.memory_space<vmem>>, vector<1x16x256xbf16>
    %12 = vector.shape_cast %11 : vector<1x16x256xbf16> to vector<16x256xbf16>
    %13 = vector.shape_cast %10 : vector<16x256xbf16> to vector<1x16x256xbf16>
    tpu.vector_store %arg6[%c0_8, %c0_9, %c0_10], %13 {strides = array<i32>} : memref<1x16x256xbf16, #tpu.memory_space<vmem>>, vector<1x16x256xbf16>,
    return
  }
  func.func @transform_0(%arg0: i32, %arg1: i32, %arg2: i32) -> (i32, i32, i32) {
    %c0_i32 = arith.constant 0 : i32
    %c0_i32_0 = arith.constant 0 : i32
    return %arg0, %arg1, %c0_i32 : i32, i32, i32
  }
  func.func @transform_1(%arg0: i32, %arg1: i32, %arg2: i32) -> (i32, i32) {
    %c0_i32 = arith.constant 0 : i32
    %c0_i32_0 = arith.constant 0 : i32
    return %c0_i32, %arg2 : i32, i32
  }
  func.func @transform_2(%arg0: i32, %arg1: i32, %arg2: i32) -> (i32, i32, i32) {
    %c0_i32 = arith.constant 0 : i32
    %c0_i32_0 = arith.constant 0 : i32
    return %arg0, %c0_i32, %arg2 : i32, i32, i32
  }
  func.func @transform_3(%arg0: i32, %arg1: i32, %arg2: i32) -> (i32, i32, i32) {
    %c0_i32 = arith.constant 0 : i32
    return %arg0, %arg1, %arg2 : i32, i32, i32
  }
}

module attributes {stable_mosaic.version = 11 : i64} {
  func.func @_conv3x3_kernel(%arg0: i32, %arg1: i32, %arg2: memref<1x6x18x256xbf16, #tpu.memory_space<vmem>>, %arg3: memref<9x256x256xbf16, #tpu.memory_space<vmem>>, %arg4: memref<1x256xf32, #tpu.memory_space<vmem>>, %arg5: memref<1x4x16x256xbf16, #tpu.memory_space<vmem>>) attributes {dimension_semantics = [#tpu.dimension_semantics<parallel>, #tpu.dimension_semantics<parallel>], iteration_bounds = array<i64: 2, 1>, scalar_prefetch = 0 : i64, scratch_operands = 0 : i64, tpu.core_type = #tpu.core_type<tc>, window_params = [{transform_indices = @transform_0, window_bounds = array<i64: 1, 6, 18, 256>}, {transform_indices = @transform_1, window_bounds = array<i64: 9, 256, 256>}, {transform_indices = @transform_2, window_bounds = array<i64: 1, 256>}, {transform_indices = @transform_3, window_bounds = array<i64: 1, 4, 16, 256>}]} {
    %cst = arith.constant 0.000000e+00 : f32
    %0 = vector.broadcast %cst : f32 to vector<64x256xf32>
    %c0 = arith.constant 0 : index
    %c0_0 = arith.constant 0 : index
    %c0_1 = arith.constant 0 : index
    %c0_2 = arith.constant 0 : index
    %1 = vector.load %arg2[%c0, %c0_0, %c0_1, %c0_2] : memref<1x6x18x256xbf16, #tpu.memory_space<vmem>>, vector<1x4x16x256xbf16>
    %2 = vector.shape_cast %1 : vector<1x4x16x256xbf16> to vector<4x16x256xbf16>
    %3 = vector.shape_cast %2 : vector<4x16x256xbf16> to vector<64x256xbf16>
    %c0_3 = arith.constant 0 : index
    %c0_4 = arith.constant 0 : index
    %c0_5 = arith.constant 0 : index
    %4 = vector.load %arg3[%c0_3, %c0_4, %c0_5] : memref<9x256x256xbf16, #tpu.memory_space<vmem>>, vector<1x256x256xbf16>
    %5 = vector.shape_cast %4 : vector<1x256x256xbf16> to vector<256x256xbf16>
    %cst_6 = arith.constant dense<0.000000e+00> : vector<64x256xf32>
    %6 = tpu.matmul %3, %5, %cst_6 {dimension_numbers = #tpu.dot_dimension_numbers<[1], [0], [0], [1], [0, 0, 1, 1], [], []>} : vector<64x256xbf16>, vector<256x256xbf16>, vector<64x256xf32> -> vector<64x256xf32>
    %7 = arith.addf %0, %6 : vector<64x256xf32>
    %c0_7 = arith.constant 0 : index
    %c0_8 = arith.constant 0 : index
    %c1 = arith.constant 1 : index
    %c0_9 = arith.constant 0 : index
    %8 = vector.load %arg2[%c0_7, %c0_8, %c1, %c0_9] : memref<1x6x18x256xbf16, #tpu.memory_space<vmem>>, vector<1x4x16x256xbf16>
    %9 = vector.shape_cast %8 : vector<1x4x16x256xbf16> to vector<4x16x256xbf16>
    %10 = vector.shape_cast %9 : vector<4x16x256xbf16> to vector<64x256xbf16>
    %c1_10 = arith.constant 1 : index
    %c0_11 = arith.constant 0 : index
    %c0_12 = arith.constant 0 : index
    %11 = vector.load %arg3[%c1_10, %c0_11, %c0_12] : memref<9x256x256xbf16, #tpu.memory_space<vmem>>, vector<1x256x256xbf16>
    %12 = vector.shape_cast %11 : vector<1x256x256xbf16> to vector<256x256xbf16>
    %cst_13 = arith.constant dense<0.000000e+00> : vector<64x256xf32>
    %13 = tpu.matmul %10, %12, %cst_13 {dimension_numbers = #tpu.dot_dimension_numbers<[1], [0], [0], [1], [0, 0, 1, 1], [], []>} : vector<64x256xbf16>, vector<256x256xbf16>, vector<64x256xf32> -> vector<64x256xf32>
    %14 = arith.addf %7, %13 : vector<64x256xf32>
    %c0_14 = arith.constant 0 : index
    %c0_15 = arith.constant 0 : index
    %c2 = arith.constant 2 : index
    %c0_16 = arith.constant 0 : index
    %15 = vector.load %arg2[%c0_14, %c0_15, %c2, %c0_16] : memref<1x6x18x256xbf16, #tpu.memory_space<vmem>>, vector<1x4x16x256xbf16>
    %16 = vector.shape_cast %15 : vector<1x4x16x256xbf16> to vector<4x16x256xbf16>
    %17 = vector.shape_cast %16 : vector<4x16x256xbf16> to vector<64x256xbf16>
    %c2_17 = arith.constant 2 : index
    %c0_18 = arith.constant 0 : index
    %c0_19 = arith.constant 0 : index
    %18 = vector.load %arg3[%c2_17, %c0_18, %c0_19] : memref<9x256x256xbf16, #tpu.memory_space<vmem>>, vector<1x256x256xbf16>
    %19 = vector.shape_cast %18 : vector<1x256x256xbf16> to vector<256x256xbf16>
    %cst_20 = arith.constant dense<0.000000e+00> : vector<64x256xf32>
    %20 = tpu.matmul %17, %19, %cst_20 {dimension_numbers = #tpu.dot_dimension_numbers<[1], [0], [0], [1], [0, 0, 1, 1], [], []>} : vector<64x256xbf16>, vector<256x256xbf16>, vector<64x256xf32> -> vector<64x256xf32>
    %21 = arith.addf %14, %20 : vector<64x256xf32>
    %c0_21 = arith.constant 0 : index
    %c1_22 = arith.constant 1 : index
    %c0_23 = arith.constant 0 : index
    %c0_24 = arith.constant 0 : index
    %22 = vector.load %arg2[%c0_21, %c1_22, %c0_23, %c0_24] : memref<1x6x18x256xbf16, #tpu.memory_space<vmem>>, vector<1x4x16x256xbf16>
    %23 = vector.shape_cast %22 : vector<1x4x16x256xbf16> to vector<4x16x256xbf16>
    %24 = vector.shape_cast %23 : vector<4x16x256xbf16> to vector<64x256xbf16>
    %c3 = arith.constant 3 : index
    %c0_25 = arith.constant 0 : index
    %c0_26 = arith.constant 0 : index
    %25 = vector.load %arg3[%c3, %c0_25, %c0_26] : memref<9x256x256xbf16, #tpu.memory_space<vmem>>, vector<1x256x256xbf16>
    %26 = vector.shape_cast %25 : vector<1x256x256xbf16> to vector<256x256xbf16>
    %cst_27 = arith.constant dense<0.000000e+00> : vector<64x256xf32>
    %27 = tpu.matmul %24, %26, %cst_27 {dimension_numbers = #tpu.dot_dimension_numbers<[1], [0], [0], [1], [0, 0, 1, 1], [], []>} : vector<64x256xbf16>, vector<256x256xbf16>, vector<64x256xf32> -> vector<64x256xf32>
    %28 = arith.addf %21, %27 : vector<64x256xf32>
    %c0_28 = arith.constant 0 : index
    %c1_29 = arith.constant 1 : index
    %c1_30 = arith.constant 1 : index
    %c0_31 = arith.constant 0 : index
    %29 = vector.load %arg2[%c0_28, %c1_29, %c1_30, %c0_31] : memref<1x6x18x256xbf16, #tpu.memory_space<vmem>>, vector<1x4x16x256xbf16>
    %30 = vector.shape_cast %29 : vector<1x4x16x256xbf16> to vector<4x16x256xbf16>
    %31 = vector.shape_cast %30 : vector<4x16x256xbf16> to vector<64x256xbf16>
    %c4 = arith.constant 4 : index
    %c0_32 = arith.constant 0 : index
    %c0_33 = arith.constant 0 : index
    %32 = vector.load %arg3[%c4, %c0_32, %c0_33] : memref<9x256x256xbf16, #tpu.memory_space<vmem>>, vector<1x256x256xbf16>
    %33 = vector.shape_cast %32 : vector<1x256x256xbf16> to vector<256x256xbf16>
    %cst_34 = arith.constant dense<0.000000e+00> : vector<64x256xf32>
    %34 = tpu.matmul %31, %33, %cst_34 {dimension_numbers = #tpu.dot_dimension_numbers<[1], [0], [0], [1], [0, 0, 1, 1], [], []>} : vector<64x256xbf16>, vector<256x256xbf16>, vector<64x256xf32> -> vector<64x256xf32>
    %35 = arith.addf %28, %34 : vector<64x256xf32>
    %c0_35 = arith.constant 0 : index
    %c1_36 = arith.constant 1 : index
    %c2_37 = arith.constant 2 : index
    %c0_38 = arith.constant 0 : index
    %36 = vector.load %arg2[%c0_35, %c1_36, %c2_37, %c0_38] : memref<1x6x18x256xbf16, #tpu.memory_space<vmem>>, vector<1x4x16x256xbf16>
    %37 = vector.shape_cast %36 : vector<1x4x16x256xbf16> to vector<4x16x256xbf16>
    %38 = vector.shape_cast %37 : vector<4x16x256xbf16> to vector<64x256xbf16>
    %c5 = arith.constant 5 : index
    %c0_39 = arith.constant 0 : index
    %c0_40 = arith.constant 0 : index
    %39 = vector.load %arg3[%c5, %c0_39, %c0_40] : memref<9x256x256xbf16, #tpu.memory_space<vmem>>, vector<1x256x256xbf16>
    %40 = vector.shape_cast %39 : vector<1x256x256xbf16> to vector<256x256xbf16>
    %cst_41 = arith.constant dense<0.000000e+00> : vector<64x256xf32>
    %41 = tpu.matmul %38, %40, %cst_41 {dimension_numbers = #tpu.dot_dimension_numbers<[1], [0], [0], [1], [0, 0, 1, 1], [], []>} : vector<64x256xbf16>, vector<256x256xbf16>, vector<64x256xf32> -> vector<64x256xf32>
    %42 = arith.addf %35, %41 : vector<64x256xf32>
    %c0_42 = arith.constant 0 : index
    %c2_43 = arith.constant 2 : index
    %c0_44 = arith.constant 0 : index
    %c0_45 = arith.constant 0 : index
    %43 = vector.load %arg2[%c0_42, %c2_43, %c0_44, %c0_45] : memref<1x6x18x256xbf16, #tpu.memory_space<vmem>>, vector<1x4x16x256xbf16>
    %44 = vector.shape_cast %43 : vector<1x4x16x256xbf16> to vector<4x16x256xbf16>
    %45 = vector.shape_cast %44 : vector<4x16x256xbf16> to vector<64x256xbf16>
    %c6 = arith.constant 6 : index
    %c0_46 = arith.constant 0 : index
    %c0_47 = arith.constant 0 : index
    %46 = vector.load %arg3[%c6, %c0_46, %c0_47] : memref<9x256x256xbf16, #tpu.memory_space<vmem>>, vector<1x256x256xbf16>
    %47 = vector.shape_cast %46 : vector<1x256x256xbf16> to vector<256x256xbf16>
    %cst_48 = arith.constant dense<0.000000e+00> : vector<64x256xf32>
    %48 = tpu.matmul %45, %47, %cst_48 {dimension_numbers = #tpu.dot_dimension_numbers<[1], [0], [0], [1], [0, 0, 1, 1], [], []>} : vector<64x256xbf16>, vector<256x256xbf16>, vector<64x256xf32> -> vector<64x256xf32>
    %49 = arith.addf %42, %48 : vector<64x256xf32>
    %c0_49 = arith.constant 0 : index
    %c2_50 = arith.constant 2 : index
    %c1_51 = arith.constant 1 : index
    %c0_52 = arith.constant 0 : index
    %50 = vector.load %arg2[%c0_49, %c2_50, %c1_51, %c0_52] : memref<1x6x18x256xbf16, #tpu.memory_space<vmem>>, vector<1x4x16x256xbf16>
    %51 = vector.shape_cast %50 : vector<1x4x16x256xbf16> to vector<4x16x256xbf16>
    %52 = vector.shape_cast %51 : vector<4x16x256xbf16> to vector<64x256xbf16>
    %c7 = arith.constant 7 : index
    %c0_53 = arith.constant 0 : index
    %c0_54 = arith.constant 0 : index
    %53 = vector.load %arg3[%c7, %c0_53, %c0_54] : memref<9x256x256xbf16, #tpu.memory_space<vmem>>, vector<1x256x256xbf16>
    %54 = vector.shape_cast %53 : vector<1x256x256xbf16> to vector<256x256xbf16>
    %cst_55 = arith.constant dense<0.000000e+00> : vector<64x256xf32>
    %55 = tpu.matmul %52, %54, %cst_55 {dimension_numbers = #tpu.dot_dimension_numbers<[1], [0], [0], [1], [0, 0, 1, 1], [], []>} : vector<64x256xbf16>, vector<256x256xbf16>, vector<64x256xf32> -> vector<64x256xf32>
    %56 = arith.addf %49, %55 : vector<64x256xf32>
    %c0_56 = arith.constant 0 : index
    %c2_57 = arith.constant 2 : index
    %c2_58 = arith.constant 2 : index
    %c0_59 = arith.constant 0 : index
    %57 = vector.load %arg2[%c0_56, %c2_57, %c2_58, %c0_59] : memref<1x6x18x256xbf16, #tpu.memory_space<vmem>>, vector<1x4x16x256xbf16>
    %58 = vector.shape_cast %57 : vector<1x4x16x256xbf16> to vector<4x16x256xbf16>
    %59 = vector.shape_cast %58 : vector<4x16x256xbf16> to vector<64x256xbf16>
    %c8 = arith.constant 8 : index
    %c0_60 = arith.constant 0 : index
    %c0_61 = arith.constant 0 : index
    %60 = vector.load %arg3[%c8, %c0_60, %c0_61] : memref<9x256x256xbf16, #tpu.memory_space<vmem>>, vector<1x256x256xbf16>
    %61 = vector.shape_cast %60 : vector<1x256x256xbf16> to vector<256x256xbf16>
    %cst_62 = arith.constant dense<0.000000e+00> : vector<64x256xf32>
    %62 = tpu.matmul %59, %61, %cst_62 {dimension_numbers = #tpu.dot_dimension_numbers<[1], [0], [0], [1], [0, 0, 1, 1], [], []>} : vector<64x256xbf16>, vector<256x256xbf16>, vector<64x256xf32> -> vector<64x256xf32>
    %63 = arith.addf %56, %62 : vector<64x256xf32>
    %c0_63 = arith.constant 0 : index
    %c0_64 = arith.constant 0 : index
    %64 = vector.load %arg4[%c0_63, %c0_64] : memref<1x256xf32, #tpu.memory_space<vmem>>, vector<1x256xf32>
    %65 = vector.broadcast %64 : vector<1x256xf32> to vector<64x256xf32>
    %66 = arith.addf %63, %65 : vector<64x256xf32>
    %cst_65 = arith.constant 0.000000e+00 : f32
    %67 = vector.broadcast %cst_65 : f32 to vector<64x256xf32>
    %68 = arith.maximumf %66, %67 : vector<64x256xf32>
    %69 = vector.shape_cast %68 : vector<64x256xf32> to vector<4x16x256xf32>
    %70 = arith.truncf %69 : vector<4x16x256xf32> to vector<4x16x256xbf16>
    %c0_66 = arith.constant 0 : index
    %c0_67 = arith.constant 0 : index
    %c0_68 = arith.constant 0 : index
    %c0_69 = arith.constant 0 : index
    %71 = vector.load %arg5[%c0_66, %c0_67, %c0_68, %c0_69] : memref<1x4x16x256xbf16, #tpu.memory_space<vmem>>, vector<1x4x16x256xbf16>
    %72 = vector.shape_cast %71 : vector<1x4x16x256xbf16> to vector<4x16x256xbf16>
    %73 = vector.shape_cast %70 : vector<4x16x256xbf16> to vector<1x4x16x256xbf16>
    tpu.vector_store %arg5[%c0_66, %c0_67, %c0_68, %c0_69], %73 {strides = array<i32>} : memref<1x4x16x256xbf16, #tpu.memory_space<vmem>>, vector<1x4x16x256xbf16>,
    return
  }
  func.func @transform_0(%arg0: i32, %arg1: i32) -> (i32, i32, i32, i32) {
    %c0_i32 = arith.constant 0 : i32
    %c0_i32_0 = arith.constant 0 : i32
    %c0_i32_1 = arith.constant 0 : i32
    %c0_i32_2 = arith.constant 0 : i32
    return %arg0, %c0_i32, %c0_i32_0, %c0_i32_1 : i32, i32, i32, i32
  }
  func.func @transform_1(%arg0: i32, %arg1: i32) -> (i32, i32, i32) {
    %c0_i32 = arith.constant 0 : i32
    %c0_i32_0 = arith.constant 0 : i32
    %c0_i32_1 = arith.constant 0 : i32
    return %c0_i32, %c0_i32_0, %arg1 : i32, i32, i32
  }
  func.func @transform_2(%arg0: i32, %arg1: i32) -> (i32, i32) {
    %c0_i32 = arith.constant 0 : i32
    %c0_i32_0 = arith.constant 0 : i32
    return %c0_i32, %arg1 : i32, i32
  }
  func.func @transform_3(%arg0: i32, %arg1: i32) -> (i32, i32, i32, i32) {
    %c0_i32 = arith.constant 0 : i32
    %c0_i32_0 = arith.constant 0 : i32
    %c0_i32_1 = arith.constant 0 : i32
    return %arg0, %c0_i32, %c0_i32_0, %arg1 : i32, i32, i32, i32
  }
}

module attributes {stable_mosaic.version = 11 : i64} {
  func.func @_mm_bias_kernel(%arg0: i32, %arg1: i32, %arg2: i32, %arg3: memref<16x256xbf16, #tpu.memory_space<vmem>>, %arg4: memref<256x128xbf16, #tpu.memory_space<vmem>>, %arg5: memref<1x128xf32, #tpu.memory_space<vmem>>, %arg6: memref<16x128xf32, #tpu.memory_space<vmem>>, %arg7: memref<16x128xf32, #tpu.memory_space<vmem>>) attributes {dimension_semantics = [#tpu.dimension_semantics<parallel>, #tpu.dimension_semantics<parallel>, #tpu.dimension_semantics<arbitrary>], iteration_bounds = array<i64: 2, 1, 1>, scalar_prefetch = 0 : i64, scratch_operands = 1 : i64, tpu.core_type = #tpu.core_type<tc>, window_params = [{transform_indices = @transform_0, window_bounds = array<i64: 16, 256>}, {transform_indices = @transform_1, window_bounds = array<i64: 256, 128>}, {transform_indices = @transform_2, window_bounds = array<i64: 1, 128>}, {transform_indices = @transform_3, window_bounds = array<i64: 16, 128>}]} {
    %c0_i32 = arith.constant 0 : i32
    %0 = arith.cmpi eq, %arg2, %c0_i32 : i32
    %1 = arith.extui %0 : i1 to i32
    %c0_i32_0 = arith.constant 0 : i32
    %2 = arith.cmpi ne, %1, %c0_i32_0 : i32
    scf.if %2 {
      %cst_10 = arith.constant 0.000000e+00 : f32
      %12 = vector.broadcast %cst_10 : f32 to vector<16x128xf32>
      %c0_11 = arith.constant 0 : index
      %c0_12 = arith.constant 0 : index
      %13 = vector.load %arg7[%c0_11, %c0_12] : memref<16x128xf32, #tpu.memory_space<vmem>>, vector<16x128xf32>
      tpu.vector_store %arg7[%c0_11, %c0_12], %12 {strides = array<i32>} : memref<16x128xf32, #tpu.memory_space<vmem>>, vector<16x128xf32>,
    } else {
    }
    %c0 = arith.constant 0 : index
    %c0_1 = arith.constant 0 : index
    %3 = vector.load %arg7[%c0, %c0_1] : memref<16x128xf32, #tpu.memory_space<vmem>>, vector<16x128xf32>
    %c0_2 = arith.constant 0 : index
    %c0_3 = arith.constant 0 : index
    %4 = vector.load %arg3[%c0_2, %c0_3] : memref<16x256xbf16, #tpu.memory_space<vmem>>, vector<16x256xbf16>
    %c0_4 = arith.constant 0 : index
    %c0_5 = arith.constant 0 : index
    %5 = vector.load %arg4[%c0_4, %c0_5] : memref<256x128xbf16, #tpu.memory_space<vmem>>, vector<256x128xbf16>
    %cst = arith.constant dense<0.000000e+00> : vector<16x128xf32>
    %6 = tpu.matmul %4, %5, %cst {dimension_numbers = #tpu.dot_dimension_numbers<[1], [0], [0], [1], [0, 0, 1, 1], [], []>} : vector<16x256xbf16>, vector<256x128xbf16>, vector<16x128xf32> -> vector<16x128xf32>
    %7 = arith.addf %3, %6 : vector<16x128xf32>
    %c0_6 = arith.constant 0 : index
    %c0_7 = arith.constant 0 : index
    %8 = vector.load %arg7[%c0_6, %c0_7] : memref<16x128xf32, #tpu.memory_space<vmem>>, vector<16x128xf32>
    tpu.vector_store %arg7[%c0_6, %c0_7], %7 {strides = array<i32>} : memref<16x128xf32, #tpu.memory_space<vmem>>, vector<16x128xf32>,
    %c0_i32_8 = arith.constant 0 : i32
    %9 = arith.cmpi eq, %arg2, %c0_i32_8 : i32
    %10 = arith.extui %9 : i1 to i32
    %c0_i32_9 = arith.constant 0 : i32
    %11 = arith.cmpi ne, %10, %c0_i32_9 : i32
    scf.if %11 {
      %c0_10 = arith.constant 0 : index
      %c0_11 = arith.constant 0 : index
      %12 = vector.load %arg7[%c0_10, %c0_11] : memref<16x128xf32, #tpu.memory_space<vmem>>, vector<16x128xf32>
      %c0_12 = arith.constant 0 : index
      %c0_13 = arith.constant 0 : index
      %13 = vector.load %arg5[%c0_12, %c0_13] : memref<1x128xf32, #tpu.memory_space<vmem>>, vector<1x128xf32>
      %14 = vector.broadcast %13 : vector<1x128xf32> to vector<16x128xf32>
      %15 = arith.addf %12, %14 : vector<16x128xf32>
      %c0_14 = arith.constant 0 : index
      %c0_15 = arith.constant 0 : index
      %16 = vector.load %arg6[%c0_14, %c0_15] : memref<16x128xf32, #tpu.memory_space<vmem>>, vector<16x128xf32>
      tpu.vector_store %arg6[%c0_14, %c0_15], %15 {strides = array<i32>} : memref<16x128xf32, #tpu.memory_space<vmem>>, vector<16x128xf32>,
    } else {
    }
    return
  }
  func.func @transform_0(%arg0: i32, %arg1: i32, %arg2: i32) -> (i32, i32) {
    %c0_i32 = arith.constant 0 : i32
    return %arg0, %arg2 : i32, i32
  }
  func.func @transform_1(%arg0: i32, %arg1: i32, %arg2: i32) -> (i32, i32) {
    %c0_i32 = arith.constant 0 : i32
    return %arg2, %arg1 : i32, i32
  }
  func.func @transform_2(%arg0: i32, %arg1: i32, %arg2: i32) -> (i32, i32) {
    %c0_i32 = arith.constant 0 : i32
    %c0_i32_0 = arith.constant 0 : i32
    return %c0_i32, %arg1 : i32, i32
  }
  func.func @transform_3(%arg0: i32, %arg1: i32, %arg2: i32) -> (i32, i32) {
    %c0_i32 = arith.constant 0 : i32
    return %arg0, %arg1 : i32, i32
  }
}

</mosaic_0001>

<bundles_post_ra>
// kernel: mobilenet3_deeplab3_forward.6
= control target key start
LH: loop header
LB: loop body
LE: loop exit
PB: predicated region body
PF: predicated region fallthrough
CT: control target
= control target key end

     0   :  { %s357_s6 = smov 0   ;;  %s359_s7 = smov 0   ;;  %s393_s0 = inlined_call_operand.vmem [shape: bf16[2,16,32], index: 0, kind: input, shape index: {}]   ;;  %s394_s1 = inlined_call_operand.vmem [shape: f32[2,1,32], index: 1, kind: output, shape index: {}]  }
   0x1   :  { %s361_s8 = smov 0  }
   0x2 LB: > { %s23_s9 = sadd.s32 1, %s338_s7  ;;  %p276_p0 = scmp.ge.s32.totalorder %s342_s8, 1  ;;  %s342_s8 = sphi %s361_s8, %s11_s8   ;;  %s338_s7 = sphi %s359_s7, %s396_s7   ;;  %s334_s6 = sphi %s357_s6, %s395_s6  }
   0x3   : > { %p25_p1 = scmp.ge.s32.totalorder %s23_s9, 2  ;;  %p106_p2 = scmp.lt.s32.totalorder %s342_s8, 3 }
   0x5   : > { %s398_s9 = smov (%p25_p1, %s23_s9), 0  ;;  %p107_p3 = pnand %p276_p0, %p106_p2 }
   0x6   : > { %p129_p4 = scmp.lt.s32.totalorder (!%p107_p3), %s334_s6, 1  ;;  %v344_v0 = vmov (!%p107_p3), 0.0   ;;  %vm345_vm0 = vmmov (!%p107_p3), 0   ;;  %vm147_vm1 = vcmask (!%p107_p3), 253952   ;;  %vm158_vm2 = vcmask (!%p107_p3), 130048  }
   0x7   : > { %110 = sbr.rel (%p107_p3) target bundleno = 246 (0xf6), region = 24  ;;  %286 = vmatprep.subr.bf16.mxu0 (!%p107_p3), %v344_v0  ;;  %288 = vmatprep.mubr.msk.bf16.mxu0 (!%p107_p3), %vm345_vm0, %v344_v0  ;;  %v346_v2 = vmov (!%p107_p3), 1065369472  }
   0xe   : > { %s400_s6 = smov (!%p129_p4, %s334_s6), 1 }
   0xf   : > { %s140_s12 = scalar_lea.vmem %s394_s1, %s400_s6  ;;  %s283_s13 = sshll.u32 %s400_s6, 3 }
  0x10   : > { %148 = vst.msk [vmem:[%s140_s12] sm:$0x1] %vm147_vm1, %v344_v0  ;;  %s136_s16 = scalar_lea.vmem %s393_s0, %s283_s13 }
  0x11   : > { %v319_v1 = vld [vmem:[%s136_s16] sm:$0xff]  }
  0x12   : > { %287 = vmatpush3.bf16.msra.mxu0 %v319_v1 }
  0x15   : > { %289 = vmatmul.mubr.msk.bf16.vlgmr.msra.gmra.mrb[0].mxu0 %vm158_vm2, %v346_v2 }
  0x17   : > { %v151_v3 = vld [vmem:[%s140_s12] sm:$0x1] }
  0xe8   : > { %v196_v4 = vpop.f32.mrb[0].mxu0 }
  0xe9   : > { %v202_v5 = vadd.f32 %v196_v4, %v151_v3  ;;  %v290_v6 = vpop.f32.mrb[1].mxu0 }
  0xea   : > { %v199_v7 = vpop.f32.mrb[2].mxu0 }
  0xeb   : > { %204 = vst.msk [vmem:[%s140_s12] sm:$0x1] %vm147_vm1, %v202_v5  ;;  %v291_v8 = vpop.f32.mrb[3].mxu0 }
  0xf2   : > { %v208_v9 = vld [vmem:[%s140_s12] sm:$0x1] }
  0xf3   : > { %v209_v10 = vmul.f32 0.0625, %v208_v9 }
  0xf5   : > { %210 = vst.msk [vmem:[%s140_s12] sm:$0x1] %vm147_vm1, %v209_v10 }
  0xf6 PF: > { %s11_s8 = sadd.s32 1, %s342_s8   ;;  %s395_s6 = smov %s338_s7 }
  0xf7   : > { %p8_p5 = scmp.ge.s32.totalorder %s11_s8, 4   ;;  %s396_s7 = smov %s398_s9 }
  0xf9   :  { %10 = sbr.rel (!%p8_p5) target bundleno = 2 (0x2), region = 62 }

// kernel: mobilenet3_deeplab3_forward.5
= control target key start
LH: loop header
LB: loop body
LE: loop exit
PB: predicated region body
PF: predicated region fallthrough
CT: control target
= control target key end

     0   :  { %s803_s12 = smov 0   ;;  %s805_s13 = smov 0   ;;  %s889_s0 = inlined_call_operand.vmem [shape: bf16[32,32], index: 0, kind: input, shape index: {}]   ;;  %s890_s1 = inlined_call_operand.vmem [shape: bf16[32,1024], index: 1, kind: input, shape index: {}]   ;;  %s891_s2 = inlined_call_operand.vmem [shape: f32[1,1024], index: 2, kind: input, shape index: {}]   ;;  %s892_s3 = inlined_call_operand.vmem [shape: bf16[32,1024], index: 3, kind: output, shape index: {}]  }
   0x1   :  { %s807_s14 = smov 0   ;;  %s809_s15 = smov 0  }
   0x2   :  { %s811_s16 = smov 0  }
   0x3 LB: > { %s28_s17 = sadd.s32 1, %s776_s15  ;;  %s654_s18 = sadd.s32 4294967295, %s780_s16   ;;  %s780_s16 = sphi %s811_s16, %s13_s16   ;;  %s776_s15 = sphi %s809_s15, %s897_s15   ;;  %s772_s14 = sphi %s807_s14, %s896_s14   ;;  %s768_s13 = sphi %s805_s13, %s895_s13   ;;  %s764_s12 = sphi %s803_s12, %s894_s12  }
   0x4   : > { %p30_p0 = scmp.ge.s32.totalorder %s28_s17, 4  ;;  %p76_p1 = scmp.ne.s32.totalorder %s768_s13, %s764_s12 }
   0x5   : > { %p77_p2 = scmp.eq.s32.totalorder %s780_s16, 0  ;;  %p134_p4 = scmp.eq.s32.totalorder %s654_s18, 3 }
   0x6   : > { %s899_s17 = smov (%p30_p0, %s28_s17), 0  ;;  %s69_s20 = sadd.s32 1, %s768_s13 }
   0x7   : > { %p78_p3 = por %p77_p2, %p76_p1  ;;  %s65_s19 = ssub.s32 %s776_s15, %s899_s17 }
   0x8   : > { %p67_p5 = scmp.eq.s32.totalorder %s65_s19, 0  ;;  %p838_p6 = por %p134_p4, %p76_p1 }
   0x9   : > { %p658_p7 = scmp.ge.s32.totalorder %s780_s16, 4 }
   0xa   : > { %s843_s22 = scalar_select %p67_p5, %s768_s13, %s69_s20  }
   0xb   : > { %168 = sbr.rel (%p658_p7) target bundleno = 26 (0x1a), region = 20 }
  0x12   : > { %171 = sbr.rel (!%p78_p3) target bundleno = 26 (0x1a), region = 24  ;;  %s173_s23 = sand.u32 (%p78_p3), 1, %s768_s13  }
  0x13   : > { %s683_s24 = sshll.u32 (%p78_p3), %s776_s15, 3  ;;  %s659_s25 = sshll.u32 (%p78_p3), %s173_s23, 5 }
  0x14   : > { %s181_s28 = scalar_lea.vmem (%p78_p3), %s890_s1, %s683_s24  ;;  %s175_s29 = scalar_lea.vmem (%p78_p3), [#allocation3], %s659_s25 }
  0x15   : > { %v215_v0 = vld [vmem:[%s181_s28] sm:$0xff] (%p78_p3) }
  0x16   : > { %v217_v1 = vld [vmem:[%s181_s28 + $0x20] sm:$0xff] (%p78_p3)  ;;  %216 = vst [vmem:[%s175_s29] sm:$0xff] (%p78_p3), %v215_v0 }
  0x17   : > { %v219_v2 = vld [vmem:[%s181_s28 + $0x40] sm:$0xff] (%p78_p3)  ;;  %218 = vst [vmem:[%s175_s29 + $0x8] sm:$0xff] (%p78_p3), %v217_v1 }
  0x18   : > { %220 = vst [vmem:[%s175_s29 + $0x10] sm:$0xff] (%p78_p3), %v219_v2  ;;  %v221_v3 = vld [vmem:[%s181_s28 + $0x60] sm:$0xff] (%p78_p3) }
  0x19   : > { %222 = vst [vmem:[%s175_s29 + $0x18] sm:$0xff] %v221_v3 }
  0x1a PF: > { %p662_p8 = scmp.ge.s32.totalorder %s780_s16, 1  ;;  %p235_p9 = scmp.lt.s32.totalorder %s780_s16, 5 }
  0x1c   : > { %p236_p10 = pnand %p662_p8, %p235_p9 }
  0x1d   : > { %s242_s30 = sand.u32 (!%p236_p10), 1, %s764_s12   ;;  %v782_v4 = vmov (!%p236_p10), 0   ;;  %v740_v9 = vld [vmem:[%s889_s0] sm:$0xff] (!%p236_p10)   ;;  %v741_v10 = vld [vmem:[%s889_s0 + $0x8] sm:$0xff] (!%p236_p10)   ;;  %vm353_vm0 = vcmask (!%p236_p10), 261120   ;;  %s665_s10 = sshll.u32 (!%p236_p10), %s772_s14, 1  ;;  %v442_v11 = vlaneseq (!%p236_p10) }
  0x1e   : > { %239 = sbr.rel (%p236_p10) target bundleno = 271 (0x10f), region = 66  ;;  %s854_s4 = sshll.u32 (!%p236_p10), %s242_s30, 5  ;;  %392 = vmatprep.mubr.bf16.mxu0 (!%p236_p10), %v782_v4  ;;  %402 = vmatprep.mubr.bf16.mxu1 (!%p236_p10), %v782_v4 }
  0x1f   : > { %s244_s5 = scalar_lea.vmem (!%p236_p10), [#allocation3], %s854_s4  ;;  %p288_p11 = scmp.lt.s32.totalorder (!%p236_p10), %s665_s10, 7  ;;  %v443_v12 = vshrl.u32 (!%p236_p10), %v442_v11, 7 }
  0x20   : > { %v734_v5 = vld [vmem:[%s244_s5 + $0x4] ss:$8 sps:$4 sm:$0xff] (!%p236_p10)   ;;  %v736_v6 = vld [vmem:[%s244_s5] ss:$8 sps:$4 sm:$0xff] (!%p236_p10)   ;;  %v737_v7 = vld [vmem:[%s244_s5 + $0x14] ss:$8 sps:$4 sm:$0xff] (!%p236_p10)  }
  0x21   : > { %360 = vmatprep.subr.bf16.mxu0 (!%p236_p10), %v734_v5  ;;  %689 = vmatprep.subr.bf16.mxu1 (!%p236_p10), %v734_v5  ;;  %v739_v8 = vld [vmem:[%s244_s5 + $0x10] ss:$8 sps:$4 sm:$0xff] (!%p236_p10)   ;;  %v444_v13 = vsub.s32 (!%p236_p10), 0, %v443_v12  ;;  %v448_v15 = vsub.s32 (!%p236_p10), 1, %v443_v12  ;;  %s275_s19 = scalar_lea.vmem (!%p236_p10), [#allocation4], %s854_s4 }
  0x22   : > { %361 = vmatpush1.bf16.msra.mxu0 (!%p236_p10), %v736_v6  ;;  %691 = vmatpush1.bf16.msra.mxu1 (!%p236_p10), %v736_v6 }
  0x23   : > { %362 = vmatprep.subr.bf16.mxu0 (!%p236_p10), %v737_v7  ;;  %690 = vmatprep.subr.bf16.mxu1 (!%p236_p10), %v737_v7 }
  0x25   : > { %s901_s10 = smov (!%p288_p11, %s665_s10), 7  ;;  %s688_s20 = sshll.u32 (%p838_p6), %s772_s14, 3 }
  0x26   : > { %363 = vmatpush1.bf16.msra.mxu0 %v739_v8  ;;  %692 = vmatpush1.bf16.msra.mxu1 %v739_v8  ;;  %s290_s18 = scalar_lea.vmem %s891_s2, %s901_s10  ;;  %s508_s25 = scalar_lea.vmem (%p838_p6), %s892_s3, %s688_s20 }
  0x27   : > { %v440_v14 = vld [vmem:[%s290_s18] sm:$0x3] }
  0x28   : > { %v445_v16 = vrot.slane %v440_v14, %v444_v13  ;;  %v449_v17 = vrot.slane %v440_v14, %v448_v15 }
  0x29   : > { %672 = vmatmul.mubr.msk.bf16.vlgmr.msra.gmra.mrb[0].mxu0 %vm353_vm0, %v740_v9  ;;  %673 = vmatmul.mubr.msk.bf16.vlgmr.msra.gmra.mrb[0].mxu1 %vm353_vm0, %v741_v10 }
  0xfc   : > { %v394_v18 = vpop.f32.mrb[0].mxu0  ;;  %v404_v19 = vpop.f32.mrb[0].mxu1 }
  0xfd   : > { %v452_v20 = vadd.f32 %v445_v16, %v394_v18  ;;  %v456_v21 = vadd.f32 %v445_v16, %v404_v19  ;;  %v396_v22 = vpop.f32.mrb[1].mxu0  ;;  %v406_v23 = vpop.f32.mrb[1].mxu1 }
  0xfe   : > { %v453_v24 = vadd.f32 %v449_v17, %v396_v22  ;;  %v457_v25 = vadd.f32 %v449_v17, %v406_v23  ;;  %v398_v26 = vpop.f32.mrb[2].mxu0  ;;  %v408_v27 = vpop.f32.mrb[2].mxu1 }
  0xff   : > { %v460_v28 = vmax.f32 %v452_v20, 0.0  ;;  %v464_v29 = vmax.f32 %v456_v21, 0.0  ;;  %v454_v30 = vadd.f32 %v445_v16, %v398_v26  ;;  %v458_v31 = vadd.f32 %v445_v16, %v408_v27  ;;  %v400_v32 = vpop.f32.mrb[3].mxu0  ;;  %v410_v33 = vpop.f32.mrb[3].mxu1 }
 0x100   : > { %v461_v34 = vmax.f32 %v453_v24, 0.0  ;;  %v465_v35 = vmax.f32 %v457_v25, 0.0  ;;  %v455_v36 = vadd.f32 %v449_v17, %v400_v32  ;;  %v459_v37 = vadd.f32 %v449_v17, %v410_v33  ;;  %502 = sbr.rel (!%p838_p6) target bundleno = 271 (0x10f), region = 82 }
 0x101   : > { %v462_v38 = vmax.f32 %v454_v30, 0.0  ;;  %v466_v39 = vmax.f32 %v458_v31, 0.0 }
 0x102   : > { %v684_v40 = vpack.c.bf16 %v461_v34, %v460_v28  ;;  %v686_v41 = vpack.c.bf16 %v465_v35, %v464_v29  ;;  %v463_v42 = vmax.f32 %v455_v36, 0.0  ;;  %v467_v43 = vmax.f32 %v459_v37, 0.0 }
 0x104   : > { %492 = vst [vmem:[%s275_s19] sm:$0xff] %v684_v40  ;;  %494 = vst [vmem:[%s275_s19 + $0x10] sm:$0xff] %v686_v41  ;;  %v685_v44 = vpack.c.bf16 %v463_v42, %v462_v38  ;;  %v687_v45 = vpack.c.bf16 %v467_v43, %v466_v39 }
 0x106   : > { %493 = vst [vmem:[%s275_s19 + $0x8] sm:$0xff] %v685_v44  ;;  %495 = vst [vmem:[%s275_s19 + $0x18] sm:$0xff] %v687_v45 }
 0x10b   : > { %v542_v46 = vld [vmem:[%s275_s19] sm:$0xff]  ;;  %v546_v48 = vld [vmem:[%s275_s19 + $0x10] sm:$0xff] }
 0x10c   : > { %543 = vst [vmem:[%s508_s25] sm:$0xff] %v542_v46  ;;  %547 = vst [vmem:[%s508_s25 + $0x40] sm:$0xff] %v546_v48 }
 0x10d   : > { %v544_v47 = vld [vmem:[%s275_s19 + $0x8] sm:$0xff]  ;;  %v548_v49 = vld [vmem:[%s275_s19 + $0x18] sm:$0xff] }
 0x10e   : > { %545 = vst [vmem:[%s508_s25 + $0x20] sm:$0xff] %v544_v47  ;;  %549 = vst [vmem:[%s508_s25 + $0x60] sm:$0xff] %v548_v49 }
 0x10f PF: > { %s13_s16 = sadd.s32 1, %s780_s16   ;;  %s894_s12 = smov %s768_s13 }
 0x110   : > { %p10_p12 = scmp.ge.s32.totalorder %s13_s16, 6   ;;  %s895_s13 = smov %s843_s22 }
 0x111   : > { %s896_s14 = smov %s776_s15  ;;  %s897_s15 = smov %s899_s17 }
 0x112   :  { %12 = sbr.rel (!%p10_p12) target bundleno = 3 (0x3), region = 157 }

// kernel: mobilenet3_deeplab3_forward.7
= control target key start
LH: loop header
LB: loop body
LE: loop exit
PB: predicated region body
PF: predicated region fallthrough
CT: control target
= control target key end

     0   :  { %s1879_s12 = smov 0   ;;  %s1881_s13 = smov 0   ;;  %s2334_s0 = inlined_call_operand.vmem [shape: bf16[2,16,1024], index: 0, kind: input, shape index: {}]   ;;  %s2335_s1 = inlined_call_operand.vmem [shape: bf16[1024,256], index: 1, kind: input, shape index: {}]   ;;  %s2336_s2 = inlined_call_operand.vmem [shape: f32[2,1,256], index: 2, kind: input, shape index: {}]   ;;  %s2337_s3 = inlined_call_operand.vmem [shape: bf16[2,16,256], index: 3, kind: output, shape index: {}]  }
   0x1   :  { %s1883_s14 = smov 0  }
   0x2 LB: > { %s32_s15 = sadd.s32 1, %s1853_s13  ;;  %p1453_p0 = scmp.ge.s32.totalorder %s1857_s14, 1  ;;  %s1857_s14 = sphi %s1883_s14, %s13_s14   ;;  %s1853_s13 = sphi %s1881_s13, %s2339_s13   ;;  %s1849_s12 = sphi %s1879_s12, %s2338_s12  }
   0x3   : > { %p34_p1 = scmp.ge.s32.totalorder %s32_s15, 2  ;;  %p195_p2 = scmp.lt.s32.totalorder %s1857_s14, 3 }
   0x5   : > { %s2341_s15 = smov (%p34_p1, %s32_s15), 0  ;;  %p196_p3 = pnand %p1453_p0, %p195_p2 }
   0x6   : > { %v1643_v0 = vld [vmem:[%s2335_s1 + $0x4] ss:$8 sps:$4 sm:$0xff] (!%p196_p3)   ;;  %v1647_v2 = vld [vmem:[%s2335_s1] ss:$8 sps:$4 sm:$0xff] (!%p196_p3)   ;;  %v1649_v4 = vld [vmem:[%s2335_s1 + $0x14] ss:$8 sps:$4 sm:$0xff] (!%p196_p3)  }
   0x7   : > { %199 = sbr.rel (%p196_p3) target bundleno = 359 (0x167), region = 32  ;;  %v1645_v1 = vld [vmem:[%s2335_s1 + $0x204] ss:$8 sps:$4 sm:$0xff] (!%p196_p3)   ;;  %1116 = vmatprep.subr.bf16.mxu1 (!%p196_p3), %v1643_v0  ;;  %v1648_v3 = vld [vmem:[%s2335_s1 + $0x200] ss:$8 sps:$4 sm:$0xff] (!%p196_p3)   ;;  %p247_p4 = scmp.lt.s32.totalorder (!%p196_p3), %s1849_s12, 1 }
   0x8   : > { %1202 = vmatprep.subr.bf16.mxu0 (!%p196_p3), %v1645_v1  ;;  %1117 = vmatpush1.bf16.msra.mxu1 (!%p196_p3), %v1647_v2  ;;  %v1651_v5 = vld [vmem:[%s2335_s1 + $0x214] ss:$8 sps:$4 sm:$0xff] (!%p196_p3)   ;;  %v1653_v6 = vld [vmem:[%s2335_s1 + $0x10] ss:$8 sps:$4 sm:$0xff] (!%p196_p3)   ;;  %v1655_v8 = vld [vmem:[%s2335_s1 + $0x24] ss:$8 sps:$4 sm:$0xff] (!%p196_p3)  }
   0x9   : > { %1203 = vmatpush1.bf16.msra.mxu0 (!%p196_p3), %v1648_v3  ;;  %1118 = vmatprep.subr.bf16.mxu1 (!%p196_p3), %v1649_v4  ;;  %v1654_v7 = vld [vmem:[%s2335_s1 + $0x210] ss:$8 sps:$4 sm:$0xff] (!%p196_p3)   ;;  %v1657_v9 = vld [vmem:[%s2335_s1 + $0x224] ss:$8 sps:$4 sm:$0xff] (!%p196_p3)   ;;  %v1659_v10 = vld [vmem:[%s2335_s1 + $0x20] ss:$8 sps:$4 sm:$0xff] (!%p196_p3)  }
   0xa   : > { %1204 = vmatprep.subr.bf16.mxu0 (!%p196_p3), %v1651_v5  ;;  %v1660_v11 = vld [vmem:[%s2335_s1 + $0x220] ss:$8 sps:$4 sm:$0xff] (!%p196_p3)   ;;  %v1661_v12 = vld [vmem:[%s2335_s1 + $0x34] ss:$8 sps:$4 sm:$0xff] (!%p196_p3)   ;;  %v1665_v14 = vld [vmem:[%s2335_s1 + $0x30] ss:$8 sps:$4 sm:$0xff] (!%p196_p3)  }
   0xb   : > { %v1663_v13 = vld [vmem:[%s2335_s1 + $0x234] ss:$8 sps:$4 sm:$0xff] (!%p196_p3)   ;;  %v1666_v15 = vld [vmem:[%s2335_s1 + $0x230] ss:$8 sps:$4 sm:$0xff] (!%p196_p3)   ;;  %v1667_v16 = vld [vmem:[%s2335_s1 + $0x44] ss:$8 sps:$4 sm:$0xff] (!%p196_p3)  }
   0xc   : > { %1119 = vmatpush1.bf16.msra.mxu1 (!%p196_p3), %v1653_v6  ;;  %v1669_v17 = vld [vmem:[%s2335_s1 + $0x244] ss:$8 sps:$4 sm:$0xff] (!%p196_p3)   ;;  %v1671_v18 = vld [vmem:[%s2335_s1 + $0x40] ss:$8 sps:$4 sm:$0xff] (!%p196_p3)   ;;  %v1673_v20 = vld [vmem:[%s2335_s1 + $0x54] ss:$8 sps:$4 sm:$0xff] (!%p196_p3)  }
   0xd   : > { %1205 = vmatpush1.bf16.msra.mxu0 (!%p196_p3), %v1654_v7  ;;  %1120 = vmatprep.subr.bf16.mxu1 (!%p196_p3), %v1655_v8  ;;  %v1672_v19 = vld [vmem:[%s2335_s1 + $0x240] ss:$8 sps:$4 sm:$0xff] (!%p196_p3)   ;;  %v1675_v21 = vld [vmem:[%s2335_s1 + $0x254] ss:$8 sps:$4 sm:$0xff] (!%p196_p3)   ;;  %v1677_v22 = vld [vmem:[%s2335_s1 + $0x50] ss:$8 sps:$4 sm:$0xff] (!%p196_p3)  }
   0xe   : > { %1206 = vmatprep.subr.bf16.mxu0 %v1657_v9  ;;  %v1678_v23 = vld [vmem:[%s2335_s1 + $0x250] ss:$8 sps:$4 sm:$0xff]   ;;  %v1679_v24 = vld [vmem:[%s2335_s1 + $0x64] ss:$8 sps:$4 sm:$0xff]   ;;  %v1683_v26 = vld [vmem:[%s2335_s1 + $0x60] ss:$8 sps:$4 sm:$0xff]  }
   0xf   : > { %v1681_v25 = vld [vmem:[%s2335_s1 + $0x264] ss:$8 sps:$4 sm:$0xff]   ;;  %v1684_v27 = vld [vmem:[%s2335_s1 + $0x260] ss:$8 sps:$4 sm:$0xff]   ;;  %v1685_v28 = vld [vmem:[%s2335_s1 + $0x74] ss:$8 sps:$4 sm:$0xff]  }
  0x10   : > { %1121 = vmatpush1.bf16.msra.mxu1 %v1659_v10  ;;  %v1687_v29 = vld [vmem:[%s2335_s1 + $0x274] ss:$8 sps:$4 sm:$0xff]   ;;  %v1689_v30 = vld [vmem:[%s2335_s1 + $0x70] ss:$8 sps:$4 sm:$0xff]   ;;  %v1691_v32 = vld [vmem:[%s2335_s1 + $0x84] ss:$8 sps:$4 sm:$0xff]  }
  0x11   : > { %1207 = vmatpush1.bf16.msra.mxu0 %v1660_v11  ;;  %1122 = vmatprep.subr.bf16.mxu1 %v1661_v12  ;;  %v1690_v31 = vld [vmem:[%s2335_s1 + $0x270] ss:$8 sps:$4 sm:$0xff]   ;;  %v1693_v33 = vld [vmem:[%s2335_s1 + $0x284] ss:$8 sps:$4 sm:$0xff]   ;;  %v1695_v34 = vld [vmem:[%s2335_s1 + $0x80] ss:$8 sps:$4 sm:$0xff]  }
  0x12   : > { %1208 = vmatprep.subr.bf16.mxu0 %v1663_v13  ;;  %v1696_v35 = vld [vmem:[%s2335_s1 + $0x280] ss:$8 sps:$4 sm:$0xff]   ;;  %v1697_v36 = vld [vmem:[%s2335_s1 + $0x94] ss:$8 sps:$4 sm:$0xff]   ;;  %s2343_s12 = smov (!%p247_p4, %s1849_s12), 1 }
  0x13   : > { %v1699_v37 = vld [vmem:[%s2335_s1 + $0x294] ss:$8 sps:$4 sm:$0xff]   ;;  %v1701_v38 = vld [vmem:[%s2335_s1 + $0x90] ss:$8 sps:$4 sm:$0xff]   ;;  %v1703_v40 = vld [vmem:[%s2335_s1 + $0xa4] ss:$8 sps:$4 sm:$0xff]  }
  0x14   : > { %1123 = vmatpush1.bf16.msra.mxu1 %v1665_v14  ;;  %v1702_v39 = vld [vmem:[%s2335_s1 + $0x290] ss:$8 sps:$4 sm:$0xff]   ;;  %s1599_s29 = sshll.u32 %s2343_s12, 6  ;;  %v1705_v41 = vld [vmem:[%s2335_s1 + $0x2a4] ss:$8 sps:$4 sm:$0xff]   ;;  %s1456_s26 = sshll.u32 %s2343_s12, 1 }
  0x15   : > { %1209 = vmatpush1.bf16.msra.mxu0 %v1666_v15  ;;  %1124 = vmatprep.subr.bf16.mxu1 %v1667_v16  ;;  %v1707_v42 = vld [vmem:[%s2335_s1 + $0xa0] ss:$8 sps:$4 sm:$0xff]   ;;  %s2039_s11 = scalar_lea.vmem %s2334_s0, %s1599_s29  ;;  %v1709_v44 = vld [vmem:[%s2335_s1 + $0xb4] ss:$8 sps:$4 sm:$0xff]   ;;  %v1713_v46 = vld [vmem:[%s2335_s1 + $0xb0] ss:$8 sps:$4 sm:$0xff]   ;;  %s270_s29 = scalar_lea.vmem %s2336_s2, %s1456_s26 }
  0x16   : > { %1210 = vmatprep.subr.bf16.mxu0 %v1669_v17  ;;  %v1708_v43 = vld [vmem:[%s2335_s1 + $0x2a0] ss:$8 sps:$4 sm:$0xff]   ;;  %v1711_v45 = vld [vmem:[%s2335_s1 + $0x2b4] ss:$8 sps:$4 sm:$0xff]   ;;  %v1714_v47 = vld [vmem:[%s2335_s1 + $0x2b0] ss:$8 sps:$4 sm:$0xff]  }
  0x17   : > { %v288_v48 = vld [vmem:[%s2039_s11] sm:$0xff]  ;;  %v290_v53 = vld [vmem:[%s2039_s11 + $0x10] sm:$0xff]  ;;  %s1600_s30 = sshll.u32 %s2343_s12, 4 }
  0x18   : > { %1125 = vmatpush1.bf16.msra.mxu1 %v1671_v18  ;;  %v292_v49 = vld [vmem:[%s2039_s11 + $0x20] sm:$0xff]  ;;  %v294_v54 = vld [vmem:[%s2039_s11 + $0x30] sm:$0xff]  ;;  %s285_s6 = scalar_lea.vmem %s2337_s3, %s1600_s30 }
  0x19   : > { %1211 = vmatpush1.bf16.msra.mxu0 %v1672_v19  ;;  %1126 = vmatprep.subr.bf16.mxu1 %v1673_v20  ;;  %v1715_v50 = vld [vmem:[%s2335_s1 + $0xc4] ss:$8 sps:$4 sm:$0xff]   ;;  %v1460_v52 = vcombine.high %v288_v48, %v292_v49  ;;  %v1464_v55 = vcombine.high %v290_v53, %v294_v54  ;;  %v1719_v56 = vld [vmem:[%s2335_s1 + $0xc0] ss:$8 sps:$4 sm:$0xff]   ;;  %v1721_v58 = vld [vmem:[%s2335_s1 + $0xd4] ss:$8 sps:$4 sm:$0xff]   ;;  %v1459_v8 = vcombine.low %v288_v48, %v292_v49 }
  0x1a   : > { %1212 = vmatprep.subr.bf16.mxu0 %v1675_v21  ;;  %v1717_v51 = vld [vmem:[%s2335_s1 + $0x2c4] ss:$8 sps:$4 sm:$0xff]   ;;  %v1720_v57 = vld [vmem:[%s2335_s1 + $0x2c0] ss:$8 sps:$4 sm:$0xff]   ;;  %v1723_v59 = vld [vmem:[%s2335_s1 + $0x2d4] ss:$8 sps:$4 sm:$0xff]   ;;  %v1463_v10 = vcombine.low %v290_v53, %v294_v54 }
  0x1b   : > { %1148 = vmatprep.mubr.bf16.mxu1 %v1460_v52  ;;  %1234 = vmatprep.mubr.bf16.mxu0 %v1464_v55  ;;  %v1725_v60 = vld [vmem:[%s2335_s1 + $0xd0] ss:$8 sps:$4 sm:$0xff]   ;;  %v1727_v62 = vld [vmem:[%s2335_s1 + $0xe4] ss:$8 sps:$4 sm:$0xff]   ;;  %v1731_v0 = vld [vmem:[%s2335_s1 + $0xe0] ss:$8 sps:$4 sm:$0xff]  }
  0x1c   : > { %1127 = vmatpush1.bf16.msra.mxu1 %v1677_v22  ;;  %v1726_v61 = vld [vmem:[%s2335_s1 + $0x2d0] ss:$8 sps:$4 sm:$0xff]   ;;  %v1729_v63 = vld [vmem:[%s2335_s1 + $0x2e4] ss:$8 sps:$4 sm:$0xff]   ;;  %v1732_v1 = vld [vmem:[%s2335_s1 + $0x2e0] ss:$8 sps:$4 sm:$0xff]  }
  0x1d   : > { %1213 = vmatpush1.bf16.msra.mxu0 %v1678_v23  ;;  %1128 = vmatprep.subr.bf16.mxu1 %v1679_v24  ;;  %v1733_v2 = vld [vmem:[%s2335_s1 + $0xf4] ss:$8 sps:$4 sm:$0xff]   ;;  %v1737_v4 = vld [vmem:[%s2335_s1 + $0xf0] ss:$8 sps:$4 sm:$0xff]   ;;  %v1741_v6 = vld [vmem:[%s2335_s1 + $0x104] ss:$8 sps:$4 sm:$0xff]  }
  0x1e   : > { %1214 = vmatprep.subr.bf16.mxu0 %v1681_v25  ;;  %v1735_v3 = vld [vmem:[%s2335_s1 + $0x2f4] ss:$8 sps:$4 sm:$0xff]   ;;  %v1738_v5 = vld [vmem:[%s2335_s1 + $0x2f0] ss:$8 sps:$4 sm:$0xff]   ;;  %v1744_v7 = vld [vmem:[%s2335_s1 + $0x304] ss:$8 sps:$4 sm:$0xff]  }
  0x1f   : > { %v1739_v9 = vld [vmem:[%s2335_s1 + $0x100] ss:$8 sps:$4 sm:$0xff]   ;;  %v1747_v12 = vld [vmem:[%s2335_s1 + $0x114] ss:$8 sps:$4 sm:$0xff]   ;;  %v1745_v14 = vld [vmem:[%s2335_s1 + $0x110] ss:$8 sps:$4 sm:$0xff]  }
  0x20   : > { %1129 = vmatpush1.bf16.msra.mxu1 %v1683_v26  ;;  %v1742_v11 = vld [vmem:[%s2335_s1 + $0x300] ss:$8 sps:$4 sm:$0xff]   ;;  %v1750_v13 = vld [vmem:[%s2335_s1 + $0x314] ss:$8 sps:$4 sm:$0xff]   ;;  %v1748_v15 = vld [vmem:[%s2335_s1 + $0x310] ss:$8 sps:$4 sm:$0xff]  }
  0x21   : > { %1215 = vmatpush1.bf16.msra.mxu0 %v1684_v27  ;;  %1130 = vmatprep.subr.bf16.mxu1 %v1685_v28  ;;  %v1753_v16 = vld [vmem:[%s2335_s1 + $0x124] ss:$8 sps:$4 sm:$0xff]   ;;  %v1751_v18 = vld [vmem:[%s2335_s1 + $0x120] ss:$8 sps:$4 sm:$0xff]   ;;  %v1759_v20 = vld [vmem:[%s2335_s1 + $0x134] ss:$8 sps:$4 sm:$0xff]  }
  0x22   : > { %1216 = vmatprep.subr.bf16.mxu0 %v1687_v29  ;;  %v1756_v17 = vld [vmem:[%s2335_s1 + $0x324] ss:$8 sps:$4 sm:$0xff]   ;;  %v1754_v19 = vld [vmem:[%s2335_s1 + $0x320] ss:$8 sps:$4 sm:$0xff]   ;;  %v1762_v21 = vld [vmem:[%s2335_s1 + $0x334] ss:$8 sps:$4 sm:$0xff]  }
  0x23   : > { %v1757_v22 = vld [vmem:[%s2335_s1 + $0x130] ss:$8 sps:$4 sm:$0xff]   ;;  %v1765_v24 = vld [vmem:[%s2335_s1 + $0x144] ss:$8 sps:$4 sm:$0xff]   ;;  %v1763_v26 = vld [vmem:[%s2335_s1 + $0x140] ss:$8 sps:$4 sm:$0xff]  }
  0x24   : > { %1131 = vmatpush1.bf16.msra.mxu1 %v1689_v30  ;;  %v1760_v23 = vld [vmem:[%s2335_s1 + $0x330] ss:$8 sps:$4 sm:$0xff]   ;;  %v1768_v25 = vld [vmem:[%s2335_s1 + $0x344] ss:$8 sps:$4 sm:$0xff]   ;;  %v1766_v27 = vld [vmem:[%s2335_s1 + $0x340] ss:$8 sps:$4 sm:$0xff]  }
  0x25   : > { %1217 = vmatpush1.bf16.msra.mxu0 %v1690_v31  ;;  %1132 = vmatprep.subr.bf16.mxu1 %v1691_v32  ;;  %v1771_v28 = vld [vmem:[%s2335_s1 + $0x154] ss:$8 sps:$4 sm:$0xff]   ;;  %v1769_v30 = vld [vmem:[%s2335_s1 + $0x150] ss:$8 sps:$4 sm:$0xff]   ;;  %v1777_v32 = vld [vmem:[%s2335_s1 + $0x164] ss:$8 sps:$4 sm:$0xff]  }
  0x26   : > { %1218 = vmatprep.subr.bf16.mxu0 %v1693_v33  ;;  %v1774_v29 = vld [vmem:[%s2335_s1 + $0x354] ss:$8 sps:$4 sm:$0xff]   ;;  %v1772_v31 = vld [vmem:[%s2335_s1 + $0x350] ss:$8 sps:$4 sm:$0xff]   ;;  %v1780_v33 = vld [vmem:[%s2335_s1 + $0x364] ss:$8 sps:$4 sm:$0xff]  }
  0x27   : > { %v1787_v48 = vld [vmem:[%s2335_s1 + $0x180] ss:$8 sps:$4 sm:$0xff]   ;;  %v1793_v52 = vld [vmem:[%s2335_s1 + $0x190] ss:$8 sps:$4 sm:$0xff]   ;;  %v1801_v54 = vld [vmem:[%s2335_s1 + $0x1a4] ss:$8 sps:$4 sm:$0xff]  }
  0x28   : > { %1133 = vmatpush1.bf16.msra.mxu1 %v1695_v34  ;;  %v2184_v34 = vld [vmem:[%s2039_s11 + $0x8] sm:$0xff]  ;;  %v1796_v53 = vld [vmem:[%s2335_s1 + $0x390] ss:$8 sps:$4 sm:$0xff]  }
  0x29   : > { %1219 = vmatpush1.bf16.msra.mxu0 %v1696_v35  ;;  %1134 = vmatprep.subr.bf16.mxu1 %v1697_v36  ;;  %v2187_v35 = vld [vmem:[%s2039_s11 + $0x28] sm:$0xff]  ;;  %v2190_v36 = vld [vmem:[%s2039_s11 + $0x18] sm:$0xff] }
  0x2a   : > { %1220 = vmatprep.subr.bf16.mxu0 %v1699_v37  ;;  %v2193_v37 = vld [vmem:[%s2039_s11 + $0x38] sm:$0xff]  ;;  %v1790_v49 = vld [vmem:[%s2335_s1 + $0x380] ss:$8 sps:$4 sm:$0xff]   ;;  %v1804_v55 = vld [vmem:[%s2335_s1 + $0x3a4] ss:$8 sps:$4 sm:$0xff]  }
  0x2c   : > { %1135 = vmatpush1.bf16.msra.mxu1 %v1701_v38  ;;  %v1775_v38 = vld [vmem:[%s2335_s1 + $0x160] ss:$8 sps:$4 sm:$0xff]  }
  0x2d   : > { %1221 = vmatpush1.bf16.msra.mxu0 %v1702_v39  ;;  %1136 = vmatprep.subr.bf16.mxu1 %v1703_v40  ;;  %v1778_v39 = vld [vmem:[%s2335_s1 + $0x360] ss:$8 sps:$4 sm:$0xff]   ;;  %v1462_v40 = vcombine.high %v2184_v34, %v2187_v35 }
  0x2e   : > { %1222 = vmatprep.subr.bf16.mxu0 %v1705_v41  ;;  %v1783_v41 = vld [vmem:[%s2335_s1 + $0x174] ss:$8 sps:$4 sm:$0xff]  }
  0x30   : > { %1137 = vmatpush1.bf16.msra.mxu1 %v1707_v42  ;;  %v1786_v42 = vld [vmem:[%s2335_s1 + $0x374] ss:$8 sps:$4 sm:$0xff]  }
  0x31   : > { %1223 = vmatpush1.bf16.msra.mxu0 %v1708_v43  ;;  %1138 = vmatprep.subr.bf16.mxu1 %v1709_v44  ;;  %v1466_v43 = vcombine.high %v2190_v36, %v2193_v37  ;;  %v1781_v44 = vld [vmem:[%s2335_s1 + $0x170] ss:$8 sps:$4 sm:$0xff]  }
  0x32   : > { %1224 = vmatprep.subr.bf16.mxu0 %v1711_v45  ;;  %v1784_v45 = vld [vmem:[%s2335_s1 + $0x370] ss:$8 sps:$4 sm:$0xff]  }
  0x34   : > { %1139 = vmatpush1.bf16.msra.mxu1 %v1713_v46  ;;  %v1789_v46 = vld [vmem:[%s2335_s1 + $0x184] ss:$8 sps:$4 sm:$0xff]  }
  0x35   : > { %1225 = vmatpush1.bf16.msra.mxu0 %v1714_v47  ;;  %1140 = vmatprep.subr.bf16.mxu1 %v1715_v50  ;;  %v1792_v47 = vld [vmem:[%s2335_s1 + $0x384] ss:$8 sps:$4 sm:$0xff]   ;;  %v1795_v50 = vld [vmem:[%s2335_s1 + $0x194] ss:$8 sps:$4 sm:$0xff]  }
  0x36   : > { %1226 = vmatprep.subr.bf16.mxu0 %v1717_v51  ;;  %v1798_v51 = vld [vmem:[%s2335_s1 + $0x394] ss:$8 sps:$4 sm:$0xff]  }
  0x38   : > { %1141 = vmatpush1.bf16.msra.mxu1 %v1719_v56  ;;  %v1799_v56 = vld [vmem:[%s2335_s1 + $0x1a0] ss:$8 sps:$4 sm:$0xff]  }
  0x39   : > { %1227 = vmatpush1.bf16.msra.mxu0 %v1720_v57  ;;  %1142 = vmatprep.subr.bf16.mxu1 %v1721_v58  ;;  %v1802_v57 = vld [vmem:[%s2335_s1 + $0x3a0] ss:$8 sps:$4 sm:$0xff]   ;;  %v1807_v58 = vld [vmem:[%s2335_s1 + $0x1b4] ss:$8 sps:$4 sm:$0xff]  }
  0x3a   : > { %1228 = vmatprep.subr.bf16.mxu0 %v1723_v59  ;;  %v1810_v59 = vld [vmem:[%s2335_s1 + $0x3b4] ss:$8 sps:$4 sm:$0xff]  }
  0x3c   : > { %1143 = vmatpush1.bf16.msra.mxu1 %v1725_v60  ;;  %v1805_v60 = vld [vmem:[%s2335_s1 + $0x1b0] ss:$8 sps:$4 sm:$0xff]  }
  0x3d   : > { %1229 = vmatpush1.bf16.msra.mxu0 %v1726_v61  ;;  %1144 = vmatprep.subr.bf16.mxu1 %v1727_v62  ;;  %v1808_v61 = vld [vmem:[%s2335_s1 + $0x3b0] ss:$8 sps:$4 sm:$0xff]   ;;  %v1813_v62 = vld [vmem:[%s2335_s1 + $0x1c4] ss:$8 sps:$4 sm:$0xff]  }
  0x3e   : > { %1230 = vmatprep.subr.bf16.mxu0 %v1729_v63  ;;  %v1816_v63 = vld [vmem:[%s2335_s1 + $0x3c4] ss:$8 sps:$4 sm:$0xff]  }
  0x40   : > { %1145 = vmatpush1.bf16.msra.mxu1 %v1731_v0  ;;  %v1811_v0 = vld [vmem:[%s2335_s1 + $0x1c0] ss:$8 sps:$4 sm:$0xff]  }
  0x41   : > { %1231 = vmatpush1.bf16.msra.mxu0 %v1732_v1  ;;  %1146 = vmatprep.subr.bf16.mxu1 %v1733_v2  ;;  %v1814_v1 = vld [vmem:[%s2335_s1 + $0x3c0] ss:$8 sps:$4 sm:$0xff]   ;;  %v1819_v2 = vld [vmem:[%s2335_s1 + $0x1d4] ss:$8 sps:$4 sm:$0xff]  }
  0x42   : > { %1232 = vmatprep.subr.bf16.mxu0 %v1735_v3  ;;  %v1822_v3 = vld [vmem:[%s2335_s1 + $0x3d4] ss:$8 sps:$4 sm:$0xff]  }
  0x44   : > { %1147 = vmatpush1.bf16.msra.mxu1 %v1737_v4  ;;  %v1817_v4 = vld [vmem:[%s2335_s1 + $0x1d0] ss:$8 sps:$4 sm:$0xff]  }
  0x45   : > { %1233 = vmatpush1.bf16.msra.mxu0 %v1738_v5  ;;  %1159 = vmatprep.subr.bf16.mxu1 %v1741_v6  ;;  %v1820_v5 = vld [vmem:[%s2335_s1 + $0x3d0] ss:$8 sps:$4 sm:$0xff]   ;;  %v1825_v6 = vld [vmem:[%s2335_s1 + $0x1e4] ss:$8 sps:$4 sm:$0xff]  }
  0x46   : > { %1245 = vmatprep.subr.bf16.mxu0 %v1744_v7  ;;  %v1828_v7 = vld [vmem:[%s2335_s1 + $0x3e4] ss:$8 sps:$4 sm:$0xff]  }
  0x47   : > { %1149 = vmatmul.mubr.bf16.vlgmr.msra.gmra.mrb[0].mxu1 %v1459_v8  ;;  %v1823_v8 = vld [vmem:[%s2335_s1 + $0x1e0] ss:$8 sps:$4 sm:$0xff]  }
  0x48   : > { %1235 = vmatmul.mubr.bf16.vlgmr.msra.gmra.mrb[0].mxu0 %v1463_v10  ;;  %1160 = vmatpush1.bf16.msra.mxu1 %v1739_v9  ;;  %v1826_v9 = vld [vmem:[%s2335_s1 + $0x3e0] ss:$8 sps:$4 sm:$0xff]   ;;  %v1831_v10 = vld [vmem:[%s2335_s1 + $0x1f4] ss:$8 sps:$4 sm:$0xff]  }
  0x49   : > { %1246 = vmatpush1.bf16.msra.mxu0 %v1742_v11  ;;  %1161 = vmatprep.subr.bf16.mxu1 %v1747_v12  ;;  %v1834_v11 = vld [vmem:[%s2335_s1 + $0x3f4] ss:$8 sps:$4 sm:$0xff]   ;;  %v1829_v12 = vld [vmem:[%s2335_s1 + $0x1f0] ss:$8 sps:$4 sm:$0xff]  }
  0x4a   : > { %1247 = vmatprep.subr.bf16.mxu0 %v1750_v13  ;;  %1191 = vmatprep.mubr.bf16.mxu1 %v1462_v40  ;;  %v1832_v13 = vld [vmem:[%s2335_s1 + $0x3f0] ss:$8 sps:$4 sm:$0xff]  }
  0x4b   : > { %1277 = vmatprep.mubr.bf16.mxu0 %v1466_v43 }
  0x4c   : > { %1162 = vmatpush1.bf16.msra.mxu1 %v1745_v14  ;;  %v1461_v14 = vcombine.low %v2184_v34, %v2187_v35 }
  0x4d   : > { %1248 = vmatpush1.bf16.msra.mxu0 %v1748_v15  ;;  %1163 = vmatprep.subr.bf16.mxu1 %v1753_v16  ;;  %v1465_v15 = vcombine.low %v2190_v36, %v2193_v37  ;;  %v426_v16 = vlaneseq }
  0x4e   : > { %1249 = vmatprep.subr.bf16.mxu0 %v1756_v17 }
  0x4f   : > { %v427_v17 = vshrl.u32 %v426_v16, 7 }
  0x50   : > { %1164 = vmatpush1.bf16.msra.mxu1 %v1751_v18 }
  0x51   : > { %1250 = vmatpush1.bf16.msra.mxu0 %v1754_v19  ;;  %1165 = vmatprep.subr.bf16.mxu1 %v1759_v20  ;;  %v428_v18 = vsub.s32 0, %v427_v17  ;;  %v424_v19 = vld [vmem:[%s270_s29] sm:$0x3]  ;;  %v432_v20 = vsub.s32 1, %v427_v17 }
  0x52   : > { %1251 = vmatprep.subr.bf16.mxu0 %v1762_v21 }
  0x53   : > { %v429_v21 = vrot.slane %v424_v19, %v428_v18 }
  0x54   : > { %1166 = vmatpush1.bf16.msra.mxu1 %v1757_v22  ;;  %v433_v22 = vrot.slane %v424_v19, %v432_v20 }
  0x55   : > { %1252 = vmatpush1.bf16.msra.mxu0 %v1760_v23  ;;  %1167 = vmatprep.subr.bf16.mxu1 %v1765_v24 }
  0x56   : > { %1253 = vmatprep.subr.bf16.mxu0 %v1768_v25 }
  0x58   : > { %1168 = vmatpush1.bf16.msra.mxu1 %v1763_v26 }
  0x59   : > { %1254 = vmatpush1.bf16.msra.mxu0 %v1766_v27  ;;  %1169 = vmatprep.subr.bf16.mxu1 %v1771_v28 }
  0x5a   : > { %1255 = vmatprep.subr.bf16.mxu0 %v1774_v29 }
  0x5c   : > { %1170 = vmatpush1.bf16.msra.mxu1 %v1769_v30 }
  0x5d   : > { %1256 = vmatpush1.bf16.msra.mxu0 %v1772_v31  ;;  %1171 = vmatprep.subr.bf16.mxu1 %v1777_v32 }
  0x5e   : > { %1257 = vmatprep.subr.bf16.mxu0 %v1780_v33 }
  0x60   : > { %1172 = vmatpush1.bf16.msra.mxu1 %v1775_v38 }
  0x61   : > { %1258 = vmatpush1.bf16.msra.mxu0 %v1778_v39  ;;  %1173 = vmatprep.subr.bf16.mxu1 %v1783_v41 }
  0x62   : > { %1259 = vmatprep.subr.bf16.mxu0 %v1786_v42 }
  0x64   : > { %1174 = vmatpush1.bf16.msra.mxu1 %v1781_v44 }
  0x65   : > { %1260 = vmatpush1.bf16.msra.mxu0 %v1784_v45  ;;  %1175 = vmatprep.subr.bf16.mxu1 %v1789_v46 }
  0x66   : > { %1261 = vmatprep.subr.bf16.mxu0 %v1792_v47 }
  0x68   : > { %1176 = vmatpush1.bf16.msra.mxu1 %v1787_v48 }
  0x69   : > { %1262 = vmatpush1.bf16.msra.mxu0 %v1790_v49  ;;  %1177 = vmatprep.subr.bf16.mxu1 %v1795_v50 }
  0x6a   : > { %1263 = vmatprep.subr.bf16.mxu0 %v1798_v51 }
  0x6c   : > { %1178 = vmatpush1.bf16.msra.mxu1 %v1793_v52 }
  0x6d   : > { %1264 = vmatpush1.bf16.msra.mxu0 %v1796_v53  ;;  %1179 = vmatprep.subr.bf16.mxu1 %v1801_v54 }
  0x6e   : > { %1265 = vmatprep.subr.bf16.mxu0 %v1804_v55 }
  0x70   : > { %1180 = vmatpush1.bf16.msra.mxu1 %v1799_v56 }
  0x71   : > { %1266 = vmatpush1.bf16.msra.mxu0 %v1802_v57  ;;  %1181 = vmatprep.subr.bf16.mxu1 %v1807_v58 }
  0x72   : > { %1267 = vmatprep.subr.bf16.mxu0 %v1810_v59 }
  0x74   : > { %1182 = vmatpush1.bf16.msra.mxu1 %v1805_v60 }
  0x75   : > { %1268 = vmatpush1.bf16.msra.mxu0 %v1808_v61  ;;  %1183 = vmatprep.subr.bf16.mxu1 %v1813_v62 }
  0x76   : > { %1269 = vmatprep.subr.bf16.mxu0 %v1816_v63 }
  0x78   : > { %1184 = vmatpush1.bf16.msra.mxu1 %v1811_v0 }
  0x79   : > { %1270 = vmatpush1.bf16.msra.mxu0 %v1814_v1  ;;  %1185 = vmatprep.subr.bf16.mxu1 %v1819_v2 }
  0x7a   : > { %1271 = vmatprep.subr.bf16.mxu0 %v1822_v3 }
  0x7c   : > { %1186 = vmatpush1.bf16.msra.mxu1 %v1817_v4 }
  0x7d   : > { %1272 = vmatpush1.bf16.msra.mxu0 %v1820_v5  ;;  %1187 = vmatprep.subr.bf16.mxu1 %v1825_v6 }
  0x7e   : > { %1273 = vmatprep.subr.bf16.mxu0 %v1828_v7 }
  0x80   : > { %1188 = vmatpush1.bf16.msra.mxu1 %v1823_v8 }
  0x81   : > { %1274 = vmatpush1.bf16.msra.mxu0 %v1826_v9  ;;  %1189 = vmatprep.subr.bf16.mxu1 %v1831_v10 }
  0x82   : > { %1275 = vmatprep.subr.bf16.mxu0 %v1834_v11 }
  0x84   : > { %1190 = vmatpush1.bf16.msra.mxu1 %v1829_v12 }
  0x85   : > { %1276 = vmatpush1.bf16.msra.mxu0 %v1832_v13 }
  0x87   : > { %1192 = vmatmul.mubr.bf16.vlgmr.msra.gmra.mrb[0].mxu1 %v1461_v14 }
  0x88   : > { %1278 = vmatmul.mubr.bf16.vlgmr.msra.gmra.mrb[0].mxu0 %v1465_v15 }
 0x15a   : > { %v1193_v23 = vpop.f32.mrb[0].mxu1 }
 0x15b   : > { %v1279_v24 = vpop.f32.mrb[0].mxu0  ;;  %v1603_v25 = vadd.f32 %v1193_v23, %v429_v21  ;;  %v1195_v26 = vpop.f32.mrb[1].mxu1 }
 0x15c   : > { %v1281_v27 = vpop.f32.mrb[1].mxu0  ;;  %v1605_v28 = vadd.f32 %v1195_v26, %v433_v22  ;;  %v1197_v29 = vpop.f32.mrb[2].mxu1 }
 0x15d   : > { %v1283_v30 = vpop.f32.mrb[2].mxu0  ;;  %v1604_v31 = vadd.f32 %v1603_v25, %v1279_v24  ;;  %v1607_v32 = vadd.f32 %v1197_v29, %v429_v21  ;;  %v1199_v33 = vpop.f32.mrb[3].mxu1 }
 0x15e   : > { %v1285_v34 = vpop.f32.mrb[3].mxu0  ;;  %v1606_v35 = vadd.f32 %v1605_v28, %v1281_v27  ;;  %v1609_v36 = vadd.f32 %v1199_v33, %v433_v22 }
 0x15f   : > { %v1288_v37 = vmax.f32 %v1604_v31, 0.0  ;;  %v1608_v38 = vadd.f32 %v1607_v32, %v1283_v30 }
 0x160   : > { %v1289_v39 = vmax.f32 %v1606_v35, 0.0  ;;  %v1610_v40 = vadd.f32 %v1609_v36, %v1285_v34 }
 0x161   : > { %v1290_v41 = vmax.f32 %v1608_v38, 0.0 }
 0x162   : > { %v1601_v42 = vpack.c.bf16 %v1289_v39, %v1288_v37  ;;  %v1291_v43 = vmax.f32 %v1610_v40, 0.0 }
 0x164   : > { %1304 = vst [vmem:[%s285_s6] sm:$0xff] %v1601_v42  ;;  %v1602_v44 = vpack.c.bf16 %v1291_v43, %v1290_v41 }
 0x166   : > { %1305 = vst [vmem:[%s285_s6 + $0x8] sm:$0xff] %v1602_v44 }
 0x167 PF: > { %s13_s14 = sadd.s32 1, %s1857_s14   ;;  %s2338_s12 = smov %s1853_s13 }
 0x168   : > { %p10_p5 = scmp.ge.s32.totalorder %s13_s14, 4   ;;  %s2339_s13 = smov %s2341_s15 }
 0x16a   :  { %12 = sbr.rel (!%p10_p5) target bundleno = 2 (0x2), region = 68 }

// kernel: mobilenet3_deeplab3_forward.9
= control target key start
LH: loop header
LB: loop body
LE: loop exit
PB: predicated region body
PF: predicated region fallthrough
CT: control target
= control target key end

     0   :  { %s734_s12 = smov 0   ;;  %s736_s13 = smov 0   ;;  %s825_s0 = inlined_call_operand.vmem [shape: bf16[32,256], index: 0, kind: input, shape index: {}]   ;;  %s826_s1 = inlined_call_operand.vmem [shape: bf16[256,128], index: 1, kind: input, shape index: {}]   ;;  %s827_s2 = inlined_call_operand.vmem [shape: f32[1,128], index: 2, kind: input, shape index: {}]   ;;  %s828_s3 = inlined_call_operand.vmem [shape: f32[32,128], index: 3, kind: output, shape index: {}]  }
   0x1   :  { %s738_s14 = smov 0  }
   0x2 LB: > { %s32_s15 = sadd.s32 1, %s708_s13  ;;  %p597_p0 = scmp.ge.s32.totalorder %s712_s14, 1  ;;  %s712_s14 = sphi %s738_s14, %s13_s14   ;;  %s708_s13 = sphi %s736_s13, %s830_s13   ;;  %s704_s12 = sphi %s734_s12, %s829_s12  }
   0x3   : > { %p34_p1 = scmp.ge.s32.totalorder %s32_s15, 2  ;;  %p191_p2 = scmp.lt.s32.totalorder %s712_s14, 3 }
   0x5   : > { %s832_s15 = smov (%p34_p1, %s32_s15), 0  ;;  %p192_p3 = pnand %p597_p0, %p191_p2 }
   0x6   : > { %v671_v0 = vld [vmem:[%s826_s1 + $0x40] sm:$0xff] (!%p192_p3)   ;;  %s598_s18 = sshll.u32 (!%p192_p3), %s704_s12, 1  ;;  %v673_v2 = vld [vmem:[%s826_s1 + $0x48] sm:$0xff] (!%p192_p3)   ;;  %v675_v4 = vld [vmem:[%s826_s1 + $0x50] sm:$0xff] (!%p192_p3)  }
   0x7   : > { %195 = sbr.rel (%p192_p3) target bundleno = 259 (0x103), region = 32  ;;  %v672_v1 = vld [vmem:[%s826_s1] sm:$0xff] (!%p192_p3)   ;;  %625 = vmatprep.subr.bf16.mxu0 (!%p192_p3), %v671_v0  ;;  %v674_v3 = vld [vmem:[%s826_s1 + $0x8] sm:$0xff] (!%p192_p3)   ;;  %p236_p4 = scmp.lt.s32.totalorder (!%p192_p3), %s598_s18, 3  ;;  %v676_v5 = vld [vmem:[%s826_s1 + $0x10] sm:$0xff] (!%p192_p3)  }
   0x8   : > { %626 = vmatpush3.bf16.msra.mxu0 (!%p192_p3), %v672_v1  ;;  %v677_v6 = vld [vmem:[%s826_s1 + $0x58] sm:$0xff] (!%p192_p3)   ;;  %v679_v8 = vld [vmem:[%s826_s1 + $0x60] sm:$0xff] (!%p192_p3)   ;;  %v681_v10 = vld [vmem:[%s826_s1 + $0x68] sm:$0xff] (!%p192_p3)  }
   0x9   : > { %627 = vmatprep.subr.bf16.mxu0 (!%p192_p3), %v673_v2  ;;  %v678_v7 = vld [vmem:[%s826_s1 + $0x18] sm:$0xff] (!%p192_p3)   ;;  %v680_v9 = vld [vmem:[%s826_s1 + $0x20] sm:$0xff] (!%p192_p3)   ;;  %v682_v12 = vld [vmem:[%s826_s1 + $0x28] sm:$0xff] (!%p192_p3)  }
   0xa   : > { %v683_v13 = vld [vmem:[%s826_s1 + $0x70] sm:$0xff] (!%p192_p3)   ;;  %v685_v15 = vld [vmem:[%s826_s1 + $0x78] sm:$0xff] (!%p192_p3)   ;;  %v621_v20 = vld [vmem:[%s827_s2] ss:$0 sm:$0xff] (!%p192_p3) }
   0xb   : > { %v684_v14 = vld [vmem:[%s826_s1 + $0x30] sm:$0xff] (!%p192_p3)   ;;  %v686_v16 = vld [vmem:[%s826_s1 + $0x38] sm:$0xff] (!%p192_p3)  }
   0xc   : > { %628 = vmatpush3.bf16.msra.mxu0 (!%p192_p3), %v674_v3 }
   0xd   : > { %629 = vmatprep.subr.bf16.mxu0 (!%p192_p3), %v675_v4 }
   0xe   : > { %s834_s18 = smov (!%p236_p4, %s598_s18), 3 }
   0xf   : > { %s624_s6 = sshll.u32 %s834_s18, 3 }
  0x10   : > { %630 = vmatpush3.bf16.msra.mxu0 %v676_v5  ;;  %s243_s11 = scalar_lea.vmem %s825_s0, %s624_s6  ;;  %s265_s8 = scalar_lea.vmem %s828_s3, %s624_s6 }
  0x11   : > { %631 = vmatprep.subr.bf16.mxu0 %v677_v6  ;;  %v689_v11 = vld [vmem:[%s243_s11 + $0x4] ss:$8 sps:$4 sm:$0xff]   ;;  %v687_v17 = vld [vmem:[%s243_s11] ss:$8 sps:$4 sm:$0xff]  }
  0x12   : > { %448 = vmatprep.mubr.bf16.mxu0 %v689_v11 }
  0x14   : > { %632 = vmatpush3.bf16.msra.mxu0 %v678_v7 }
  0x15   : > { %633 = vmatprep.subr.bf16.mxu0 %v679_v8 }
  0x18   : > { %634 = vmatpush3.bf16.msra.mxu0 %v680_v9 }
  0x19   : > { %635 = vmatprep.subr.bf16.mxu0 %v681_v10 }
  0x1c   : > { %636 = vmatpush3.bf16.msra.mxu0 %v682_v12 }
  0x1d   : > { %637 = vmatprep.subr.bf16.mxu0 %v683_v13 }
  0x20   : > { %638 = vmatpush3.bf16.msra.mxu0 %v684_v14 }
  0x21   : > { %639 = vmatprep.subr.bf16.mxu0 %v685_v15 }
  0x24   : > { %640 = vmatpush3.bf16.msra.mxu0 %v686_v16 }
  0x27   : > { %449 = vmatmul.mubr.bf16.vlgmr.msra.gmra.mrb[0].mxu0 %v687_v17 }
  0xfa   : > { %v641_v18 = vpop.f32.mrb[0].mxu0 }
  0xfb   : > { %v642_v19 = vpop.f32.mrb[1].mxu0 }
  0xfc   : > { %v643_v21 = vadd.f32 %v642_v19, %v641_v18  ;;  %v644_v22 = vpop.f32.mrb[2].mxu0 }
  0xfd   : > { %v645_v23 = vpop.f32.mrb[3].mxu0 }
  0xfe   : > { %v473_v24 = vadd.f32 %v643_v21, %v621_v20  ;;  %v646_v25 = vadd.f32 %v645_v23, %v644_v22 }
 0x100   : > { %475 = vst [vmem:[%s265_s8] sm:$0xff] %v473_v24  ;;  %v474_v26 = vadd.f32 %v646_v25, %v621_v20 }
 0x102   : > { %476 = vst [vmem:[%s265_s8 + $0x8] sm:$0xff] %v474_v26 }
 0x103 PF: > { %s13_s14 = sadd.s32 1, %s712_s14   ;;  %s829_s12 = smov %s708_s13 }
 0x104   : > { %p10_p5 = scmp.ge.s32.totalorder %s13_s14, 4   ;;  %s830_s13 = smov %s832_s15 }
 0x106   :  { %12 = sbr.rel (!%p10_p5) target bundleno = 2 (0x2), region = 76 }

// kernel: mobilenet3_deeplab3_forward.8
= control target key start
LH: loop header
LB: loop body
LE: loop exit
PB: predicated region body
PF: predicated region fallthrough
CT: control target
= control target key end

     0   :  { %s5123_s12 = smov 0   ;;  %s5125_s13 = smov 0   ;;  %s6528_s0 = inlined_call_operand.vmem [shape: bf16[2,6,18,256], index: 0, kind: input, shape index: {}]   ;;  %s6529_s1 = inlined_call_operand.vmem [shape: bf16[9,256,256], index: 1, kind: input, shape index: {}]   ;;  %s6530_s2 = inlined_call_operand.vmem [shape: f32[1,256], index: 2, kind: input, shape index: {}]   ;;  %s6531_s3 = inlined_call_operand.vmem [shape: bf16[2,4,16,256], index: 3, kind: output, shape index: {}]  }
   0x1   :  { %s5127_s14 = smov 0  }
   0x2 LB: > { %s25_s15 = sadd.s32 1, %s5097_s13  ;;  %p3742_p0 = scmp.ge.s32.totalorder %s5101_s14, 1  ;;  %s5101_s14 = sphi %s5127_s14, %s13_s14   ;;  %s5097_s13 = sphi %s5125_s13, %s6537_s13   ;;  %s5093_s12 = sphi %s5123_s12, %s6536_s12  }
   0x3   : > { %p27_p1 = scmp.ge.s32.totalorder %s25_s15, 2  ;;  %p172_p2 = scmp.lt.s32.totalorder %s5101_s14, 3 }
   0x5   : > { %s6539_s15 = smov (%p27_p1, %s25_s15), 0  ;;  %p173_p3 = pnand %p3742_p0, %p172_p2 }
   0x6   : > { %v4626_v0 = vld [vmem:[%s6529_s1 + $0x104] ss:$8 sps:$4 sm:$0xff] (!%p173_p3)   ;;  %v4630_v2 = vld [vmem:[%s6529_s1 + $0x100] ss:$8 sps:$4 sm:$0xff] (!%p173_p3)   ;;  %v4632_v4 = vld [vmem:[%s6529_s1 + $0x114] ss:$8 sps:$4 sm:$0xff] (!%p173_p3)  }
   0x7   : > { %176 = sbr.rel (%p173_p3) target bundleno = 560 (0x230), region = 32  ;;  %v4628_v1 = vld [vmem:[%s6529_s1 + $0x404] ss:$8 sps:$4 sm:$0xff] (!%p173_p3)   ;;  %603 = vmatprep.subr.bf16.mxu1 (!%p173_p3), %v4626_v0  ;;  %v4631_v3 = vld [vmem:[%s6529_s1 + $0x400] ss:$8 sps:$4 sm:$0xff] (!%p173_p3)   ;;  %p209_p4 = scmp.lt.s32.totalorder (!%p173_p3), %s5093_s12, 1 }
   0x8   : > { %1970 = vmatprep.subr.bf16.mxu0 (!%p173_p3), %v4628_v1  ;;  %604 = vmatpush1.bf16.msra.mxu1 (!%p173_p3), %v4630_v2  ;;  %v4634_v5 = vld [vmem:[%s6529_s1 + $0x414] ss:$8 sps:$4 sm:$0xff] (!%p173_p3)   ;;  %v4636_v6 = vld [vmem:[%s6529_s1 + $0x110] ss:$8 sps:$4 sm:$0xff] (!%p173_p3)   ;;  %v4638_v8 = vld [vmem:[%s6529_s1 + $0x124] ss:$8 sps:$4 sm:$0xff] (!%p173_p3)  }
   0x9   : > { %1971 = vmatpush1.bf16.msra.mxu0 (!%p173_p3), %v4631_v3  ;;  %605 = vmatprep.subr.bf16.mxu1 (!%p173_p3), %v4632_v4  ;;  %v4637_v7 = vld [vmem:[%s6529_s1 + $0x410] ss:$8 sps:$4 sm:$0xff] (!%p173_p3)   ;;  %v4640_v9 = vld [vmem:[%s6529_s1 + $0x424] ss:$8 sps:$4 sm:$0xff] (!%p173_p3)   ;;  %v4642_v10 = vld [vmem:[%s6529_s1 + $0x120] ss:$8 sps:$4 sm:$0xff] (!%p173_p3)  }
   0xa   : > { %1972 = vmatprep.subr.bf16.mxu0 (!%p173_p3), %v4634_v5  ;;  %v4643_v11 = vld [vmem:[%s6529_s1 + $0x420] ss:$8 sps:$4 sm:$0xff] (!%p173_p3)   ;;  %v4644_v12 = vld [vmem:[%s6529_s1 + $0x134] ss:$8 sps:$4 sm:$0xff] (!%p173_p3)   ;;  %v4648_v14 = vld [vmem:[%s6529_s1 + $0x130] ss:$8 sps:$4 sm:$0xff] (!%p173_p3)  }
   0xb   : > { %v4646_v13 = vld [vmem:[%s6529_s1 + $0x434] ss:$8 sps:$4 sm:$0xff] (!%p173_p3)   ;;  %v4649_v15 = vld [vmem:[%s6529_s1 + $0x430] ss:$8 sps:$4 sm:$0xff] (!%p173_p3)   ;;  %v4650_v16 = vld [vmem:[%s6529_s1 + $0x144] ss:$8 sps:$4 sm:$0xff] (!%p173_p3)  }
   0xc   : > { %606 = vmatpush1.bf16.msra.mxu1 (!%p173_p3), %v4636_v6  ;;  %v4652_v17 = vld [vmem:[%s6529_s1 + $0x444] ss:$8 sps:$4 sm:$0xff] (!%p173_p3)   ;;  %v4654_v18 = vld [vmem:[%s6529_s1 + $0x140] ss:$8 sps:$4 sm:$0xff] (!%p173_p3)   ;;  %v4656_v20 = vld [vmem:[%s6529_s1 + $0x154] ss:$8 sps:$4 sm:$0xff] (!%p173_p3)  }
   0xd   : > { %1973 = vmatpush1.bf16.msra.mxu0 (!%p173_p3), %v4637_v7  ;;  %607 = vmatprep.subr.bf16.mxu1 (!%p173_p3), %v4638_v8  ;;  %v4655_v19 = vld [vmem:[%s6529_s1 + $0x440] ss:$8 sps:$4 sm:$0xff] (!%p173_p3)   ;;  %v4658_v21 = vld [vmem:[%s6529_s1 + $0x454] ss:$8 sps:$4 sm:$0xff] (!%p173_p3)   ;;  %v4660_v22 = vld [vmem:[%s6529_s1 + $0x150] ss:$8 sps:$4 sm:$0xff] (!%p173_p3)  }
   0xe   : > { %1974 = vmatprep.subr.bf16.mxu0 %v4640_v9  ;;  %v4661_v23 = vld [vmem:[%s6529_s1 + $0x450] ss:$8 sps:$4 sm:$0xff]   ;;  %v4662_v24 = vld [vmem:[%s6529_s1 + $0x164] ss:$8 sps:$4 sm:$0xff]   ;;  %v4666_v26 = vld [vmem:[%s6529_s1 + $0x160] ss:$8 sps:$4 sm:$0xff]  }
   0xf   : > { %v4664_v25 = vld [vmem:[%s6529_s1 + $0x464] ss:$8 sps:$4 sm:$0xff]   ;;  %v4667_v27 = vld [vmem:[%s6529_s1 + $0x460] ss:$8 sps:$4 sm:$0xff]   ;;  %v4668_v28 = vld [vmem:[%s6529_s1 + $0x174] ss:$8 sps:$4 sm:$0xff]  }
  0x10   : > { %608 = vmatpush1.bf16.msra.mxu1 %v4642_v10  ;;  %v4670_v29 = vld [vmem:[%s6529_s1 + $0x474] ss:$8 sps:$4 sm:$0xff]   ;;  %v4672_v30 = vld [vmem:[%s6529_s1 + $0x170] ss:$8 sps:$4 sm:$0xff]   ;;  %v4674_v32 = vld [vmem:[%s6529_s1 + $0x184] ss:$8 sps:$4 sm:$0xff]  }
  0x11   : > { %1975 = vmatpush1.bf16.msra.mxu0 %v4643_v11  ;;  %609 = vmatprep.subr.bf16.mxu1 %v4644_v12  ;;  %v4673_v31 = vld [vmem:[%s6529_s1 + $0x470] ss:$8 sps:$4 sm:$0xff]   ;;  %v4676_v33 = vld [vmem:[%s6529_s1 + $0x484] ss:$8 sps:$4 sm:$0xff]   ;;  %v4678_v34 = vld [vmem:[%s6529_s1 + $0x180] ss:$8 sps:$4 sm:$0xff]  }
  0x12   : > { %1976 = vmatprep.subr.bf16.mxu0 %v4646_v13  ;;  %v4679_v35 = vld [vmem:[%s6529_s1 + $0x480] ss:$8 sps:$4 sm:$0xff]   ;;  %s6541_s12 = smov (!%p209_p4, %s5093_s12), 1  ;;  %v4680_v36 = vld [vmem:[%s6529_s1 + $0x194] ss:$8 sps:$4 sm:$0xff]   ;;  %vm961_vm3 = vcmask 1042432  }
  0x13   : > { %v4682_v37 = vld [vmem:[%s6529_s1 + $0x494] ss:$8 sps:$4 sm:$0xff]   ;;  %v4684_v38 = vld [vmem:[%s6529_s1 + $0x190] ss:$8 sps:$4 sm:$0xff]   ;;  %s4601_s25 = smul.u32 144, %s6541_s12  ;;  %vm962_vm4 = vcmask 1046532  }
  0x14   : > { %610 = vmatpush1.bf16.msra.mxu1 %v4648_v14  ;;  %v4685_v39 = vld [vmem:[%s6529_s1 + $0x490] ss:$8 sps:$4 sm:$0xff]   ;;  %v4686_v40 = vld [vmem:[%s6529_s1 + $0x1a4] ss:$8 sps:$4 sm:$0xff]   ;;  %v4690_v42 = vld [vmem:[%s6529_s1 + $0x1a0] ss:$8 sps:$4 sm:$0xff]  }
  0x15   : > { %1977 = vmatpush1.bf16.msra.mxu0 %v4649_v15  ;;  %611 = vmatprep.subr.bf16.mxu1 %v4650_v16  ;;  %v4688_v41 = vld [vmem:[%s6529_s1 + $0x4a4] ss:$8 sps:$4 sm:$0xff]   ;;  %v4691_v43 = vld [vmem:[%s6529_s1 + $0x4a0] ss:$8 sps:$4 sm:$0xff]   ;;  %s5283_s11 = scalar_lea.vmem %s6528_s0, %s4601_s25  ;;  %v4692_v44 = vld [vmem:[%s6529_s1 + $0x1b4] ss:$8 sps:$4 sm:$0xff]  }
  0x16   : > { %1978 = vmatprep.subr.bf16.mxu0 %v4652_v17  ;;  %vm279_vm0 = vsmask.f32 3328  ;;  %v4694_v45 = vld [vmem:[%s6529_s1 + $0x4b4] ss:$8 sps:$4 sm:$0xff]   ;;  %vm280_vm1 = vsmask.f32 7440  ;;  %vm5410_vm5 = vmor %vm961_vm3, %vm962_vm4 }
  0x17   : > { %v4696_v46 = vld [vmem:[%s6529_s1 + $0x1b0] ss:$8 sps:$4 sm:$0xff]   ;;  %v5298_v48 = vld [vmem:[%s5283_s11] sm:$0xff]  ;;  %v5301_v49 = vld [vmem:[%s5283_s11 + $0x8] sm:$0xff]  ;;  %s4432_s21 = sshll.u32 %s6541_s12, 6 }
  0x18   : > { %612 = vmatpush1.bf16.msra.mxu1 %v4654_v18  ;;  %v4697_v47 = vld [vmem:[%s6529_s1 + $0x4b0] ss:$8 sps:$4 sm:$0xff]   ;;  %v283_v51 = vshrl.u32 %v5298_v48, 16  ;;  %v286_v52 = vshll.u32 %v5298_v48, 16  ;;  %v292_v53 = vshll.u32 %v5301_v49, 16  ;;  %v296_v54 = vshrl.u32 %v5301_v49, 16  ;;  %vm5342_vm2 = vmor %vm279_vm0, %vm280_vm1  ;;  %s6495_s23 = scalar_lea.vmem %s6531_s3, %s4432_s21 }
  0x19   : > { %1979 = vmatpush1.bf16.msra.mxu0 %v4655_v19  ;;  %613 = vmatprep.subr.bf16.mxu1 %v4656_v20  ;;  %v5304_v50 = vld [vmem:[%s5283_s11 + $0x10] sm:$0x11]  ;;  %v4698_v56 = vld [vmem:[%s6529_s1 + $0x1c4] ss:$8 sps:$4 sm:$0xff]   ;;  %v3818_v60 = vcombine.low %v5298_v48, %v5301_v49  ;;  %v4702_v61 = vld [vmem:[%s6529_s1 + $0x1c0] ss:$8 sps:$4 sm:$0xff]  }
  0x1a   : > { %1980 = vmatprep.subr.bf16.mxu0 %v4658_v21  ;;  %v302_v55 = vshll.u32 %v5304_v50, 16  ;;  %v4700_v57 = vld [vmem:[%s6529_s1 + $0x4c4] ss:$8 sps:$4 sm:$0xff]   ;;  %v285_v58 = vrot.slane %v283_v51, 4  ;;  %v288_v59 = vrot.slane %v286_v52, 5  ;;  %v294_v63 = vrot.slane %v292_v53, 5 }
  0x1b   : > { %v4703_v62 = vld [vmem:[%s6529_s1 + $0x4c0] ss:$8 sps:$4 sm:$0xff]   ;;  %v298_v0 = vrot.slane %v296_v54, 4  ;;  %v5326_v1 = vld [vmem:[%s5283_s11 + $0x18] sm:$0xff] }
  0x1c   : > { %614 = vmatpush1.bf16.msra.mxu1 %v4660_v22  ;;  %v5329_v2 = vld [vmem:[%s5283_s11 + $0x20] sm:$0xff]  ;;  %v289_v3 = vor.u32 %v288_v59, %v285_v58  ;;  %v5332_v4 = vld [vmem:[%s5283_s11 + $0x28] sm:$0x11]  ;;  %v1650_v5 = vshrl.u32 %v5326_v1, 16  ;;  %v1653_v6 = vshll.u32 %v5326_v1, 16  ;;  %v304_v11 = vrot.slane %v302_v55, 5 }
  0x1d   : > { %1981 = vmatpush1.bf16.msra.mxu0 %v4661_v23  ;;  %615 = vmatprep.subr.bf16.mxu1 %v4662_v24  ;;  %v1659_v7 = vshll.u32 %v5329_v2, 16  ;;  %v4704_v8 = vld [vmem:[%s6529_s1 + $0x1d4] ss:$8 sps:$4 sm:$0xff]   ;;  %v299_v10 = vor.u32 %v298_v0, %v294_v63  ;;  %v1663_v12 = vshrl.u32 %v5329_v2, 16  ;;  %v1669_v13 = vshll.u32 %v5332_v4, 16 }
  0x1e   : > { %1982 = vmatprep.subr.bf16.mxu0 %v4664_v25  ;;  %v4706_v14 = vld [vmem:[%s6529_s1 + $0x4d4] ss:$8 sps:$4 sm:$0xff]   ;;  %v290_v15 = vrot.slane %v289_v3, 4  ;;  %v1652_v16 = vrot.slane %v1650_v5, 4  ;;  %v1655_v17 = vrot.slane %v1653_v6, 5  ;;  %v3821_v21 = vcombine.high %v5326_v1, %v5329_v2 }
  0x1f   : > { %v1661_v18 = vrot.slane %v1659_v7, 5  ;;  %v300_v19 = vrot.slane %v299_v10, 4  ;;  %v1665_v20 = vrot.slane %v1663_v12, 4  ;;  %v3820_v24 = vcombine.low %v5326_v1, %v5329_v2  ;;  %v4708_v25 = vld [vmem:[%s6529_s1 + $0x1d0] ss:$8 sps:$4 sm:$0xff]  }
  0x20   : > { %616 = vmatpush1.bf16.msra.mxu1 %v4666_v26  ;;  %v295_v22 = vsel %vm5342_vm2, %v290_v15, %v294_v63  ;;  %v1656_v23 = vor.u32 %v1655_v17, %v1652_v16  ;;  %v4709_v26 = vld [vmem:[%s6529_s1 + $0x4d0] ss:$8 sps:$4 sm:$0xff]   ;;  %v4722_v54 = vld [vmem:[%s6529_s1] ss:$8 sps:$4 sm:$0xff]   ;;  %v4733_v58 = vld [vmem:[%s6529_s1 + $0x514] ss:$8 sps:$4 sm:$0xff]  }
  0x21   : > { %1983 = vmatpush1.bf16.msra.mxu0 %v4667_v27  ;;  %617 = vmatprep.subr.bf16.mxu1 %v4668_v28  ;;  %v305_v27 = vsel %vm5342_vm2, %v300_v19, %v304_v11  ;;  %v1666_v28 = vor.u32 %v1665_v20, %v1661_v18  ;;  %v4725_v55 = vld [vmem:[%s6529_s1 + $0x500] ss:$8 sps:$4 sm:$0xff]   ;;  %v4728_v59 = vld [vmem:[%s6529_s1 + $0x10] ss:$8 sps:$4 sm:$0xff]   ;;  %v4739_v63 = vld [vmem:[%s6529_s1 + $0x524] ss:$8 sps:$4 sm:$0xff]  }
  0x22   : > { %1984 = vmatprep.subr.bf16.mxu0 %v4670_v29  ;;  %v1671_v29 = vrot.slane %v1669_v13, 5  ;;  %v3778_v52 = vcombine.low %v295_v22, %v305_v27  ;;  %v4734_v0 = vld [vmem:[%s6529_s1 + $0x20] ss:$8 sps:$4 sm:$0xff]   ;;  %v4742_v5 = vld [vmem:[%s6529_s1 + $0x34] ss:$8 sps:$4 sm:$0xff]  }
  0x23   : > { %v4737_v3 = vld [vmem:[%s6529_s1 + $0x520] ss:$8 sps:$4 sm:$0xff]   ;;  %v4745_v6 = vld [vmem:[%s6529_s1 + $0x534] ss:$8 sps:$4 sm:$0xff]   ;;  %v4740_v7 = vld [vmem:[%s6529_s1 + $0x30] ss:$8 sps:$4 sm:$0xff]  }
  0x24   : > { %618 = vmatpush1.bf16.msra.mxu1 %v4672_v30  ;;  %v4710_v30 = vld [vmem:[%s6529_s1 + $0x1e4] ss:$8 sps:$4 sm:$0xff]   ;;  %v5474_v15 = vld [vmem:[%s5283_s11 + $0x38] sm:$0xff] }
  0x25   : > { %1985 = vmatpush1.bf16.msra.mxu0 %v4673_v31  ;;  %619 = vmatprep.subr.bf16.mxu1 %v4674_v32  ;;  %v4712_v31 = vld [vmem:[%s6529_s1 + $0x4e4] ss:$8 sps:$4 sm:$0xff]   ;;  %v3779_v32 = vcombine.high %v295_v22, %v305_v27  ;;  %v1683_v20 = vshll.u32 %v5474_v15, 16  ;;  %v1687_v22 = vshrl.u32 %v5474_v15, 16 }
  0x26   : > { %1986 = vmatprep.subr.bf16.mxu0 %v4676_v33  ;;  %v1657_v33 = vrot.slane %v1656_v23, 4  ;;  %v5461_v10 = vld [vmem:[%s5283_s11 + $0x28] sm:$0x11]  ;;  %v5477_v16 = vld [vmem:[%s5283_s11 + $0x40] sm:$0x11] }
  0x27   : > { %635 = vmatprep.mubr.bf16.mxu1 %v3779_v32  ;;  %v4748_v11 = vld [vmem:[%s6529_s1 + $0x44] ss:$8 sps:$4 sm:$0xff]   ;;  %v326_v13 = vshll.u32 %v5461_v10, 16  ;;  %v1693_v23 = vshll.u32 %v5477_v16, 16  ;;  %v1689_v32 = vrot.slane %v1687_v22, 4  ;;  %v5551_v22 = vrot.slane %v5329_v2, 5 }
  0x28   : > { %620 = vmatpush1.bf16.msra.mxu1 %v4678_v34  ;;  %v5371_v34 = vrot.slane %v1666_v28, 4  ;;  %v4751_v12 = vld [vmem:[%s6529_s1 + $0x544] ss:$8 sps:$4 sm:$0xff]   ;;  %v4844_v2 = vld [vmem:[%s6529_s1 + $0x240] ss:$8 sps:$4 sm:$0xff]  }
  0x29   : > { %1987 = vmatpush1.bf16.msra.mxu0 %v4679_v35  ;;  %621 = vmatprep.subr.bf16.mxu1 %v4680_v36  ;;  %v5375_v35 = vsel %vm5342_vm2, %v1657_v33, %v1661_v18  ;;  %v4714_v36 = vld [vmem:[%s6529_s1 + $0x1e0] ss:$8 sps:$4 sm:$0xff]   ;;  %v328_v19 = vrot.slane %v326_v13, 5  ;;  %v4754_v33 = vld [vmem:[%s6529_s1 + $0x54] ss:$8 sps:$4 sm:$0xff]  }
  0x2a   : > { %1988 = vmatprep.subr.bf16.mxu0 %v4682_v37  ;;  %v4715_v37 = vld [vmem:[%s6529_s1 + $0x4e0] ss:$8 sps:$4 sm:$0xff]  }
  0x2c   : > { %622 = vmatpush1.bf16.msra.mxu1 %v4684_v38  ;;  %v1672_v38 = vsel %vm5342_vm2, %v5371_v34, %v1671_v29  ;;  %v4749_v29 = vld [vmem:[%s6529_s1 + $0x540] ss:$8 sps:$4 sm:$0xff]  }
  0x2d   : > { %1989 = vmatpush1.bf16.msra.mxu0 %v4685_v39  ;;  %623 = vmatprep.subr.bf16.mxu1 %v4686_v40  ;;  %v4716_v39 = vld [vmem:[%s6529_s1 + $0x1f4] ss:$8 sps:$4 sm:$0xff]   ;;  %v4058_v53 = vcombine.low %v5375_v35, %v1672_v38 }
  0x2e   : > { %1990 = vmatprep.subr.bf16.mxu0 %v4688_v41  ;;  %v4718_v40 = vld [vmem:[%s6529_s1 + $0x4f4] ss:$8 sps:$4 sm:$0xff]   ;;  %v4059_v41 = vcombine.high %v5375_v35, %v1672_v38 }
  0x30   : > { %624 = vmatpush1.bf16.msra.mxu1 %v4690_v42  ;;  %v4720_v42 = vld [vmem:[%s6529_s1 + $0x1f0] ss:$8 sps:$4 sm:$0xff]   ;;  %2002 = vmatprep.mubr.bf16.mxu0 %v4059_v41  ;;  %v5506_v41 = vld [vmem:[%s5283_s11 + $0x40] sm:$0x11] }
  0x31   : > { %1991 = vmatpush1.bf16.msra.mxu0 %v4691_v43  ;;  %625 = vmatprep.subr.bf16.mxu1 %v4692_v44  ;;  %v4721_v43 = vld [vmem:[%s6529_s1 + $0x4f0] ss:$8 sps:$4 sm:$0xff]   ;;  %v969_v44 = vrot.slane %v5304_v50, 5 }
  0x32   : > { %1992 = vmatprep.subr.bf16.mxu0 %v4694_v45  ;;  %v966_v45 = vrot.slane %v5301_v49, 5 }
  0x34   : > { %626 = vmatpush1.bf16.msra.mxu1 %v4696_v46  ;;  %v4724_v46 = vld [vmem:[%s6529_s1 + $0x4] ss:$8 sps:$4 sm:$0xff]   ;;  %v968_v51 = vrot.slane %v966_v45, 4 }
  0x35   : > { %1993 = vmatpush1.bf16.msra.mxu0 %v4697_v47  ;;  %627 = vmatprep.subr.bf16.mxu1 %v4698_v56  ;;  %v4727_v47 = vld [vmem:[%s6529_s1 + $0x504] ss:$8 sps:$4 sm:$0xff]  }
  0x36   : > { %1994 = vmatprep.subr.bf16.mxu0 %v4700_v57  ;;  %v5422_v56 = vsel %vm5410_vm5, %v968_v51, %v969_v44  ;;  %v4730_v57 = vld [vmem:[%s6529_s1 + $0x14] ss:$8 sps:$4 sm:$0xff]   ;;  %v350_v44 = vshll.u32 %v5506_v41, 16  ;;  %v5519_v51 = vld [vmem:[%s5283_s11 + $0x48] sm:$0xff] }
  0x38   : > { %628 = vmatpush1.bf16.msra.mxu1 %v4702_v61  ;;  %v4731_v61 = vld [vmem:[%s6529_s1 + $0x510] ss:$8 sps:$4 sm:$0xff]  }
  0x39   : > { %1995 = vmatpush1.bf16.msra.mxu0 %v4703_v62  ;;  %629 = vmatprep.subr.bf16.mxu1 %v4704_v8  ;;  %v4736_v62 = vld [vmem:[%s6529_s1 + $0x24] ss:$8 sps:$4 sm:$0xff]   ;;  %v4743_v8 = vld [vmem:[%s6529_s1 + $0x530] ss:$8 sps:$4 sm:$0xff]  }
  0x3a   : > { %1996 = vmatprep.subr.bf16.mxu0 %v4706_v14  ;;  %v5471_v14 = vld [vmem:[%s5283_s11 + $0x30] sm:$0xff] }
  0x3b   : > { %v1674_v17 = vshrl.u32 %v5471_v14, 16  ;;  %v1677_v18 = vshll.u32 %v5471_v14, 16  ;;  %v5489_v28 = vcombine.low %v5471_v14, %v5474_v15 }
  0x3c   : > { %630 = vmatpush1.bf16.msra.mxu1 %v4708_v25  ;;  %v4746_v25 = vld [vmem:[%s6529_s1 + $0x40] ss:$8 sps:$4 sm:$0xff]  }
  0x3d   : > { %1997 = vmatpush1.bf16.msra.mxu0 %v4709_v26  ;;  %631 = vmatprep.subr.bf16.mxu1 %v4710_v30  ;;  %v1676_v26 = vrot.slane %v1674_v17, 4  ;;  %v1679_v27 = vrot.slane %v1677_v18, 5  ;;  %v329_v30 = vsel %vm5342_vm2, %v5371_v34, %v328_v19  ;;  %v4757_v34 = vld [vmem:[%s6529_s1 + $0x554] ss:$8 sps:$4 sm:$0xff]   ;;  %v4761_v18 = vld [vmem:[%s6529_s1 + $0x560] ss:$8 sps:$4 sm:$0xff]  }
  0x3e   : > { %1998 = vmatprep.subr.bf16.mxu0 %v4712_v31  ;;  %v1685_v31 = vrot.slane %v1683_v20, 5  ;;  %v3780_v38 = vcombine.low %v5375_v35, %v329_v30  ;;  %v4766_v19 = vld [vmem:[%s6529_s1 + $0x74] ss:$8 sps:$4 sm:$0xff]  }
  0x40   : > { %632 = vmatpush1.bf16.msra.mxu1 %v4714_v36  ;;  %v3781_v36 = vcombine.high %v5375_v35, %v329_v30  ;;  %v4755_v35 = vld [vmem:[%s6529_s1 + $0x550] ss:$8 sps:$4 sm:$0xff]  }
  0x41   : > { %1999 = vmatpush1.bf16.msra.mxu0 %v4715_v37  ;;  %633 = vmatprep.subr.bf16.mxu1 %v4716_v39  ;;  %v1680_v37 = vor.u32 %v1679_v27, %v1676_v26  ;;  %v1690_v39 = vor.u32 %v1689_v32, %v1685_v31  ;;  %v5559_v30 = vld [vmem:[%s5283_s11 + $0x58] sm:$0x11] }
  0x42   : > { %2000 = vmatprep.subr.bf16.mxu0 %v4718_v40  ;;  %v1695_v40 = vrot.slane %v1693_v23, 5  ;;  %v4767_v32 = vld [vmem:[%s6529_s1 + $0x570] ss:$8 sps:$4 sm:$0xff]  }
  0x44   : > { %634 = vmatpush1.bf16.msra.mxu1 %v4720_v42  ;;  %v4752_v42 = vld [vmem:[%s6529_s1 + $0x50] ss:$8 sps:$4 sm:$0xff]  }
  0x45   : > { %2001 = vmatpush1.bf16.msra.mxu0 %v4721_v43  ;;  %876 = vmatprep.subr.bf16.mxu1 %v4724_v46  ;;  %v1681_v43 = vrot.slane %v1680_v37, 4  ;;  %v4760_v46 = vld [vmem:[%s6529_s1 + $0x64] ss:$8 sps:$4 sm:$0xff]  }
  0x46   : > { %2328 = vmatprep.subr.bf16.mxu0 %v4727_v47  ;;  %v1691_v47 = vrot.slane %v1690_v39, 4  ;;  %v5575_v39 = vld [vmem:[%s5283_s11 + $0x70] sm:$0x11] }
  0x47   : > { %636 = vmatmul.mubr.bf16.vlgmr.msra.gmra.mrb[0].mxu1 %v3778_v52  ;;  %v5522_v52 = vld [vmem:[%s5283_s11 + $0x50] sm:$0xff] }
  0x48   : > { %2003 = vmatmul.mubr.bf16.vlgmr.msra.gmra.mrb[0].mxu0 %v4058_v53  ;;  %877 = vmatpush1.bf16.msra.mxu1 %v4722_v54  ;;  %v1686_v53 = vsel %vm5342_vm2, %v1681_v43, %v1685_v31  ;;  %v352_v54 = vrot.slane %v350_v44, 5  ;;  %v3824_v23 = vcombine.low %v5519_v51, %v5522_v52  ;;  %v4764_v31 = vld [vmem:[%s6529_s1 + $0x70] ss:$8 sps:$4 sm:$0xff]   ;;  %v4772_v44 = vld [vmem:[%s6529_s1 + $0x84] ss:$8 sps:$4 sm:$0xff]  }
  0x49   : > { %2329 = vmatpush1.bf16.msra.mxu0 %v4725_v55  ;;  %878 = vmatprep.subr.bf16.mxu1 %v4730_v57  ;;  %v5527_v55 = vld [vmem:[%s5283_s11 + $0x58] sm:$0x11]  ;;  %v1698_v57 = vshrl.u32 %v5519_v51, 16 }
  0x4a   : > { %2330 = vmatprep.subr.bf16.mxu0 %v4733_v58  ;;  %645 = vmatprep.mubr.bf16.mxu1 %v3781_v36  ;;  %v1701_v58 = vshll.u32 %v5519_v51, 16 }
  0x4c   : > { %879 = vmatpush1.bf16.msra.mxu1 %v4728_v59  ;;  %v4763_v59 = vld [vmem:[%s6529_s1 + $0x564] ss:$8 sps:$4 sm:$0xff]  }
  0x4d   : > { %2331 = vmatpush1.bf16.msra.mxu0 %v4731_v61  ;;  %880 = vmatprep.subr.bf16.mxu1 %v4736_v62  ;;  %v1696_v61 = vsel %vm5342_vm2, %v1691_v47, %v1695_v40  ;;  %v1707_v62 = vshll.u32 %v5522_v52, 16 }
  0x4e   : > { %2332 = vmatprep.subr.bf16.mxu0 %v4739_v63  ;;  %v1711_v63 = vshrl.u32 %v5522_v52, 16 }
  0x4f   : > { %646 = vmatmul.mubr.bf16.gmra.mrb[4].mxu1 %v3780_v38  ;;  %v1709_v13 = vrot.slane %v1707_v62, 5  ;;  %v5569_v38 = vld [vmem:[%s5283_s11 + $0x60] sm:$0xff] }
  0x50   : > { %881 = vmatpush1.bf16.msra.mxu1 %v4734_v0  ;;  %v1717_v0 = vshll.u32 %v5527_v55, 16  ;;  %v1713_v17 = vrot.slane %v1711_v63, 4  ;;  %v4770_v63 = vld [vmem:[%s6529_s1 + $0x80] ss:$8 sps:$4 sm:$0xff]  }
  0x51   : > { %2333 = vmatpush1.bf16.msra.mxu0 %v4737_v3  ;;  %882 = vmatprep.subr.bf16.mxu1 %v4742_v5  ;;  %v4061_v3 = vcombine.high %v1686_v53, %v1696_v61  ;;  %v4060_v5 = vcombine.low %v1686_v53, %v1696_v61 }
  0x52   : > { %2334 = vmatprep.subr.bf16.mxu0 %v4745_v6  ;;  %v353_v6 = vsel %vm5342_vm2, %v1691_v47, %v352_v54  ;;  %v1714_v27 = vor.u32 %v1713_v17, %v1709_v13 }
  0x53   : > { %v3782_v20 = vcombine.low %v1686_v53, %v353_v6  ;;  %2012 = vmatprep.mubr.bf16.mxu0 %v4061_v3 }
  0x54   : > { %883 = vmatpush1.bf16.msra.mxu1 %v4740_v7  ;;  %v1700_v7 = vrot.slane %v1698_v57, 4  ;;  %2013 = vmatmul.mubr.bf16.gmra.mrb[4].mxu0 %v4060_v5  ;;  %v1715_v37 = vrot.slane %v1714_v27, 4  ;;  %v1741_v57 = vshll.u32 %v5575_v39, 16  ;;  %v4776_v27 = vld [vmem:[%s6529_s1 + $0x90] ss:$8 sps:$4 sm:$0xff]  }
  0x55   : > { %2335 = vmatpush1.bf16.msra.mxu0 %v4743_v8  ;;  %884 = vmatprep.subr.bf16.mxu1 %v4748_v11  ;;  %v4758_v8 = vld [vmem:[%s6529_s1 + $0x60] ss:$8 sps:$4 sm:$0xff]   ;;  %v3783_v11 = vcombine.high %v1686_v53, %v353_v6 }
  0x56   : > { %2336 = vmatprep.subr.bf16.mxu0 %v4751_v12  ;;  %v1703_v12 = vrot.slane %v1701_v58, 5 }
  0x57   : > { %655 = vmatprep.mubr.bf16.mxu1 %v3783_v11 }
  0x58   : > { %885 = vmatpush1.bf16.msra.mxu1 %v4746_v25  ;;  %v4769_v25 = vld [vmem:[%s6529_s1 + $0x574] ss:$8 sps:$4 sm:$0xff]   ;;  %v1704_v26 = vor.u32 %v1703_v12, %v1700_v7  ;;  %v4773_v7 = vld [vmem:[%s6529_s1 + $0x580] ss:$8 sps:$4 sm:$0xff]  }
  0x59   : > { %2337 = vmatpush1.bf16.msra.mxu0 %v4749_v29  ;;  %886 = vmatprep.subr.bf16.mxu1 %v4754_v33  ;;  %v1719_v29 = vrot.slane %v1717_v0, 5  ;;  %v374_v33 = vshll.u32 %v5559_v30, 16  ;;  %v4781_v12 = vld [vmem:[%s6529_s1 + $0x594] ss:$8 sps:$4 sm:$0xff]  }
  0x5a   : > { %2338 = vmatprep.subr.bf16.mxu0 %v4757_v34  ;;  %v1705_v36 = vrot.slane %v1704_v26, 4  ;;  %656 = vmatmul.mubr.bf16.gmra.mrb[8].mxu1 %v3782_v20  ;;  %v5572_v34 = vld [vmem:[%s5283_s11 + $0x68] sm:$0xff]  ;;  %v3819_v20 = vcombine.high %v5298_v48, %v5301_v49  ;;  %v2079_v26 = vrot.slane %v5551_v22, 4 }
  0x5b   : > { %v376_v40 = vrot.slane %v374_v33, 5  ;;  %v1731_v43 = vshll.u32 %v5572_v34, 16  ;;  %v1720_v53 = vsel %vm5342_vm2, %v1715_v37, %v1719_v29  ;;  %v1735_v54 = vshrl.u32 %v5572_v34, 16  ;;  %v4784_v33 = vld [vmem:[%s6529_s1 + $0xa4] ss:$8 sps:$4 sm:$0xff]  }
  0x5c   : > { %887 = vmatpush1.bf16.msra.mxu1 %v4752_v42  ;;  %v1722_v42 = vshrl.u32 %v5569_v38, 16  ;;  %v1710_v47 = vsel %vm5342_vm2, %v1705_v36, %v1709_v13  ;;  %v4787_v36 = vld [vmem:[%s6529_s1 + $0x5a4] ss:$8 sps:$4 sm:$0xff]  }
  0x5d   : > { %2339 = vmatpush1.bf16.msra.mxu0 %v4755_v35  ;;  %888 = vmatprep.subr.bf16.mxu1 %v4760_v46  ;;  %v1725_v35 = vshll.u32 %v5569_v38, 16  ;;  %v4775_v46 = vld [vmem:[%s6529_s1 + $0x584] ss:$8 sps:$4 sm:$0xff]   ;;  %v4063_v58 = vcombine.high %v1710_v47, %v1720_v53  ;;  %v377_v61 = vsel %vm5342_vm2, %v1715_v37, %v376_v40  ;;  %v1733_v5 = vrot.slane %v1731_v43, 5 }
  0x5e   : > { %2340 = vmatprep.subr.bf16.mxu0 %v4763_v59  ;;  %v4062_v59 = vcombine.low %v1710_v47, %v1720_v53  ;;  %v1724_v62 = vrot.slane %v1722_v42, 4  ;;  %v3785_v0 = vcombine.high %v1710_v47, %v377_v61  ;;  %v1737_v6 = vrot.slane %v1735_v54, 4  ;;  %v4785_v53 = vld [vmem:[%s6529_s1 + $0x5a0] ss:$8 sps:$4 sm:$0xff]   ;;  %v4790_v54 = vld [vmem:[%s6529_s1 + $0xb4] ss:$8 sps:$4 sm:$0xff]  }
  0x5f   : > { %v1727_v3 = vrot.slane %v1725_v35, 5  ;;  %v3784_v11 = vcombine.low %v1710_v47, %v377_v61  ;;  %2022 = vmatprep.mubr.bf16.mxu0 %v4063_v58  ;;  %v4782_v35 = vld [vmem:[%s6529_s1 + $0xa0] ss:$8 sps:$4 sm:$0xff]   ;;  %v976_v47 = vrot.slane %v5461_v10, 5  ;;  %v5650_v58 = vrot.slane %v5474_v15, 5 }
  0x60   : > { %889 = vmatpush1.bf16.msra.mxu1 %v4758_v8  ;;  %v4778_v8 = vld [vmem:[%s6529_s1 + $0x94] ss:$8 sps:$4 sm:$0xff]   ;;  %v1738_v17 = vor.u32 %v1737_v6, %v1733_v5  ;;  %665 = vmatprep.mubr.bf16.mxu1 %v3785_v0  ;;  %v4799_v0 = vld [vmem:[%s6529_s1 + $0x5c4] ss:$8 sps:$4 sm:$0xff]   ;;  %v4794_v6 = vld [vmem:[%s6529_s1 + $0xc0] ss:$8 sps:$4 sm:$0xff]  }
  0x61   : > { %2341 = vmatpush1.bf16.msra.mxu0 %v4761_v18  ;;  %890 = vmatprep.subr.bf16.mxu1 %v4766_v19  ;;  %v1728_v13 = vor.u32 %v1727_v3, %v1724_v62  ;;  %v1743_v18 = vrot.slane %v1741_v57, 5  ;;  %v2080_v19 = vrot.slane %v5332_v4, 5  ;;  %v4779_v4 = vld [vmem:[%s6529_s1 + $0x590] ss:$8 sps:$4 sm:$0xff]   ;;  %v4793_v57 = vld [vmem:[%s6529_s1 + $0x5b4] ss:$8 sps:$4 sm:$0xff]   ;;  %v5654_v10 = vsel %vm5410_vm5, %v2079_v26, %v976_v47 }
  0x62   : > { %2342 = vmatprep.subr.bf16.mxu0 %v4769_v25  ;;  %v4098_v25 = vld [vmem:[%s5283_s11 + $0x18] sm:$0xee]  ;;  %2023 = vmatmul.mubr.bf16.gmra.mrb[8].mxu0 %v4062_v59  ;;  %v2086_v3 = vrot.slane %v5650_v58, 4 }
  0x63   : > { %v1729_v29 = vrot.slane %v1728_v13, 4  ;;  %666 = vmatmul.mubr.bf16.gmra.mrb[12].mxu1 %v3784_v11  ;;  %v4788_v59 = vld [vmem:[%s6529_s1 + $0xb0] ss:$8 sps:$4 sm:$0xff]   ;;  %v4223_v11 = vcombine.high %v5569_v38, %v5572_v34  ;;  %v5691_v13 = vrot.slane %v5522_v52, 5 }
  0x64   : > { %891 = vmatpush1.bf16.msra.mxu1 %v4764_v31  ;;  %v1739_v31 = vrot.slane %v1738_v17, 4  ;;  %908 = vmatprep.mubr.bf16.mxu1 %v3819_v20  ;;  %v4791_v62 = vld [vmem:[%s6529_s1 + $0x5b0] ss:$8 sps:$4 sm:$0xff]   ;;  %v4222_v17 = vcombine.low %v5569_v38, %v5572_v34  ;;  %v4808_v20 = vld [vmem:[%s6529_s1 + $0xe4] ss:$8 sps:$4 sm:$0xff]  }
  0x65   : > { %2343 = vmatpush1.bf16.msra.mxu0 %v4767_v32  ;;  %892 = vmatprep.subr.bf16.mxu1 %v4772_v44  ;;  %v4102_v32 = vrot.slane %v4098_v25, 9  ;;  %v1734_v37 = vsel %vm5342_vm2, %v1729_v29, %v1733_v5  ;;  %v983_v5 = vrot.slane %v5506_v41, 5  ;;  %v4802_v41 = vld [vmem:[%s6529_s1 + $0xd4] ss:$8 sps:$4 sm:$0xff]   ;;  %v4811_v25 = vld [vmem:[%s6529_s1 + $0x5e4] ss:$8 sps:$4 sm:$0xff]  }
  0x66   : > { %2344 = vmatprep.subr.bf16.mxu0 %v4775_v46  ;;  %v1744_v40 = vsel %vm5342_vm2, %v1739_v31, %v1743_v18  ;;  %v5637_v46 = vsel %vm5410_vm5, %v2079_v26, %v2080_v19  ;;  %v4800_v18 = vld [vmem:[%s6529_s1 + $0xd0] ss:$8 sps:$4 sm:$0xff]   ;;  %v2093_v26 = vrot.slane %v5691_v13, 4  ;;  %v4806_v29 = vld [vmem:[%s6529_s1 + $0xe0] ss:$8 sps:$4 sm:$0xff]  }
  0x67   : > { %v4065_v42 = vcombine.high %v1734_v37, %v1744_v40  ;;  %v4064_v43 = vcombine.low %v1734_v37, %v1744_v40  ;;  %v5633_v44 = vsel %vm5410_vm5, %v4102_v32, %v5551_v22  ;;  %v4803_v19 = vld [vmem:[%s6529_s1 + $0x5d0] ss:$8 sps:$4 sm:$0xff]   ;;  %v4809_v32 = vld [vmem:[%s6529_s1 + $0x5e0] ss:$8 sps:$4 sm:$0xff]   ;;  %v4821_v40 = vld [vmem:[%s6529_s1 + $0x204] ss:$8 sps:$4 sm:$0xff]  }
  0x68   : > { %893 = vmatpush1.bf16.msra.mxu1 %v4770_v63  ;;  %v4139_v61 = vcombine.high %v5633_v44, %v5637_v46  ;;  %v4796_v63 = vld [vmem:[%s6529_s1 + $0xc4] ss:$8 sps:$4 sm:$0xff]   ;;  %v4815_v37 = vld [vmem:[%s6529_s1 + $0x5f0] ss:$8 sps:$4 sm:$0xff]  }
  0x69   : > { %2345 = vmatpush1.bf16.msra.mxu0 %v4773_v7  ;;  %894 = vmatprep.subr.bf16.mxu1 %v4778_v8  ;;  %v5677_v7 = vsel %vm5410_vm5, %v2086_v3, %v983_v5  ;;  %v4797_v8 = vld [vmem:[%s6529_s1 + $0x5c0] ss:$8 sps:$4 sm:$0xff]   ;;  %v4960_v38 = vld [vmem:[%s6529_s1 + $0x364] ss:$8 sps:$4 sm:$0xff]  }
  0x6a   : > { %2346 = vmatprep.subr.bf16.mxu0 %v4781_v12  ;;  %2032 = vmatprep.mubr.bf16.mxu0 %v4065_v42  ;;  %v4805_v12 = vld [vmem:[%s6529_s1 + $0x5d4] ss:$8 sps:$4 sm:$0xff]   ;;  %v4824_v42 = vld [vmem:[%s6529_s1 + $0x604] ss:$8 sps:$4 sm:$0xff]   ;;  %v4832_v5 = vld [vmem:[%s6529_s1 + $0x220] ss:$8 sps:$4 sm:$0xff]  }
  0x6b   : > { %2033 = vmatmul.mubr.bf16.gmra.mrb[12].mxu0 %v4064_v43 }
  0x6c   : > { %895 = vmatpush1.bf16.msra.mxu1 %v4776_v27  ;;  %2360 = vmatprep.mubr.bf16.mxu0 %v4139_v61  ;;  %v990_v27 = vrot.slane %v5559_v30, 5  ;;  %v4814_v30 = vld [vmem:[%s6529_s1 + $0xf4] ss:$8 sps:$4 sm:$0xff]   ;;  %v4826_v61 = vld [vmem:[%s6529_s1 + $0x210] ss:$8 sps:$4 sm:$0xff]  }
  0x6d   : > { %2347 = vmatpush1.bf16.msra.mxu0 %v4779_v4  ;;  %896 = vmatprep.subr.bf16.mxu1 %v4784_v33  ;;  %v4817_v4 = vld [vmem:[%s6529_s1 + $0x5f4] ss:$8 sps:$4 sm:$0xff]   ;;  %v4812_v33 = vld [vmem:[%s6529_s1 + $0xf0] ss:$8 sps:$4 sm:$0xff]  }
  0x6e   : > { %2348 = vmatprep.subr.bf16.mxu0 %v4787_v36  ;;  %v5714_v31 = vsel %vm5410_vm5, %v2093_v26, %v990_v27  ;;  %v2087_v36 = vrot.slane %v5477_v16, 5  ;;  %v4138_v16 = vcombine.low %v5633_v44, %v5637_v46  ;;  %v4828_v44 = vld [vmem:[%s6529_s1 + $0x214] ss:$8 sps:$4 sm:$0xff]   ;;  %v2101_v27 = vrot.slane %v5575_v39, 5  ;;  %v949_v39 = vld [vmem:[%s5283_s11] sm:$0xee] }
  0x6f   : > { %v4831_v46 = vld [vmem:[%s6529_s1 + $0x614] ss:$8 sps:$4 sm:$0xff]   ;;  %v3858_v1 = vrot.slane %v949_v39, 9  ;;  %v4914_v39 = vld [vmem:[%s6529_s1 + $0x6e4] ss:$8 sps:$4 sm:$0xff]  }
  0x70   : > { %897 = vmatpush1.bf16.msra.mxu1 %v4782_v35  ;;  %v4099_v35 = vld [vmem:[%s5283_s11 + $0x30] sm:$0xee]  ;;  %v2088_v47 = vsel %vm5410_vm5, %v2086_v3, %v2087_v36  ;;  %v4834_v3 = vld [vmem:[%s6529_s1 + $0x224] ss:$8 sps:$4 sm:$0xff]   ;;  %v4847_v36 = vld [vmem:[%s6529_s1 + $0x640] ss:$8 sps:$4 sm:$0xff]  }
  0x71   : > { %2349 = vmatpush1.bf16.msra.mxu0 %v4785_v53  ;;  %898 = vmatprep.subr.bf16.mxu1 %v4790_v54  ;;  %v4103_v43 = vrot.slane %v4099_v35, 9  ;;  %v4819_v53 = vld [vmem:[%s6529_s1 + $0x200] ss:$8 sps:$4 sm:$0xff]  }
  0x72   : > { %2350 = vmatprep.subr.bf16.mxu0 %v4793_v57  ;;  %v4822_v54 = vld [vmem:[%s6529_s1 + $0x600] ss:$8 sps:$4 sm:$0xff]  }
  0x73   : > { %v2085_v57 = vsel %vm5410_vm5, %v4103_v43, %v5650_v58 }
  0x74   : > { %899 = vmatpush1.bf16.msra.mxu1 %v4788_v59  ;;  %v4141_v59 = vcombine.high %v2085_v57, %v2088_v47 }
  0x75   : > { %2351 = vmatpush1.bf16.msra.mxu0 %v4791_v62  ;;  %900 = vmatprep.subr.bf16.mxu1 %v4796_v63  ;;  %v4100_v62 = vld [vmem:[%s5283_s11 + $0x48] sm:$0xee]  ;;  %v2094_v63 = vrot.slane %v5527_v55, 5  ;;  %v2098_v55 = vrot.slane %v5572_v34, 5 }
  0x76   : > { %2352 = vmatprep.subr.bf16.mxu0 %v4799_v0  ;;  %v4829_v0 = vld [vmem:[%s6529_s1 + $0x610] ss:$8 sps:$4 sm:$0xff]   ;;  %v4104_v48 = vrot.slane %v4100_v62, 9  ;;  %v4963_v34 = vld [vmem:[%s6529_s1 + $0x764] ss:$8 sps:$4 sm:$0xff]  }
  0x77   : > { %v4862_v62 = vld [vmem:[%s6529_s1 + $0x270] ss:$8 sps:$4 sm:$0xff]  }
  0x78   : > { %901 = vmatpush1.bf16.msra.mxu1 %v4794_v6  ;;  %v4835_v6 = vld [vmem:[%s6529_s1 + $0x620] ss:$8 sps:$4 sm:$0xff]  }
  0x79   : > { %2353 = vmatpush1.bf16.msra.mxu0 %v4797_v8  ;;  %902 = vmatprep.subr.bf16.mxu1 %v4802_v41  ;;  %v4140_v8 = vcombine.low %v2085_v57, %v2088_v47  ;;  %v2092_v41 = vsel %vm5410_vm5, %v4104_v48, %v5691_v13  ;;  %v4853_v47 = vld [vmem:[%s6529_s1 + $0x650] ss:$8 sps:$4 sm:$0xff]   ;;  %v4856_v57 = vld [vmem:[%s6529_s1 + $0x260] ss:$8 sps:$4 sm:$0xff]   ;;  %v4879_v48 = vld [vmem:[%s6529_s1 + $0x694] ss:$8 sps:$4 sm:$0xff]  }
  0x7a   : > { %2354 = vmatprep.subr.bf16.mxu0 %v4805_v12  ;;  %v2095_v12 = vsel %vm5410_vm5, %v2093_v26, %v2094_v63  ;;  %v2100_v26 = vrot.slane %v2098_v55, 4  ;;  %v4865_v63 = vld [vmem:[%s6529_s1 + $0x670] ss:$8 sps:$4 sm:$0xff]  }
  0x7c   : > { %903 = vmatpush1.bf16.msra.mxu1 %v4800_v18  ;;  %v4843_v18 = vld [vmem:[%s6529_s1 + $0x634] ss:$8 sps:$4 sm:$0xff]  }
  0x7d   : > { %2355 = vmatpush1.bf16.msra.mxu0 %v4803_v19  ;;  %904 = vmatprep.subr.bf16.mxu1 %v4808_v20  ;;  %v4101_v19 = vld [vmem:[%s5283_s11 + $0x60] sm:$0xee]  ;;  %v5799_v20 = vcombine.high %v5471_v14, %v5474_v15 }
  0x7e   : > { %2356 = vmatprep.subr.bf16.mxu0 %v4811_v25  ;;  %v4143_v25 = vcombine.high %v2092_v41, %v2095_v12  ;;  %v4846_v14 = vld [vmem:[%s6529_s1 + $0x244] ss:$8 sps:$4 sm:$0xff]  }
  0x7f   : > { %v4849_v15 = vld [vmem:[%s6529_s1 + $0x644] ss:$8 sps:$4 sm:$0xff]  }
  0x80   : > { %905 = vmatpush1.bf16.msra.mxu1 %v4806_v29  ;;  %v4838_v29 = vld [vmem:[%s6529_s1 + $0x230] ss:$8 sps:$4 sm:$0xff]  }
  0x81   : > { %2357 = vmatpush1.bf16.msra.mxu0 %v4809_v32  ;;  %906 = vmatprep.subr.bf16.mxu1 %v4814_v30  ;;  %v4841_v32 = vld [vmem:[%s6529_s1 + $0x630] ss:$8 sps:$4 sm:$0xff]   ;;  %v4105_v30 = vrot.slane %v4101_v19, 9 }
  0x82   : > { %2358 = vmatprep.subr.bf16.mxu0 %v4817_v4  ;;  %v4891_v19 = vld [vmem:[%s6529_s1 + $0x6b0] ss:$8 sps:$4 sm:$0xff]  }
  0x83   : > { %v2099_v4 = vsel %vm5410_vm5, %v4105_v30, %v2098_v55  ;;  %v4877_v55 = vld [vmem:[%s6529_s1 + $0x690] ss:$8 sps:$4 sm:$0xff]  }
  0x84   : > { %907 = vmatpush1.bf16.msra.mxu1 %v4812_v33  ;;  %v2102_v33 = vsel %vm5410_vm5, %v2100_v26, %v2101_v27  ;;  %v4895_v26 = vld [vmem:[%s6529_s1 + $0x2c0] ss:$8 sps:$4 sm:$0xff]   ;;  %v4902_v30 = vld [vmem:[%s6529_s1 + $0x2d0] ss:$8 sps:$4 sm:$0xff]  }
  0x85   : > { %2359 = vmatpush1.bf16.msra.mxu0 %v4815_v37  ;;  %1217 = vmatprep.subr.bf16.mxu1 %v4821_v40  ;;  %v5833_v37 = vsel %vm5410_vm5, %v3858_v1, %v966_v45  ;;  %v4852_v40 = vld [vmem:[%s6529_s1 + $0x254] ss:$8 sps:$4 sm:$0xff]   ;;  %v3825_v45 = vcombine.high %v5519_v51, %v5522_v52  ;;  %v4145_v43 = vcombine.high %v2099_v4, %v2102_v33  ;;  %v4868_v51 = vld [vmem:[%s6529_s1 + $0x280] ss:$8 sps:$4 sm:$0xff]  }
  0x86   : > { %2659 = vmatprep.subr.bf16.mxu0 %v4824_v42  ;;  %v4855_v42 = vld [vmem:[%s6529_s1 + $0x654] ss:$8 sps:$4 sm:$0xff]   ;;  %v3894_v35 = vcombine.low %v5833_v37, %v5422_v56  ;;  %v3895_v49 = vcombine.high %v5833_v37, %v5422_v56  ;;  %v4871_v52 = vld [vmem:[%s6529_s1 + $0x680] ss:$8 sps:$4 sm:$0xff]  }
  0x87   : > { %909 = vmatmul.mubr.bf16.vlgmr.msra.gmra.mrb[0].mxu1 %v3818_v60  ;;  %v4837_v60 = vld [vmem:[%s6529_s1 + $0x624] ss:$8 sps:$4 sm:$0xff]   ;;  %v4898_v27 = vld [vmem:[%s6529_s1 + $0x6c0] ss:$8 sps:$4 sm:$0xff]   ;;  %v6029_v56 = vld [vmem:[%s5283_s11 + $0x38] sm:$0xff] }
  0x88   : > { %2361 = vmatmul.mubr.bf16.vlgmr.msra.gmra.mrb[0].mxu0 %v4138_v16  ;;  %1218 = vmatpush1.bf16.msra.mxu1 %v4819_v53  ;;  %v4850_v16 = vld [vmem:[%s6529_s1 + $0x250] ss:$8 sps:$4 sm:$0xff]   ;;  %v4858_v53 = vld [vmem:[%s6529_s1 + $0x264] ss:$8 sps:$4 sm:$0xff]   ;;  %v4909_v1 = vld [vmem:[%s6529_s1 + $0x2e0] ss:$8 sps:$4 sm:$0xff]  }
  0x89   : > { %2660 = vmatpush1.bf16.msra.mxu0 %v4822_v54  ;;  %1219 = vmatprep.subr.bf16.mxu1 %v4828_v44  ;;  %v4861_v54 = vld [vmem:[%s6529_s1 + $0x664] ss:$8 sps:$4 sm:$0xff]   ;;  %v4144_v44 = vcombine.low %v2099_v4, %v2102_v33  ;;  %v950_v4 = vld [vmem:[%s5283_s11 + $0x18] sm:$0xee]  ;;  %v4934_v37 = vld [vmem:[%s6529_s1 + $0x320] ss:$8 sps:$4 sm:$0xff]  }
  0x8a   : > { %2661 = vmatprep.subr.bf16.mxu0 %v4831_v46  ;;  %918 = vmatprep.mubr.bf16.mxu1 %v3821_v21  ;;  %v4840_v21 = vld [vmem:[%s6529_s1 + $0x234] ss:$8 sps:$4 sm:$0xff]   ;;  %v4859_v46 = vld [vmem:[%s6529_s1 + $0x660] ss:$8 sps:$4 sm:$0xff]  }
  0x8b   : > { %2370 = vmatprep.mubr.bf16.mxu0 %v4141_v59  ;;  %v4864_v59 = vld [vmem:[%s6529_s1 + $0x274] ss:$8 sps:$4 sm:$0xff]  }
  0x8c   : > { %1220 = vmatpush1.bf16.msra.mxu1 %v4826_v61  ;;  %v4867_v61 = vld [vmem:[%s6529_s1 + $0x674] ss:$8 sps:$4 sm:$0xff]  }
  0x8d   : > { %2662 = vmatpush1.bf16.msra.mxu0 %v4829_v0  ;;  %1221 = vmatprep.subr.bf16.mxu1 %v4834_v3  ;;  %v4870_v0 = vld [vmem:[%s6529_s1 + $0x284] ss:$8 sps:$4 sm:$0xff]   ;;  %v4921_v33 = vld [vmem:[%s6529_s1 + $0x6f4] ss:$8 sps:$4 sm:$0xff]  }
  0x8e   : > { %2663 = vmatprep.subr.bf16.mxu0 %v4837_v60  ;;  %v4873_v3 = vld [vmem:[%s6529_s1 + $0x684] ss:$8 sps:$4 sm:$0xff]   ;;  %v4874_v60 = vld [vmem:[%s6529_s1 + $0x290] ss:$8 sps:$4 sm:$0xff]  }
  0x8f   : > { %919 = vmatmul.mubr.bf16.gmra.mrb[4].mxu1 %v3820_v24  ;;  %v4142_v24 = vcombine.low %v2092_v41, %v2095_v12  ;;  %v4884_v41 = vld [vmem:[%s6529_s1 + $0x6a0] ss:$8 sps:$4 sm:$0xff]   ;;  %v4890_v12 = vld [vmem:[%s6529_s1 + $0x2b4] ss:$8 sps:$4 sm:$0xff]  }
  0x90   : > { %2371 = vmatmul.mubr.bf16.gmra.mrb[4].mxu0 %v4140_v8  ;;  %1222 = vmatpush1.bf16.msra.mxu1 %v4832_v5  ;;  %v4883_v5 = vld [vmem:[%s6529_s1 + $0x2a4] ss:$8 sps:$4 sm:$0xff]   ;;  %v4881_v8 = vld [vmem:[%s6529_s1 + $0x2a0] ss:$8 sps:$4 sm:$0xff]  }
  0x91   : > { %2664 = vmatpush1.bf16.msra.mxu0 %v4835_v6  ;;  %1223 = vmatprep.subr.bf16.mxu1 %v4840_v21  ;;  %v4886_v6 = vld [vmem:[%s6529_s1 + $0x6a4] ss:$8 sps:$4 sm:$0xff]   ;;  %v4893_v21 = vld [vmem:[%s6529_s1 + $0x6b4] ss:$8 sps:$4 sm:$0xff]  }
  0x92   : > { %2665 = vmatprep.subr.bf16.mxu0 %v4843_v18  ;;  %928 = vmatprep.mubr.bf16.mxu1 %v5799_v20  ;;  %v4888_v18 = vld [vmem:[%s6529_s1 + $0x2b0] ss:$8 sps:$4 sm:$0xff]  }
  0x93   : > { %2380 = vmatprep.mubr.bf16.mxu0 %v4143_v25  ;;  %v4900_v25 = vld [vmem:[%s6529_s1 + $0x6c4] ss:$8 sps:$4 sm:$0xff]  }
  0x94   : > { %1224 = vmatpush1.bf16.msra.mxu1 %v4838_v29  ;;  %v4904_v29 = vld [vmem:[%s6529_s1 + $0x2d4] ss:$8 sps:$4 sm:$0xff]  }
  0x95   : > { %2666 = vmatpush1.bf16.msra.mxu0 %v4841_v32  ;;  %1225 = vmatprep.subr.bf16.mxu1 %v4846_v14  ;;  %v4907_v32 = vld [vmem:[%s6529_s1 + $0x6d4] ss:$8 sps:$4 sm:$0xff]   ;;  %v4905_v14 = vld [vmem:[%s6529_s1 + $0x6d0] ss:$8 sps:$4 sm:$0xff]  }
  0x96   : > { %2667 = vmatprep.subr.bf16.mxu0 %v4849_v15  ;;  %v4911_v15 = vld [vmem:[%s6529_s1 + $0x2e4] ss:$8 sps:$4 sm:$0xff]  }
  0x97   : > { %929 = vmatmul.mubr.bf16.gmra.mrb[8].mxu1 %v5489_v28 }
  0x98   : > { %2381 = vmatmul.mubr.bf16.gmra.mrb[8].mxu0 %v4142_v24  ;;  %1226 = vmatpush1.bf16.msra.mxu1 %v4844_v2  ;;  %v4912_v2 = vld [vmem:[%s6529_s1 + $0x6e0] ss:$8 sps:$4 sm:$0xff]   ;;  %v4918_v24 = vld [vmem:[%s6529_s1 + $0x2f4] ss:$8 sps:$4 sm:$0xff]  }
  0x99   : > { %2668 = vmatpush1.bf16.msra.mxu0 %v4847_v36  ;;  %1227 = vmatprep.subr.bf16.mxu1 %v4852_v40  ;;  %v3859_v36 = vrot.slane %v950_v4, 9  ;;  %v4916_v40 = vld [vmem:[%s6529_s1 + $0x2f0] ss:$8 sps:$4 sm:$0xff]   ;;  %v6095_v4 = vld [vmem:[%s5283_s11 + $0x80] sm:$0xff] }
  0x9a   : > { %2669 = vmatprep.subr.bf16.mxu0 %v4855_v42  ;;  %938 = vmatprep.mubr.bf16.mxu1 %v3825_v45  ;;  %v4919_v42 = vld [vmem:[%s6529_s1 + $0x6f0] ss:$8 sps:$4 sm:$0xff]   ;;  %v4927_v45 = vld [vmem:[%s6529_s1 + $0x704] ss:$8 sps:$4 sm:$0xff]  }
  0x9b   : > { %2390 = vmatprep.mubr.bf16.mxu0 %v4145_v43  ;;  %v5986_v43 = vld [vmem:[%s5283_s11 + $0x48] sm:$0xff] }
  0x9c   : > { %1228 = vmatpush1.bf16.msra.mxu1 %v4850_v16  ;;  %v5989_v16 = vld [vmem:[%s5283_s11 + $0x50] sm:$0xff] }
  0x9d   : > { %2670 = vmatpush1.bf16.msra.mxu0 %v4853_v47  ;;  %1229 = vmatprep.subr.bf16.mxu1 %v4858_v53  ;;  %v974_v47 = vsel %vm5410_vm5, %v3859_v36, %v5551_v22  ;;  %v951_v53 = vld [vmem:[%s5283_s11 + $0x30] sm:$0xee] }
  0x9e   : > { %2671 = vmatprep.subr.bf16.mxu0 %v4861_v54  ;;  %v4922_v54 = vld [vmem:[%s6529_s1 + $0x300] ss:$8 sps:$4 sm:$0xff]   ;;  %v4933_v22 = vld [vmem:[%s6529_s1 + $0x714] ss:$8 sps:$4 sm:$0xff]  }
  0x9f   : > { %939 = vmatmul.mubr.bf16.gmra.mrb[12].mxu1 %v3824_v23  ;;  %v4876_v23 = vld [vmem:[%s6529_s1 + $0x294] ss:$8 sps:$4 sm:$0xff]  }
  0xa0   : > { %2391 = vmatmul.mubr.bf16.gmra.mrb[12].mxu0 %v4144_v44  ;;  %1230 = vmatpush1.bf16.msra.mxu1 %v4856_v57  ;;  %v4925_v57 = vld [vmem:[%s6529_s1 + $0x700] ss:$8 sps:$4 sm:$0xff]   ;;  %v4930_v44 = vld [vmem:[%s6529_s1 + $0x314] ss:$8 sps:$4 sm:$0xff]  }
  0xa1   : > { %2672 = vmatpush1.bf16.msra.mxu0 %v4859_v46  ;;  %1231 = vmatprep.subr.bf16.mxu1 %v4864_v59  ;;  %v3897_v46 = vcombine.high %v974_v47, %v5654_v10  ;;  %v6010_v59 = vcombine.high %v5986_v43, %v5989_v16 }
  0xa2   : > { %2673 = vmatprep.subr.bf16.mxu0 %v4867_v61  ;;  %1249 = vmatprep.mubr.bf16.mxu1 %v3895_v49  ;;  %v4924_v49 = vld [vmem:[%s6529_s1 + $0x304] ss:$8 sps:$4 sm:$0xff]   ;;  %v3860_v61 = vrot.slane %v951_v53, 9 }
  0xa3   : > { %2691 = vmatprep.mubr.bf16.mxu0 %v5799_v20  ;;  %v4897_v20 = vld [vmem:[%s6529_s1 + $0x2c4] ss:$8 sps:$4 sm:$0xff]  }
  0xa4   : > { %1232 = vmatpush1.bf16.msra.mxu1 %v4862_v62  ;;  %v4928_v62 = vld [vmem:[%s6529_s1 + $0x310] ss:$8 sps:$4 sm:$0xff]  }
  0xa5   : > { %2674 = vmatpush1.bf16.msra.mxu0 %v4865_v63  ;;  %1233 = vmatprep.subr.bf16.mxu1 %v4870_v0  ;;  %v4931_v63 = vld [vmem:[%s6529_s1 + $0x710] ss:$8 sps:$4 sm:$0xff]   ;;  %v4936_v0 = vld [vmem:[%s6529_s1 + $0x324] ss:$8 sps:$4 sm:$0xff]  }
  0xa6   : > { %2675 = vmatprep.subr.bf16.mxu0 %v4873_v3  ;;  %v6026_v3 = vld [vmem:[%s5283_s11 + $0x30] sm:$0xff] }
  0xa8   : > { %1234 = vmatpush1.bf16.msra.mxu1 %v4868_v51  ;;  %v6041_v51 = vcombine.low %v5986_v43, %v5989_v16 }
  0xa9   : > { %2676 = vmatpush1.bf16.msra.mxu0 %v4871_v52  ;;  %1235 = vmatprep.subr.bf16.mxu1 %v4876_v23  ;;  %v981_v52 = vsel %vm5410_vm5, %v3860_v61, %v5650_v58  ;;  %v952_v23 = vld [vmem:[%s5283_s11 + $0x48] sm:$0xee]  ;;  %v4942_v58 = vld [vmem:[%s6529_s1 + $0x334] ss:$8 sps:$4 sm:$0xff]   ;;  %v4955_v61 = vld [vmem:[%s6529_s1 + $0x750] ss:$8 sps:$4 sm:$0xff]  }
  0xaa   : > { %2677 = vmatprep.subr.bf16.mxu0 %v4879_v48  ;;  %v2761_v48 = vshrl.u32 %v6026_v3, 16 }
  0xac   : > { %1236 = vmatpush1.bf16.msra.mxu1 %v4874_v60  ;;  %v2764_v60 = vshll.u32 %v6026_v3, 16 }
  0xad   : > { %2678 = vmatpush1.bf16.msra.mxu0 %v4877_v55  ;;  %1237 = vmatprep.subr.bf16.mxu1 %v4883_v5  ;;  %v2770_v55 = vshll.u32 %v6029_v56, 16  ;;  %v2774_v5 = vshrl.u32 %v6029_v56, 16 }
  0xae   : > { %2679 = vmatprep.subr.bf16.mxu0 %v4886_v6  ;;  %v4945_v6 = vld [vmem:[%s6529_s1 + $0x734] ss:$8 sps:$4 sm:$0xff]  }
  0xb0   : > { %1238 = vmatpush1.bf16.msra.mxu1 %v4881_v8  ;;  %v4940_v8 = vld [vmem:[%s6529_s1 + $0x330] ss:$8 sps:$4 sm:$0xff]  }
  0xb1   : > { %2680 = vmatpush1.bf16.msra.mxu0 %v4884_v41  ;;  %1239 = vmatprep.subr.bf16.mxu1 %v4890_v12  ;;  %v4943_v41 = vld [vmem:[%s6529_s1 + $0x730] ss:$8 sps:$4 sm:$0xff]   ;;  %v3899_v12 = vcombine.high %v981_v52, %v5677_v7 }
  0xb2   : > { %2681 = vmatprep.subr.bf16.mxu0 %v4893_v21  ;;  %v3861_v21 = vrot.slane %v952_v23, 9 }
  0xb4   : > { %1240 = vmatpush1.bf16.msra.mxu1 %v4888_v18  ;;  %v3188_v18 = vrot.slane %v6029_v56, 5 }
  0xb5   : > { %2682 = vmatpush1.bf16.msra.mxu0 %v4891_v19  ;;  %1241 = vmatprep.subr.bf16.mxu1 %v4897_v20  ;;  %v2763_v19 = vrot.slane %v2761_v48, 4  ;;  %v2766_v20 = vrot.slane %v2764_v60, 5  ;;  %v4958_v48 = vld [vmem:[%s6529_s1 + $0x360] ss:$8 sps:$4 sm:$0xff]  }
  0xb6   : > { %2683 = vmatprep.subr.bf16.mxu0 %v4900_v25  ;;  %v2772_v25 = vrot.slane %v2770_v55, 5  ;;  %v4961_v60 = vld [vmem:[%s6529_s1 + $0x760] ss:$8 sps:$4 sm:$0xff]   ;;  %v4966_v55 = vld [vmem:[%s6529_s1 + $0x374] ss:$8 sps:$4 sm:$0xff]  }
  0xb8   : > { %1242 = vmatpush1.bf16.msra.mxu1 %v4895_v26  ;;  %v2776_v26 = vrot.slane %v2774_v5, 4  ;;  %v4969_v5 = vld [vmem:[%s6529_s1 + $0x774] ss:$8 sps:$4 sm:$0xff]  }
  0xb9   : > { %2684 = vmatpush1.bf16.msra.mxu0 %v4898_v27  ;;  %1243 = vmatprep.subr.bf16.mxu1 %v4904_v29  ;;  %v4260_v27 = vld [vmem:[%s5283_s11 + $0x40] sm:$0x11]  ;;  %v3190_v29 = vrot.slane %v3188_v18, 4 }
  0xba   : > { %2685 = vmatprep.subr.bf16.mxu0 %v4907_v32  ;;  %v4948_v32 = vld [vmem:[%s6529_s1 + $0x344] ss:$8 sps:$4 sm:$0xff]   ;;  %v2777_v36 = vor.u32 %v2776_v26, %v2772_v25  ;;  %v4970_v26 = vld [vmem:[%s6529_s1 + $0x380] ss:$8 sps:$4 sm:$0xff]  }
  0xbc   : > { %1244 = vmatpush1.bf16.msra.mxu1 %v4902_v30  ;;  %v4951_v30 = vld [vmem:[%s6529_s1 + $0x744] ss:$8 sps:$4 sm:$0xff]  }
  0xbd   : > { %2686 = vmatpush1.bf16.msra.mxu0 %v4905_v14  ;;  %1245 = vmatprep.subr.bf16.mxu1 %v4911_v15  ;;  %v3191_v14 = vrot.slane %v4260_v27, 5  ;;  %v4946_v15 = vld [vmem:[%s6529_s1 + $0x340] ss:$8 sps:$4 sm:$0xff]  }
  0xbe   : > { %2687 = vmatprep.subr.bf16.mxu0 %v4914_v39  ;;  %v4949_v39 = vld [vmem:[%s6529_s1 + $0x740] ss:$8 sps:$4 sm:$0xff]  }
  0xc0   : > { %1246 = vmatpush1.bf16.msra.mxu1 %v4909_v1  ;;  %v3898_v1 = vcombine.low %v981_v52, %v5677_v7  ;;  %v3195_v7 = vrot.slane %v5989_v16, 5 }
  0xc1   : > { %2688 = vmatpush1.bf16.msra.mxu0 %v4912_v2  ;;  %1247 = vmatprep.subr.bf16.mxu1 %v4918_v24  ;;  %v988_v2 = vsel %vm5410_vm5, %v3861_v21, %v5691_v13  ;;  %v6092_v24 = vld [vmem:[%s5283_s11 + $0x78] sm:$0xff] }
  0xc2   : > { %2689 = vmatprep.subr.bf16.mxu0 %v4921_v33  ;;  %v2767_v33 = vor.u32 %v2766_v20, %v2763_v19  ;;  %v4954_v13 = vld [vmem:[%s6529_s1 + $0x354] ss:$8 sps:$4 sm:$0xff]   ;;  %v3901_v53 = vcombine.high %v988_v2, %v5714_v31  ;;  %v4967_v19 = vld [vmem:[%s6529_s1 + $0x770] ss:$8 sps:$4 sm:$0xff]   ;;  %v4972_v20 = vld [vmem:[%s6529_s1 + $0x384] ss:$8 sps:$4 sm:$0xff]  }
  0xc4   : > { %1248 = vmatpush1.bf16.msra.mxu1 %v4916_v40  ;;  %v2780_v40 = vshll.u32 %v4260_v27, 16  ;;  %v4973_v27 = vld [vmem:[%s6529_s1 + $0x780] ss:$8 sps:$4 sm:$0xff]  }
  0xc5   : > { %2690 = vmatpush1.bf16.msra.mxu0 %v4919_v42  ;;  %1548 = vmatprep.subr.bf16.mxu1 %v4924_v49  ;;  %v6099_v42 = vsel %vm5410_vm5, %v3190_v29, %v3191_v14  ;;  %v4957_v49 = vld [vmem:[%s6529_s1 + $0x754] ss:$8 sps:$4 sm:$0xff]   ;;  %v4979_v14 = vld [vmem:[%s6529_s1 + $0x790] ss:$8 sps:$4 sm:$0xff]  }
  0xc6   : > { %3081 = vmatprep.subr.bf16.mxu0 %v4927_v45  ;;  %v4978_v29 = vld [vmem:[%s6529_s1 + $0x394] ss:$8 sps:$4 sm:$0xff]  }
  0xc7   : > { %1250 = vmatmul.mubr.bf16.vlgmr.msra.gmra.mrb[0].mxu1 %v3894_v35  ;;  %v3896_v35 = vcombine.low %v974_v47, %v5654_v10  ;;  %v4937_v10 = vld [vmem:[%s6529_s1 + $0x720] ss:$8 sps:$4 sm:$0xff]   ;;  %v4952_v47 = vld [vmem:[%s6529_s1 + $0x350] ss:$8 sps:$4 sm:$0xff]  }
  0xc8   : > { %2692 = vmatmul.mubr.bf16.vlgmr.msra.gmra.mrb[0].mxu0 %v5489_v28  ;;  %1549 = vmatpush1.bf16.msra.mxu1 %v4922_v54  ;;  %v4939_v28 = vld [vmem:[%s6529_s1 + $0x724] ss:$8 sps:$4 sm:$0xff]   ;;  %v4225_v54 = vcombine.high %v6092_v24, %v6095_v4 }
  0xc9   : > { %3082 = vmatpush1.bf16.msra.mxu0 %v4925_v57  ;;  %1550 = vmatprep.subr.bf16.mxu1 %v4930_v44  ;;  %v3197_v57 = vrot.slane %v3195_v7, 4  ;;  %v2768_v44 = vrot.slane %v2767_v33, 4  ;;  %v4992_v33 = vld [vmem:[%s6529_s1 + $0x3b4] ss:$8 sps:$4 sm:$0xff]  }
  0xca   : > { %3083 = vmatprep.subr.bf16.mxu0 %v4933_v22  ;;  %1259 = vmatprep.mubr.bf16.mxu1 %v3897_v46  ;;  %v2778_v22 = vrot.slane %v2777_v36, 4  ;;  %v2782_v46 = vrot.slane %v2780_v40, 5  ;;  %v4995_v36 = vld [vmem:[%s6529_s1 + $0x7b4] ss:$8 sps:$4 sm:$0xff]   ;;  %v4990_v40 = vld [vmem:[%s6529_s1 + $0x3b0] ss:$8 sps:$4 sm:$0xff]  }
  0xcb   : > { %2701 = vmatprep.mubr.bf16.mxu0 %v6010_v59 }
  0xcc   : > { %1551 = vmatpush1.bf16.msra.mxu1 %v4928_v62  ;;  %v6145_v52 = vsel %vm5342_vm2, %v2778_v22, %v2782_v46 }
  0xcd   : > { %3084 = vmatpush1.bf16.msra.mxu0 %v4931_v63  ;;  %1552 = vmatprep.subr.bf16.mxu1 %v4936_v0  ;;  %v4224_v63 = vcombine.low %v6092_v24, %v6095_v4 }
  0xce   : > { %3085 = vmatprep.subr.bf16.mxu0 %v4939_v28  ;;  %v4343_v28 = vld [vmem:[%s5283_s11 + $0x48] sm:$0xee] }
  0xcf   : > { %1260 = vmatmul.mubr.bf16.gmra.mrb[4].mxu1 %v3896_v35  ;;  %v6141_v35 = vsel %vm5342_vm2, %v2768_v44, %v2772_v25  ;;  %v4347_v23 = vrot.slane %v4343_v28, 9  ;;  %v4975_v25 = vld [vmem:[%s6529_s1 + $0x784] ss:$8 sps:$4 sm:$0xff]   ;;  %v5001_v44 = vld [vmem:[%s6529_s1 + $0x7c0] ss:$8 sps:$4 sm:$0xff]  }
  0xd0   : > { %2702 = vmatmul.mubr.bf16.gmra.mrb[4].mxu0 %v6041_v51  ;;  %1553 = vmatpush1.bf16.msra.mxu1 %v4934_v37  ;;  %v3900_v37 = vcombine.low %v988_v2, %v5714_v31  ;;  %v4987_v2 = vld [vmem:[%s6529_s1 + $0x7a0] ss:$8 sps:$4 sm:$0xff]   ;;  %v5013_v28 = vld [vmem:[%s6529_s1 + $0x3e4] ss:$8 sps:$4 sm:$0xff]  }
  0xd1   : > { %3086 = vmatpush1.bf16.msra.mxu0 %v4937_v10  ;;  %1554 = vmatprep.subr.bf16.mxu1 %v4942_v58 }
  0xd2   : > { %3087 = vmatprep.subr.bf16.mxu0 %v4945_v6  ;;  %1269 = vmatprep.mubr.bf16.mxu1 %v3899_v12  ;;  %v5026_v6 = vld [vmem:[%s5283_s11 + $0x1c] ss:$8 sps:$4 sm:$0xff]  }
  0xd3   : > { %2711 = vmatprep.mubr.bf16.mxu0 %v4223_v11  ;;  %v6102_v11 = vld [vmem:[%s5283_s11 + $0x58] sm:$0x11] }
  0xd4   : > { %1555 = vmatpush1.bf16.msra.mxu1 %v4940_v8  ;;  %v3198_v45 = vrot.slane %v6102_v11, 5  ;;  %v4303_v8 = vcombine.high %v6141_v35, %v6145_v52 }
  0xd5   : > { %3088 = vmatpush1.bf16.msra.mxu0 %v4943_v41  ;;  %1556 = vmatprep.subr.bf16.mxu1 %v4948_v32  ;;  %v6174_v41 = vsel %vm5410_vm5, %v4347_v23, %v3195_v7  ;;  %v4981_v32 = vld [vmem:[%s6529_s1 + $0x794] ss:$8 sps:$4 sm:$0xff]   ;;  %v4993_v7 = vld [vmem:[%s6529_s1 + $0x7b0] ss:$8 sps:$4 sm:$0xff]  }
  0xd6   : > { %3089 = vmatprep.subr.bf16.mxu0 %v4951_v30  ;;  %v6126_v62 = vsel %vm5410_vm5, %v3197_v57, %v3198_v45  ;;  %v4976_v30 = vld [vmem:[%s6529_s1 + $0x390] ss:$8 sps:$4 sm:$0xff]   ;;  %v2785_v45 = vshrl.u32 %v5986_v43, 16  ;;  %v4997_v57 = vld [vmem:[%s6529_s1 + $0x3c0] ss:$8 sps:$4 sm:$0xff]  }
  0xd7   : > { %1270 = vmatmul.mubr.bf16.gmra.mrb[8].mxu1 %v3898_v1  ;;  %v4385_v12 = vcombine.high %v6174_v41, %v6126_v62  ;;  %v4384_v21 = vcombine.low %v6174_v41, %v6126_v62  ;;  %v4983_v1 = vld [vmem:[%s6529_s1 + $0x3a0] ss:$8 sps:$4 sm:$0xff]  }
  0xd8   : > { %2712 = vmatmul.mubr.bf16.gmra.mrb[8].mxu0 %v4222_v17  ;;  %1557 = vmatpush1.bf16.msra.mxu1 %v4946_v15  ;;  %v4342_v17 = vld [vmem:[%s5283_s11 + $0x30] sm:$0xee]  ;;  %v4985_v15 = vld [vmem:[%s6529_s1 + $0x3a4] ss:$8 sps:$4 sm:$0xff]   ;;  %v2787_v22 = vrot.slane %v2785_v45, 4 }
  0xd9   : > { %3090 = vmatpush1.bf16.msra.mxu0 %v4949_v39  ;;  %1558 = vmatprep.subr.bf16.mxu1 %v4954_v13  ;;  %v4346_v0 = vrot.slane %v4342_v17, 9  ;;  %v4989_v39 = vld [vmem:[%s6529_s1 + $0x7a4] ss:$8 sps:$4 sm:$0xff]   ;;  %v5007_v17 = vld [vmem:[%s6529_s1 + $0x7d0] ss:$8 sps:$4 sm:$0xff]  }
  0xda   : > { %3091 = vmatprep.subr.bf16.mxu0 %v4957_v49  ;;  %1279 = vmatprep.mubr.bf16.mxu1 %v3901_v53  ;;  %v4999_v13 = vld [vmem:[%s6529_s1 + $0x3c4] ss:$8 sps:$4 sm:$0xff]   ;;  %v2794_v53 = vshll.u32 %v5989_v16, 16  ;;  %v5024_v45 = vld [vmem:[%s5283_s11 + $0x18] ss:$8 sps:$4 sm:$0xff]  }
  0xdb   : > { %2721 = vmatprep.mubr.bf16.mxu0 %v4225_v54  ;;  %v6157_v31 = vsel %vm5410_vm5, %v4346_v0, %v3188_v18  ;;  %v4964_v18 = vld [vmem:[%s6529_s1 + $0x370] ss:$8 sps:$4 sm:$0xff]   ;;  %v5003_v49 = vld [vmem:[%s6529_s1 + $0x7c4] ss:$8 sps:$4 sm:$0xff]   ;;  %v2798_v54 = vshrl.u32 %v5989_v16, 16 }
  0xdc   : > { %1559 = vmatpush1.bf16.msra.mxu1 %v4952_v47  ;;  %v4382_v10 = vcombine.low %v6157_v31, %v6099_v42  ;;  %v4383_v58 = vcombine.high %v6157_v31, %v6099_v42  ;;  %v2788_v47 = vshll.u32 %v5986_v43, 16  ;;  %v5006_v43 = vld [vmem:[%s6529_s1 + $0x3d4] ss:$8 sps:$4 sm:$0xff]   ;;  %v6266_v0 = vld [vmem:[%s5283_s11 + $0x68] sm:$0xff] }
  0xdd   : > { %3092 = vmatpush1.bf16.msra.mxu0 %v4955_v61  ;;  %1560 = vmatprep.subr.bf16.mxu1 %v4960_v38  ;;  %v5009_v16 = vld [vmem:[%s6529_s1 + $0x7d4] ss:$8 sps:$4 sm:$0xff]   ;;  %v2796_v61 = vrot.slane %v2794_v53, 5  ;;  %v2800_v38 = vrot.slane %v2798_v54, 4 }
  0xde   : > { %3093 = vmatprep.subr.bf16.mxu0 %v4963_v34  ;;  %v2790_v46 = vrot.slane %v2788_v47, 5  ;;  %v5004_v34 = vld [vmem:[%s6529_s1 + $0x3d0] ss:$8 sps:$4 sm:$0xff]   ;;  %v4302_v47 = vcombine.low %v6141_v35, %v6145_v52  ;;  %v3977_v52 = vcombine.high %v6026_v3, %v6029_v56 }
  0xdf   : > { %1280 = vmatmul.mubr.bf16.gmra.mrb[12].mxu1 %v3900_v37  ;;  %v5017_v37 = vld [vmem:[%s6529_s1 + $0x7e4] ss:$8 sps:$4 sm:$0xff]  }
  0xe0   : > { %2722 = vmatmul.mubr.bf16.gmra.mrb[12].mxu0 %v4224_v63  ;;  %1561 = vmatpush1.bf16.msra.mxu1 %v4958_v48  ;;  %v6263_v63 = vld [vmem:[%s5283_s11 + $0x60] sm:$0xff]  ;;  %v2791_v23 = vor.u32 %v2790_v46, %v2787_v22  ;;  %v2801_v48 = vor.u32 %v2800_v38, %v2796_v61 }
  0xe1   : > { %3094 = vmatpush1.bf16.msra.mxu0 %v4961_v60  ;;  %1562 = vmatprep.subr.bf16.mxu1 %v4966_v55  ;;  %v2804_v60 = vshll.u32 %v6102_v11, 16  ;;  %v2809_v55 = vshrl.u32 %v6263_v63, 16  ;;  %v5020_v11 = vld [vmem:[%s6529_s1 + $0x3f4] ss:$8 sps:$4 sm:$0xff]  }
  0xe2   : > { %3095 = vmatprep.subr.bf16.mxu0 %v4969_v5  ;;  %1580 = vmatprep.mubr.bf16.mxu1 %v5026_v6  ;;  %v2812_v5 = vshll.u32 %v6263_v63, 16  ;;  %v2818_v6 = vshll.u32 %v6266_v0, 16 }
  0xe3   : > { %3113 = vmatprep.mubr.bf16.mxu0 %v4303_v8  ;;  %v2822_v8 = vshrl.u32 %v6266_v0, 16 }
  0xe4   : > { %1563 = vmatpush1.bf16.msra.mxu1 %v4964_v18  ;;  %v5011_v18 = vld [vmem:[%s6529_s1 + $0x3e0] ss:$8 sps:$4 sm:$0xff]  }
  0xe5   : > { %3096 = vmatpush1.bf16.msra.mxu0 %v4967_v19  ;;  %1564 = vmatprep.subr.bf16.mxu1 %v4972_v20  ;;  %v5015_v19 = vld [vmem:[%s6529_s1 + $0x7e0] ss:$8 sps:$4 sm:$0xff]   ;;  %v5023_v20 = vld [vmem:[%s6529_s1 + $0x7f4] ss:$8 sps:$4 sm:$0xff]  }
  0xe6   : > { %3097 = vmatprep.subr.bf16.mxu0 %v4975_v25  ;;  %v2792_v25 = vrot.slane %v2791_v23, 4  ;;  %v3976_v23 = vcombine.low %v6026_v3, %v6029_v56  ;;  %v5040_v3 = vld [vmem:[%s6529_s1 + $0x834] ss:$8 sps:$4 sm:$0xff]  }
  0xe8   : > { %1565 = vmatpush1.bf16.msra.mxu1 %v4970_v26  ;;  %v2802_v26 = vrot.slane %v2801_v48, 4 }
  0xe9   : > { %3098 = vmatpush1.bf16.msra.mxu0 %v4973_v27  ;;  %1566 = vmatprep.subr.bf16.mxu1 %v4978_v29  ;;  %v2806_v27 = vrot.slane %v2804_v60, 5  ;;  %v6292_v29 = vld [vmem:[%s5283_s11 + $0x70] sm:$0x11] }
  0xea   : > { %3099 = vmatprep.subr.bf16.mxu0 %v4981_v32  ;;  %v2811_v32 = vrot.slane %v2809_v55, 4 }
  0xeb   : > { %v2807_v53 = vsel %vm5342_vm2, %v2802_v26, %v2806_v27  ;;  %v5043_v26 = vld [vmem:[%s6529_s1 + $0x844] ss:$8 sps:$4 sm:$0xff]  }
  0xec   : > { %1567 = vmatpush1.bf16.msra.mxu1 %v4976_v30  ;;  %v2814_v30 = vrot.slane %v2812_v5, 5 }
  0xed   : > { %3100 = vmatpush1.bf16.msra.mxu0 %v4979_v14  ;;  %1568 = vmatprep.subr.bf16.mxu1 %v4985_v15  ;;  %v2820_v14 = vrot.slane %v2818_v6, 5  ;;  %v2824_v15 = vrot.slane %v2822_v8, 4 }
  0xee   : > { %3101 = vmatprep.subr.bf16.mxu0 %v4989_v39  ;;  %v5018_v39 = vld [vmem:[%s6529_s1 + $0x3f0] ss:$8 sps:$4 sm:$0xff]   ;;  %v2815_v54 = vor.u32 %v2814_v30, %v2811_v32 }
  0xf0   : > { %1569 = vmatpush1.bf16.msra.mxu1 %v4983_v1  ;;  %v5021_v1 = vld [vmem:[%s6529_s1 + $0x7f0] ss:$8 sps:$4 sm:$0xff]  }
  0xf1   : > { %3102 = vmatpush1.bf16.msra.mxu0 %v4987_v2  ;;  %1570 = vmatprep.subr.bf16.mxu1 %v4992_v33  ;;  %v5029_v2 = vld [vmem:[%s6529_s1 + $0x804] ss:$8 sps:$4 sm:$0xff]   ;;  %v2833_v33 = vshrl.u32 %v6092_v24, 16 }
  0xf2   : > { %3103 = vmatprep.subr.bf16.mxu0 %v4995_v36  ;;  %v2836_v36 = vshll.u32 %v6092_v24, 16  ;;  %v5027_v24 = vld [vmem:[%s6529_s1 + $0x800] ss:$8 sps:$4 sm:$0xff]  }
  0xf4   : > { %1571 = vmatpush1.bf16.msra.mxu1 %v4990_v40  ;;  %v2797_v40 = vsel %vm5342_vm2, %v2792_v25, %v2796_v61  ;;  %v2838_v35 = vrot.slane %v2836_v36, 5  ;;  %v2816_v61 = vrot.slane %v2815_v54, 4  ;;  %v5038_v25 = vld [vmem:[%s6529_s1 + $0x830] ss:$8 sps:$4 sm:$0xff]   ;;  %v3205_v36 = vrot.slane %v6292_v29, 5 }
  0xf5   : > { %3104 = vmatpush1.bf16.msra.mxu0 %v4993_v7  ;;  %1572 = vmatprep.subr.bf16.mxu1 %v4999_v13  ;;  %v2828_v7 = vshll.u32 %v6292_v29, 16  ;;  %v2842_v13 = vshll.u32 %v6095_v4, 16  ;;  %v4304_v55 = vcombine.low %v2797_v40, %v2807_v53  ;;  %v5055_v54 = vld [vmem:[%s6529_s1 + $0x880] ss:$8 sps:$4 sm:$0xff]  }
  0xf6   : > { %3105 = vmatprep.subr.bf16.mxu0 %v5003_v49  ;;  %v2846_v49 = vshrl.u32 %v6095_v4, 16  ;;  %v2821_v5 = vsel %vm5342_vm2, %v2816_v61, %v2820_v14  ;;  %v5075_v61 = vld [vmem:[%s6529_s1 + $0x8e4] ss:$8 sps:$4 sm:$0xff]  }
  0xf7   : > { %v2844_v22 = vrot.slane %v2842_v13, 5 }
  0xf8   : > { %1573 = vmatpush1.bf16.msra.mxu1 %v4997_v57  ;;  %v2825_v57 = vor.u32 %v2824_v15, %v2820_v14  ;;  %v2848_v46 = vrot.slane %v2846_v49, 4  ;;  %v3202_v14 = vrot.slane %v6266_v0, 5  ;;  %v5041_v15 = vld [vmem:[%s6529_s1 + $0x840] ss:$8 sps:$4 sm:$0xff]  }
  0xf9   : > { %3106 = vmatpush1.bf16.msra.mxu0 %v5001_v44  ;;  %1574 = vmatprep.subr.bf16.mxu1 %v5006_v43  ;;  %v5032_v44 = vld [vmem:[%s6529_s1 + $0x814] ss:$8 sps:$4 sm:$0xff]   ;;  %v2835_v43 = vrot.slane %v2833_v33, 4 }
  0xfa   : > { %3107 = vmatprep.subr.bf16.mxu0 %v5009_v16  ;;  %v4305_v16 = vcombine.high %v2797_v40, %v2807_v53  ;;  %v2826_v38 = vrot.slane %v2825_v57, 4  ;;  %v2849_v60 = vor.u32 %v2848_v46, %v2844_v22  ;;  %v3204_v33 = vrot.slane %v3202_v14, 4  ;;  %v5044_v40 = vld [vmem:[%s6529_s1 + $0x850] ss:$8 sps:$4 sm:$0xff]   ;;  %v5057_v53 = vld [vmem:[%s6529_s1 + $0x884] ss:$8 sps:$4 sm:$0xff]  }
  0xfb   : > { %v2839_v48 = vor.u32 %v2838_v35, %v2835_v43  ;;  %v5060_v57 = vld [vmem:[%s6529_s1 + $0x894] ss:$8 sps:$4 sm:$0xff]   ;;  %v5064_v35 = vld [vmem:[%s6529_s1 + $0x8b0] ss:$8 sps:$4 sm:$0xff]  }
  0xfc   : > { %1575 = vmatpush1.bf16.msra.mxu1 %v5004_v34  ;;  %v2830_v34 = vrot.slane %v2828_v7, 5  ;;  %v5051_v7 = vld [vmem:[%s6529_s1 + $0x864] ss:$8 sps:$4 sm:$0xff]   ;;  %v6382_v49 = vsel %vm5410_vm5, %v3204_v33, %v3205_v36  ;;  %v5066_v43 = vld [vmem:[%s6529_s1 + $0x8b4] ss:$8 sps:$4 sm:$0xff]  }
  0xfd   : > { %3108 = vmatpush1.bf16.msra.mxu0 %v5007_v17  ;;  %1576 = vmatprep.subr.bf16.mxu1 %v5013_v28  ;;  %v5030_v17 = vld [vmem:[%s6529_s1 + $0x810] ss:$8 sps:$4 sm:$0xff]   ;;  %v6327_v28 = vld [vmem:[%s5283_s11 + $0x88] sm:$0x11] }
  0xfe   : > { %3109 = vmatprep.subr.bf16.mxu0 %v5017_v37  ;;  %v5037_v37 = vld [vmem:[%s6529_s1 + $0x824] ss:$8 sps:$4 sm:$0xff]   ;;  %v2831_v6 = vsel %vm5342_vm2, %v2826_v38, %v2830_v34  ;;  %v2852_v8 = vshll.u32 %v6327_v28, 16  ;;  %v5070_v46 = vld [vmem:[%s6529_s1 + $0x8d0] ss:$8 sps:$4 sm:$0xff]   ;;  %v3209_v38 = vrot.slane %v6095_v4, 5 }
  0xff   : > { %v4307_v56 = vcombine.high %v2821_v5, %v2831_v6  ;;  %v4306_v27 = vcombine.low %v2821_v5, %v2831_v6  ;;  %v4345_v34 = vld [vmem:[%s5283_s11 + $0x78] sm:$0xee] }
 0x100   : > { %1577 = vmatpush1.bf16.msra.mxu1 %v5011_v18  ;;  %v5035_v18 = vld [vmem:[%s6529_s1 + $0x820] ss:$8 sps:$4 sm:$0xff]   ;;  %v5076_v4 = vld [vmem:[%s6529_s1 + $0x8f0] ss:$8 sps:$4 sm:$0xff]  }
 0x101   : > { %3110 = vmatpush1.bf16.msra.mxu0 %v5015_v19  ;;  %1578 = vmatprep.subr.bf16.mxu1 %v5020_v11  ;;  %v2840_v19 = vrot.slane %v2839_v48, 4  ;;  %v2850_v11 = vrot.slane %v2849_v60, 4  ;;  %v3211_v48 = vrot.slane %v3209_v38, 4  ;;  %v3212_v60 = vrot.slane %v6327_v28, 5 }
 0x102   : > { %3111 = vmatprep.subr.bf16.mxu0 %v5023_v20  ;;  %v2854_v20 = vrot.slane %v2852_v8, 5 }
 0x103   : > { %v2845_v32 = vsel %vm5342_vm2, %v2840_v19, %v2844_v22  ;;  %v5072_v22 = vld [vmem:[%s6529_s1 + $0x8d4] ss:$8 sps:$4 sm:$0xff]   ;;  %v3213_v5 = vsel %vm5410_vm5, %v3211_v48, %v3212_v60 }
 0x104   : > { %1579 = vmatpush1.bf16.msra.mxu1 %v5018_v39  ;;  %v2855_v30 = vsel %vm5342_vm2, %v2850_v11, %v2854_v20  ;;  %v4344_v39 = vld [vmem:[%s5283_s11 + $0x60] sm:$0xee] }
 0x105   : > { %3112 = vmatpush1.bf16.msra.mxu0 %v5021_v1  ;;  %4441 = vmatprep.subr.bf16.mxu1 %v5029_v2  ;;  %v3981_v1 = vcombine.high %v6263_v63, %v6266_v0  ;;  %v4309_v9 = vcombine.high %v2845_v32, %v2855_v30  ;;  %v4308_v13 = vcombine.low %v2845_v32, %v2855_v30 }
 0x106   : > { %3439 = vmatprep.subr.bf16.mxu0 %v5029_v2  ;;  %v4348_v2 = vrot.slane %v4344_v39, 9 }
 0x107   : > { %1581 = vmatmul.mubr.bf16.vlgmr.msra.gmra.mrb[0].mxu1 %v5024_v45  ;;  %v5049_v45 = vld [vmem:[%s6529_s1 + $0x860] ss:$8 sps:$4 sm:$0xff]  }
 0x108   : > { %3114 = vmatmul.mubr.bf16.vlgmr.msra.gmra.mrb[0].mxu0 %v4302_v47  ;;  %4457 = vmatpush1.bf16.msra.mxu1 %v5027_v24  ;;  %v6378_v29 = vsel %vm5410_vm5, %v4348_v2, %v3202_v14  ;;  %v5052_v47 = vld [vmem:[%s6529_s1 + $0x870] ss:$8 sps:$4 sm:$0xff]  }
 0x109   : > { %3440 = vmatpush1.bf16.msra.mxu0 %v5027_v24  ;;  %4442 = vmatprep.subr.bf16.mxu1 %v5032_v44  ;;  %v5058_v24 = vld [vmem:[%s6529_s1 + $0x890] ss:$8 sps:$4 sm:$0xff]   ;;  %v4386_v6 = vcombine.low %v6378_v29, %v6382_v49 }
 0x10a   : > { %3441 = vmatprep.subr.bf16.mxu0 %v5032_v44  ;;  %1590 = vmatprep.mubr.bf16.mxu1 %v3977_v52  ;;  %v5061_v44 = vld [vmem:[%s6529_s1 + $0x8a0] ss:$8 sps:$4 sm:$0xff]   ;;  %v5069_v52 = vld [vmem:[%s6529_s1 + $0x8c4] ss:$8 sps:$4 sm:$0xff]  }
 0x10b   : > { %3123 = vmatprep.mubr.bf16.mxu0 %v4305_v16  ;;  %v5067_v16 = vld [vmem:[%s6529_s1 + $0x8c0] ss:$8 sps:$4 sm:$0xff]  }
 0x10c   : > { %4458 = vmatpush1.bf16.msra.mxu1 %v5030_v17 }
 0x10d   : > { %3442 = vmatpush1.bf16.msra.mxu0 %v5030_v17  ;;  %4443 = vmatprep.subr.bf16.mxu1 %v5037_v37  ;;  %v5073_v17 = vld [vmem:[%s6529_s1 + $0x8e0] ss:$8 sps:$4 sm:$0xff]  }
 0x10e   : > { %3443 = vmatprep.subr.bf16.mxu0 %v5037_v37  ;;  %v5078_v37 = vld [vmem:[%s6529_s1 + $0x8f4] ss:$8 sps:$4 sm:$0xff]  }
 0x10f   : > { %1591 = vmatmul.mubr.bf16.gmra.mrb[4].mxu1 %v3976_v23  ;;  %v4349_v23 = vrot.slane %v4345_v34, 9 }
 0x110   : > { %3124 = vmatmul.mubr.bf16.gmra.mrb[4].mxu0 %v4304_v55  ;;  %4459 = vmatpush1.bf16.msra.mxu1 %v5035_v18 }
 0x111   : > { %3444 = vmatpush1.bf16.msra.mxu0 %v5035_v18  ;;  %4444 = vmatprep.subr.bf16.mxu1 %v5040_v3  ;;  %v3210_v55 = vsel %vm5410_vm5, %v4349_v23, %v3209_v38 }
 0x112   : > { %3445 = vmatprep.subr.bf16.mxu0 %v5040_v3  ;;  %1600 = vmatprep.mubr.bf16.mxu1 %v6010_v59  ;;  %v5046_v59 = vld [vmem:[%s6529_s1 + $0x854] ss:$8 sps:$4 sm:$0xff]   ;;  %v4389_v28 = vcombine.high %v3210_v55, %v3213_v5  ;;  %v4388_v8 = vcombine.low %v3210_v55, %v3213_v5 }
 0x113   : > { %3133 = vmatprep.mubr.bf16.mxu0 %v4307_v56 }
 0x114   : > { %4460 = vmatpush1.bf16.msra.mxu1 %v5038_v25 }
 0x115   : > { %3446 = vmatpush1.bf16.msra.mxu0 %v5038_v25  ;;  %4445 = vmatprep.subr.bf16.mxu1 %v5043_v26 }
 0x116   : > { %3447 = vmatprep.subr.bf16.mxu0 %v5043_v26 }
 0x117   : > { %1601 = vmatmul.mubr.bf16.gmra.mrb[8].mxu1 %v6041_v51  ;;  %v3980_v51 = vcombine.low %v6263_v63, %v6266_v0  ;;  %v5054_v63 = vld [vmem:[%s6529_s1 + $0x874] ss:$8 sps:$4 sm:$0xff]   ;;  %v4387_v0 = vcombine.high %v6378_v29, %v6382_v49  ;;  %v3530_v29 = vlaneseq }
 0x118   : > { %3134 = vmatmul.mubr.bf16.gmra.mrb[8].mxu0 %v4306_v27  ;;  %4461 = vmatpush1.bf16.msra.mxu1 %v5041_v15 }
 0x119   : > { %3448 = vmatpush1.bf16.msra.mxu0 %v5041_v15  ;;  %4446 = vmatprep.subr.bf16.mxu1 %v5046_v59  ;;  %v3531_v49 = vshrl.u32 %v3530_v29, 7 }
 0x11a   : > { %3449 = vmatprep.subr.bf16.mxu0 %v5046_v59  ;;  %1610 = vmatprep.mubr.bf16.mxu1 %v3981_v1 }
 0x11b   : > { %3143 = vmatprep.mubr.bf16.mxu0 %v4309_v9 }
 0x11c   : > { %4462 = vmatpush1.bf16.msra.mxu1 %v5044_v40 }
 0x11d   : > { %3450 = vmatpush1.bf16.msra.mxu0 %v5044_v40  ;;  %4447 = vmatprep.subr.bf16.mxu1 %v5051_v7 }
 0x11e   : > { %3451 = vmatprep.subr.bf16.mxu0 %v5051_v7 }
 0x11f   : > { %1611 = vmatmul.mubr.bf16.gmra.mrb[12].mxu1 %v3980_v51 }
 0x120   : > { %3144 = vmatmul.mubr.bf16.gmra.mrb[12].mxu0 %v4308_v13  ;;  %4463 = vmatpush1.bf16.msra.mxu1 %v5049_v45 }
 0x121   : > { %3452 = vmatpush1.bf16.msra.mxu0 %v5049_v45  ;;  %4448 = vmatprep.subr.bf16.mxu1 %v5054_v63  ;;  %v3532_v45 = vsub.s32 0, %v3531_v49 }
 0x122   : > { %3453 = vmatprep.subr.bf16.mxu0 %v5054_v63  ;;  %3471 = vmatprep.mubr.bf16.mxu0 %v4383_v58  ;;  %v5063_v58 = vld [vmem:[%s6529_s1 + $0x8a4] ss:$8 sps:$4 sm:$0xff]   ;;  %v3528_v63 = vld [vmem:[%s6530_s2] sm:$0x3] }
 0x123   : > { %3491 = vmatprep.mubr.bf16.mxu1 %v4387_v0  ;;  %v3536_v0 = vsub.s32 1, %v3531_v49 }
 0x124   : > { %4464 = vmatpush1.bf16.msra.mxu1 %v5052_v47 }
 0x125   : > { %3454 = vmatpush1.bf16.msra.mxu0 %v5052_v47  ;;  %4449 = vmatprep.subr.bf16.mxu1 %v5057_v53  ;;  %v6479_v47 = vrot.slane %v3528_v63, %v3532_v45 }
 0x126   : > { %3455 = vmatprep.subr.bf16.mxu0 %v5057_v53 }
 0x128   : > { %4465 = vmatpush1.bf16.msra.mxu1 %v5055_v54 }
 0x129   : > { %3456 = vmatpush1.bf16.msra.mxu0 %v5055_v54  ;;  %4450 = vmatprep.subr.bf16.mxu1 %v5060_v57 }
 0x12a   : > { %3457 = vmatprep.subr.bf16.mxu0 %v5060_v57  ;;  %v6481_v57 = vrot.slane %v3528_v63, %v3536_v0 }
 0x12c   : > { %4466 = vmatpush1.bf16.msra.mxu1 %v5058_v24 }
 0x12d   : > { %3458 = vmatpush1.bf16.msra.mxu0 %v5058_v24  ;;  %4451 = vmatprep.subr.bf16.mxu1 %v5063_v58 }
 0x12e   : > { %3459 = vmatprep.subr.bf16.mxu0 %v5063_v58 }
 0x130   : > { %4467 = vmatpush1.bf16.msra.mxu1 %v5061_v44 }
 0x131   : > { %3460 = vmatpush1.bf16.msra.mxu0 %v5061_v44  ;;  %4452 = vmatprep.subr.bf16.mxu1 %v5066_v43 }
 0x132   : > { %3461 = vmatprep.subr.bf16.mxu0 %v5066_v43 }
 0x134   : > { %4468 = vmatpush1.bf16.msra.mxu1 %v5064_v35 }
 0x135   : > { %3462 = vmatpush1.bf16.msra.mxu0 %v5064_v35  ;;  %4453 = vmatprep.subr.bf16.mxu1 %v5069_v52 }
 0x136   : > { %3463 = vmatprep.subr.bf16.mxu0 %v5069_v52 }
 0x138   : > { %4469 = vmatpush1.bf16.msra.mxu1 %v5067_v16 }
 0x139   : > { %3464 = vmatpush1.bf16.msra.mxu0 %v5067_v16  ;;  %4454 = vmatprep.subr.bf16.mxu1 %v5072_v22 }
 0x13a   : > { %3465 = vmatprep.subr.bf16.mxu0 %v5072_v22 }
 0x13c   : > { %4470 = vmatpush1.bf16.msra.mxu1 %v5070_v46 }
 0x13d   : > { %3466 = vmatpush1.bf16.msra.mxu0 %v5070_v46  ;;  %4455 = vmatprep.subr.bf16.mxu1 %v5075_v61 }
 0x13e   : > { %3467 = vmatprep.subr.bf16.mxu0 %v5075_v61 }
 0x140   : > { %4471 = vmatpush1.bf16.msra.mxu1 %v5073_v17 }
 0x141   : > { %3468 = vmatpush1.bf16.msra.mxu0 %v5073_v17  ;;  %4456 = vmatprep.subr.bf16.mxu1 %v5078_v37 }
 0x142   : > { %3469 = vmatprep.subr.bf16.mxu0 %v5078_v37 }
 0x144   : > { %4472 = vmatpush1.bf16.msra.mxu1 %v5076_v4 }
 0x145   : > { %3470 = vmatpush1.bf16.msra.mxu0 %v5076_v4 }
 0x147   : > { %3492 = vmatmul.mubr.bf16.vlgmr.msra.gmra.mrb[16].mxu1 %v4386_v6 }
 0x148   : > { %3472 = vmatmul.mubr.bf16.vlgmr.msra.gmra.mrb[0].mxu0 %v4382_v10  ;;  %3501 = vmatprep.mubr.bf16.mxu1 %v4389_v28 }
 0x149   : > { %3481 = vmatprep.mubr.bf16.mxu0 %v4385_v12 }
 0x14f   : > { %3502 = vmatmul.mubr.bf16.gmra.mrb[20].mxu1 %v4388_v8 }
 0x150   : > { %3482 = vmatmul.mubr.bf16.gmra.mrb[4].mxu0 %v4384_v21 }
 0x1da   : > { %v1582_v50 = vpop.f32.mrb[0].mxu1 }
 0x1db   : > { %v1584_v18 = vpop.f32.mrb[1].mxu1 }
 0x1dc   : > { %v1586_v3 = vpop.f32.mrb[2].mxu1 }
 0x1dd   : > { %v1588_v56 = vpop.f32.mrb[3].mxu1 }
 0x1e2   : > { %v6464_v19 = vpop.f32.mrb[4].mxu1 }
 0x1e3   : > { %v6466_v42 = vpop.f32.mrb[5].mxu1 }
 0x1e4   : > { %v6468_v31 = vpop.f32.mrb[6].mxu1 }
 0x1e5   : > { %v6470_v10 = vpop.f32.mrb[7].mxu1 }
 0x1ea   : > { %v1602_v12 = vpop.f32.mrb[8].mxu1 }
 0x1eb   : > { %v3135_v11 = vpop.f32.mrb[8].mxu0  ;;  %v1604_v25 = vpop.f32.mrb[9].mxu1 }
 0x1ec   : > { %v4481_v20 = vadd.f32 %v3135_v11, %v1602_v12  ;;  %v3137_v26 = vpop.f32.mrb[9].mxu0  ;;  %v1606_v41 = vpop.f32.mrb[10].mxu1 }
 0x1ed   : > { %v4483_v62 = vadd.f32 %v3137_v26, %v1604_v25  ;;  %v3139_v21 = vpop.f32.mrb[10].mxu0  ;;  %v1608_v32 = vpop.f32.mrb[11].mxu1 }
 0x1ee   : > { %v4485_v27 = vadd.f32 %v3139_v21, %v1606_v41  ;;  %v3141_v30 = vpop.f32.mrb[11].mxu0 }
 0x1ef   : > { %v4487_v14 = vadd.f32 %v3141_v30, %v1608_v32 }
 0x1f2   : > { %v1612_v15 = vpop.f32.mrb[12].mxu1 }
 0x1f3   : > { %v3145_v39 = vpop.f32.mrb[12].mxu0  ;;  %v1614_v1 = vpop.f32.mrb[13].mxu1 }
 0x1f4   : > { %v4489_v59 = vadd.f32 %v3145_v39, %v1612_v15  ;;  %v3147_v9 = vpop.f32.mrb[13].mxu0  ;;  %v1616_v33 = vpop.f32.mrb[14].mxu1 }
 0x1f5   : > { %v4491_v2 = vadd.f32 %v3147_v9, %v1614_v1  ;;  %v3149_v36 = vpop.f32.mrb[14].mxu0  ;;  %v1618_v7 = vpop.f32.mrb[15].mxu1 }
 0x1f6   : > { %v6472_v40 = vadd.f32 %v3149_v36, %v1616_v33  ;;  %v3151_v51 = vpop.f32.mrb[15].mxu0 }
 0x1f7   : > { %v6474_v13 = vadd.f32 %v3151_v51, %v1618_v7 }
 0x21a   : > { %v3493_v54 = vpop.f32.mrb[16].mxu1 }
 0x21b   : > { %v3473_v53 = vpop.f32.mrb[0].mxu0  ;;  %v4482_v58 = vadd.f32 %v4481_v20, %v3493_v54  ;;  %v3495_v43 = vpop.f32.mrb[17].mxu1 }
 0x21c   : > { %v4473_v24 = vadd.f32 %v3473_v53, %v1582_v50  ;;  %v3475_v44 = vpop.f32.mrb[1].mxu0  ;;  %v4484_v52 = vadd.f32 %v4483_v62, %v3495_v43  ;;  %v3497_v22 = vpop.f32.mrb[18].mxu1 }
 0x21d   : > { %v4474_v35 = vadd.f32 %v3475_v44, %v1584_v18  ;;  %v3477_v16 = vpop.f32.mrb[2].mxu0  ;;  %v3548_v61 = vadd.f32 %v4482_v58, %v6479_v47  ;;  %v4486_v34 = vadd.f32 %v4485_v27, %v3497_v22  ;;  %v3499_v37 = vpop.f32.mrb[19].mxu1 }
 0x21e   : > { %v3540_v46 = vadd.f32 %v4473_v24, %v6479_v47  ;;  %v4475_v38 = vadd.f32 %v3477_v16, %v1586_v3  ;;  %v3479_v17 = vpop.f32.mrb[3].mxu0  ;;  %v3549_v48 = vadd.f32 %v4484_v52, %v6481_v57  ;;  %v4488_v4 = vadd.f32 %v4487_v14, %v3499_v37 }
 0x21f   : > { %v3541_v23 = vadd.f32 %v4474_v35, %v6481_v57  ;;  %v4476_v60 = vadd.f32 %v3479_v17, %v1588_v56  ;;  %v3564_v5 = vmax.f32 %v3548_v61, 0.0  ;;  %v3550_v28 = vadd.f32 %v4486_v34, %v6479_v47 }
 0x220   : > { %v3556_v55 = vmax.f32 %v3540_v46, 0.0  ;;  %v3542_v6 = vadd.f32 %v4475_v38, %v6479_v47  ;;  %v3565_v50 = vmax.f32 %v3549_v48, 0.0  ;;  %v3551_v3 = vadd.f32 %v4488_v4, %v6481_v57 }
 0x221   : > { %v3557_v8 = vmax.f32 %v3541_v23, 0.0  ;;  %v3543_v18 = vadd.f32 %v4476_v60, %v6481_v57  ;;  %v3566_v12 = vmax.f32 %v3550_v28, 0.0 }
 0x222   : > { %v3558_v56 = vmax.f32 %v3542_v6, 0.0  ;;  %v4437_v20 = vpack.c.bf16 %v3565_v50, %v3564_v5  ;;  %v3567_v26 = vmax.f32 %v3551_v3, 0.0  ;;  %v3503_v41 = vpop.f32.mrb[20].mxu1 }
 0x223   : > { %v4433_v11 = vpack.c.bf16 %v3557_v8, %v3556_v55  ;;  %v3559_v25 = vmax.f32 %v3543_v18, 0.0  ;;  %v3483_v62 = vpop.f32.mrb[4].mxu0  ;;  %v4490_v27 = vadd.f32 %v4489_v59, %v3503_v41  ;;  %v3505_v30 = vpop.f32.mrb[21].mxu1 }
 0x224   : > { %v4477_v21 = vadd.f32 %v3483_v62, %v6464_v19  ;;  %v3485_v32 = vpop.f32.mrb[5].mxu0  ;;  %3624 = vst [vmem:[%s6495_s23 + $0x20] sm:$0xff] %v4437_v20  ;;  %v4438_v15 = vpack.c.bf16 %v3567_v26, %v3566_v12  ;;  %v4492_v1 = vadd.f32 %v4491_v2, %v3505_v30  ;;  %v3507_v33 = vpop.f32.mrb[22].mxu1 }
 0x225   : > { %3620 = vst [vmem:[%s6495_s23] sm:$0xff] %v4433_v11  ;;  %v4434_v14 = vpack.c.bf16 %v3559_v25, %v3558_v56  ;;  %v4478_v39 = vadd.f32 %v3485_v32, %v6466_v42  ;;  %v3487_v9 = vpop.f32.mrb[6].mxu0  ;;  %v3552_v7 = vadd.f32 %v4490_v27, %v6479_v47  ;;  %v4494_v59 = vadd.f32 %v6472_v40, %v3507_v33  ;;  %v3509_v29 = vpop.f32.mrb[23].mxu1 }
 0x226   : > { %v3544_v36 = vadd.f32 %v4477_v21, %v6479_v47  ;;  %v4479_v19 = vadd.f32 %v3487_v9, %v6468_v31  ;;  %v3489_v51 = vpop.f32.mrb[7].mxu0  ;;  %3625 = vst [vmem:[%s6495_s23 + $0x28] sm:$0xff] %v4438_v15  ;;  %v3553_v45 = vadd.f32 %v4492_v1, %v6481_v57  ;;  %v4496_v2 = vadd.f32 %v6474_v13, %v3509_v29 }
 0x227   : > { %3621 = vst [vmem:[%s6495_s23 + $0x8] sm:$0xff] %v4434_v14  ;;  %v3545_v49 = vadd.f32 %v4478_v39, %v6481_v57  ;;  %v4480_v42 = vadd.f32 %v3489_v51, %v6470_v10  ;;  %v3568_v0 = vmax.f32 %v3552_v7, 0.0  ;;  %v3554_v40 = vadd.f32 %v4494_v59, %v6479_v47 }
 0x228   : > { %v3560_v63 = vmax.f32 %v3544_v36, 0.0  ;;  %v3546_v31 = vadd.f32 %v4479_v19, %v6479_v47  ;;  %v3569_v54 = vmax.f32 %v3553_v45, 0.0  ;;  %v3555_v58 = vadd.f32 %v4496_v2, %v6481_v57 }
 0x229   : > { %v3561_v53 = vmax.f32 %v3545_v49, 0.0  ;;  %v3547_v24 = vadd.f32 %v4480_v42, %v6481_v57  ;;  %v3570_v10 = vmax.f32 %v3554_v40, 0.0 }
 0x22a   : > { %v3562_v44 = vmax.f32 %v3546_v31, 0.0  ;;  %v4439_v35 = vpack.c.bf16 %v3569_v54, %v3568_v0  ;;  %v3571_v52 = vmax.f32 %v3555_v58, 0.0 }
 0x22b   : > { %v4435_v43 = vpack.c.bf16 %v3561_v53, %v3560_v63  ;;  %v3563_v13 = vmax.f32 %v3547_v24, 0.0 }
 0x22c   : > { %3626 = vst [vmem:[%s6495_s23 + $0x30] sm:$0xff] %v4439_v35  ;;  %v4440_v22 = vpack.c.bf16 %v3571_v52, %v3570_v10 }
 0x22d   : > { %3622 = vst [vmem:[%s6495_s23 + $0x10] sm:$0xff] %v4435_v43  ;;  %v4436_v16 = vpack.c.bf16 %v3563_v13, %v3562_v44 }
 0x22e   : > { %3627 = vst [vmem:[%s6495_s23 + $0x38] sm:$0xff] %v4440_v22 }
 0x22f   : > { %3623 = vst [vmem:[%s6495_s23 + $0x18] sm:$0xff] %v4436_v16 }
 0x230 PF: > { %s13_s14 = sadd.s32 1, %s5101_s14   ;;  %s6536_s12 = smov %s5097_s13 }
 0x231   : > { %p10_p5 = scmp.ge.s32.totalorder %s13_s14, 4   ;;  %s6537_s13 = smov %s6539_s15 }
 0x233   :  { %12 = sbr.rel (!%p10_p5) target bundleno = 2 (0x2), region = 78 }

</bundles_post_ra>
